<compile_context>
chip_gen: v5e
topology: v5e:2x2
jax: 0.10.0
libtpu: 0.0.40
codegen_flags: <defaults>
</compile_context>

<pallas_src>
import functools

import jax
import jax.numpy as jnp
from jax.experimental import pallas as pl
from jax.experimental.pallas import tpu as pltpu


# ---------------------------------------------------------------------------
# Pallas kernels
# ---------------------------------------------------------------------------
def _conv_kernel(*refs, tap_offsets, rows, apply_act, neg_slope, emit_stats):
    """Fused 4x4 conv for one image.

    Inputs : x (1, Ltot, Ct) bf16 flattened padded image, w (T, Ct, Cout) bf16,
             b (1, Cout) f32, [mask (rows, 1) f32 if emit_stats].
    Outputs: y (1, rows, Cout), [sum (1,1,Cout) f32, sumsq (1,1,Cout) f32].
    """
    if emit_stats:
        x_ref, w_ref, b_ref, mask_ref, y_ref, s_ref, q_ref = refs
    else:
        x_ref, w_ref, b_ref, y_ref = refs

    cout = y_ref.shape[-1]
    acc = jnp.zeros((rows, cout), jnp.float32)
    # Static unrolled loop over the 4 (space-to-depth) or 16 kernel taps.
    for t, off in enumerate(tap_offsets):
        a = x_ref[0, off:off + rows, :]                      # (rows, Ct) bf16
        acc = acc + jnp.dot(a, w_ref[t], preferred_element_type=jnp.float32)
    acc = acc + b_ref[...]                                   # (1, Cout) broadcast

    if emit_stats:
        masked = acc * mask_ref[...]                         # zero out junk columns
        s_ref[0] = jnp.sum(masked, axis=0, keepdims=True)
        q_ref[0] = jnp.sum(masked * acc, axis=0, keepdims=True)

    if apply_act:
        acc = jnp.where(acc >= 0.0, acc, neg_slope * acc)    # LeakyReLU(0.2)

    y_ref[0] = acc.astype(y_ref.dtype)


def _bn_apply_kernel(y_ref, scale_ref, shift_ref, o_ref, *, neg_slope):
    """Per-channel affine (precomputed BN scale/shift) + LeakyReLU, one image."""
    y = y_ref[0].astype(jnp.float32)                         # (L, C)
    out = y * scale_ref[...] + shift_ref[...]
    out = jnp.where(out >= 0.0, out, neg_slope * out)
    o_ref[0] = out.astype(o_ref.dtype)


# ---------------------------------------------------------------------------
# Conv wrapper: pad / space-to-depth glue + fused Pallas conv
# ---------------------------------------------------------------------------
def _weights_for_taps(w_t, stride, cin_p):
    """torch (Cout, Cin, 4, 4) -> (T, Ct, Cout) tap matrices + tap (dh, dw) offsets."""
    cout = w_t.shape[0]
    if stride == 2:
        taps, mats = [], []
        for ph in range(2):
            for pw in range(2):
                sub = w_t[:, :, 2 * ph:2 * ph + 2, 2 * pw:2 * pw + 2]  # (Cout,Cin,2,2)
                sub = jnp.transpose(sub, (2, 3, 1, 0))                 # (dy,dx,Cin,Cout)
                mats.append(sub.reshape(4 * cin_p, cout))
                taps.append((ph, pw))
        return jnp.stack(mats, axis=0), tuple(taps), 2
    taps = tuple((kh, kw) for kh in range(4) for kw in range(4))
    w_mat = jnp.transpose(w_t, (2, 3, 1, 0)).reshape(16, cin_p, cout)
    return w_mat, taps, 4


def conv4x4(x, w_t, b, *, stride, apply_act, emit_stats, out_dtype, neg_slope=0.2):
    """x: (N, H, W, Cin) NHWC activations; w_t: torch-layout (Cout, Cin, 4, 4); b: (Cout,)."""
    N, H, W, Cin = x.shape
    Cout = w_t.shape[0]

    # Zero-pad spatially (pad=1) and pad Cin up to a multiple of 8 (layer 0: 3 -> 8).
    cpad = (-Cin) % 8
    Cin_p = Cin + cpad
    xp = jnp.pad(x, ((0, 0), (1, 1), (1, 1), (0, cpad))).astype(jnp.bfloat16)
    if cpad:
        w_t = jnp.pad(w_t, ((0, 0), (0, cpad), (0, 0), (0, 0)))
    Hp, Wp = H + 2, W + 2

    if stride == 2:
        # Space-to-depth: 4x4/s2 conv == 2x2/s1 conv on (Hp/2, Wp/2, 4*Cin).
        xs = xp.reshape(N, Hp // 2, 2, Wp // 2, 2, Cin_p)
        xs = jnp.transpose(xs, (0, 1, 3, 2, 4, 5)).reshape(N, Hp // 2, Wp // 2, 4 * Cin_p)
    else:
        xs = xp

    w_mat, taps, kk = _weights_for_taps(w_t, stride, Cin_p)
    w_mat = w_mat.astype(jnp.bfloat16)
    Hin, Win, Ct = xs.shape[1], xs.shape[2], xs.shape[3]
    Hout, Wout = Hin - kk + 1, Win - kk + 1
    rows = Hout * Win                       # padded-width output rows per image
    T = w_mat.shape[0]
    tap_offsets = tuple(dh * Win + dw for (dh, dw) in taps)

    # Flatten (H, W) so every tap window is one contiguous slice; pad kk-1 rows of
    # slack so the last tap's slice stays in-bounds (those rows are masked junk).
    x2 = xs.reshape(N, Hin * Win, Ct)
    x2 = jnp.pad(x2, ((0, 0), (0, kk - 1), (0, 0)))
    Ltot = Hin * Win + kk - 1
    b2 = b.reshape(1, Cout).astype(jnp.float32)

    kernel = functools.partial(_conv_kernel, tap_offsets=tap_offsets, rows=rows,
                               apply_act=apply_act, neg_slope=neg_slope,
                               emit_stats=emit_stats)

    in_specs = [
        pl.BlockSpec((1, Ltot, Ct), lambda n: (n, 0, 0)),
        pl.BlockSpec((T, Ct, Cout), lambda n: (0, 0, 0)),
        pl.BlockSpec((1, Cout), lambda n: (0, 0)),
    ]
    inputs = [x2, w_mat, b2]
    if emit_stats:
        mask = ((jnp.arange(rows) % Win) < Wout).astype(jnp.float32).reshape(rows, 1)
        in_specs.append(pl.BlockSpec((rows, 1), lambda n: (0, 0)))
        inputs.append(mask)
        out_shape = (jax.ShapeDtypeStruct((N, rows, Cout), out_dtype),
                     jax.ShapeDtypeStruct((N, 1, Cout), jnp.float32),
                     jax.ShapeDtypeStruct((N, 1, Cout), jnp.float32))
        out_specs = (pl.BlockSpec((1, rows, Cout), lambda n: (n, 0, 0)),
                     pl.BlockSpec((1, 1, Cout), lambda n: (n, 0, 0)),
                     pl.BlockSpec((1, 1, Cout), lambda n: (n, 0, 0)))
    else:
        out_shape = jax.ShapeDtypeStruct((N, rows, Cout), out_dtype)
        out_specs = pl.BlockSpec((1, rows, Cout), lambda n: (n, 0, 0))

    # TODO(synk): for very large spatial sizes, additionally tile Hout (with halos)
    # instead of one whole image per grid step.
    res = pl.pallas_call(
        kernel,
        grid=(N,),
        in_specs=in_specs,
        out_specs=out_specs,
        out_shape=out_shape,
        compiler_params=pltpu.CompilerParams(
            dimension_semantics=("parallel",),
            vmem_limit_bytes=32 * 1024 * 1024),
    )(*inputs)

    dims = (Hout, Win, Wout, Cout)
    if emit_stats:
        y, s, q = res
        return y, dims, s, q
    return res, dims


def bn_apply_leaky(y, s, q, gamma, beta, *, count, eps=1e-5, neg_slope=0.2):
    """Training-mode BatchNorm (batch stats from fused conv epilogue) + LeakyReLU."""
    N, L, C = y.shape
    mean = jnp.sum(s, axis=(0, 1)) / count
    ex2 = jnp.sum(q, axis=(0, 1)) / count
    var = jnp.maximum(ex2 - mean * mean, 0.0)          # biased variance (train mode)
    scale_v = gamma * jax.lax.rsqrt(var + eps)
    shift_v = beta - mean * scale_v
    scale = scale_v.reshape(1, C).astype(jnp.float32)
    shift = shift_v.reshape(1, C).astype(jnp.float32)

    kernel = functools.partial(_bn_apply_kernel, neg_slope=neg_slope)
    return pl.pallas_call(
        kernel,
        grid=(N,),
        in_specs=[pl.BlockSpec((1, L, C), lambda n: (n, 0, 0)),
                  pl.BlockSpec((1, C), lambda n: (0, 0)),
                  pl.BlockSpec((1, C), lambda n: (0, 0))],
        out_specs=pl.BlockSpec((1, L, C), lambda n: (n, 0, 0)),
        out_shape=jax.ShapeDtypeStruct((N, L, C), jnp.bfloat16),
        compiler_params=pltpu.CompilerParams(dimension_semantics=("parallel",)),
    )(y, scale, shift)


# ---------------------------------------------------------------------------
# Discriminator_Patch forward
# ---------------------------------------------------------------------------
def make_params(key, input_nc, ndf, n_layers):
    """Deterministic synthetic parameters with the exact PyTorch shapes.

    Returns (cfg, weights): cfg is a static tuple of (stride, has_bn, has_act),
    weights is a list of dicts of arrays.
    """
    kw = 4
    cfg, weights = [], []

    def conv_p(k, cin, cout, use_bias):
        k1, k2 = jax.random.split(k)
        w = 0.02 * jax.random.normal(k1, (cout, cin, kw, kw), jnp.float32)
        b = (0.02 * jax.random.normal(k2, (cout,), jnp.float32)
             if use_bias else jnp.zeros((cout,), jnp.float32))
        return w, b

    keys = jax.random.split(key, n_layers + 2)
    use_bias = False  # norm_layer == nn.BatchNorm2d -> use_bias = False

    # layer 0: Conv(input_nc, ndf, s=2, bias=True) + LeakyReLU
    w, b = conv_p(keys[0], input_nc, ndf, True)
    cfg.append((2, False, True)); weights.append(dict(w=w, b=b))

    nf_mult = 1
    for n in range(1, n_layers):
        nf_prev, nf_mult = nf_mult, min(2 ** n, 8)
        w, b = conv_p(keys[n], ndf * nf_prev, ndf * nf_mult, use_bias)
        cfg.append((2, True, True))
        weights.append(dict(w=w, b=b,
                            gamma=jnp.ones((ndf * nf_mult,), jnp.float32),
                            beta=jnp.zeros((ndf * nf_mult,), jnp.float32)))

    nf_prev, nf_mult = nf_mult, min(2 ** n_layers, 8)
    w, b = conv_p(keys[n_layers], ndf * nf_prev, ndf * nf_mult, use_bias)
    cfg.append((1, True, True))
    weights.append(dict(w=w, b=b,
                        gamma=jnp.ones((ndf * nf_mult,), jnp.float32),
                        beta=jnp.zeros((ndf * nf_mult,), jnp.float32)))

    # final: Conv(ndf*nf_mult, 1, s=1, bias=True), no norm, no act
    w, b = conv_p(keys[n_layers + 1], ndf * nf_mult, 1, True)
    cfg.append((1, False, False)); weights.append(dict(w=w, b=b))
    return tuple(cfg), weights


def discriminator_patch_forward(x_nchw, weights, cfg):
    N = x_nchw.shape[0]
    x = jnp.transpose(x_nchw, (0, 2, 3, 1)).astype(jnp.bfloat16)   # NCHW -> NHWC
    for (stride, has_bn, has_act), p in zip(cfg, weights):
        is_last = (not has_bn) and (not has_act)
        out_dtype = jnp.float32 if is_last else jnp.bfloat16
        res = conv4x4(x, p["w"], p["b"], stride=stride,
                      apply_act=(has_act and not has_bn),
                      emit_stats=has_bn, out_dtype=out_dtype)
        if has_bn:
            y, (Hout, Win, Wout, Cout), s, q = res
            y = bn_apply_leaky(y, s, q, p["gamma"], p["beta"],
                               count=N * Hout * Wout)
        else:
            y, (Hout, Win, Wout, Cout) = res
        # Crop the padded-width junk columns; fuses with the next layer's pad/s2d.
        x = y.reshape(N, Hout, Win, Cout)[:, :, :Wout, :]
    return jnp.transpose(x.astype(jnp.float32), (0, 3, 1, 2))       # NHWC -> NCHW


# ---------------------------------------------------------------------------
if __name__ == "__main__":
    key = jax.random.PRNGKey(0)
    k_in, k_par = jax.random.split(key)

    # Small, module-consistent sizes: N=2, input_nc=3, 32x32 images, ndf=8, n_layers=3.
    input_nc, ndf, n_layers = 3, 8, 3
    x = jax.random.normal(k_in, (2, input_nc, 32, 32), jnp.float32)
    cfg, weights = make_params(k_par, input_nc, ndf, n_layers)

    fwd = jax.jit(functools.partial(discriminator_patch_forward, cfg=cfg))
    out = jax.block_until_ready(fwd(x, weights))

    # Expected PatchGAN output for 32x32 input: (2, 1, 2, 2)
    assert out.shape == (2, 1, 2, 2), out.shape
    assert bool(jnp.all(jnp.isfinite(out)))
    print("KERNEL_OK")
</pallas_src>

<mosaic_0001>
module attributes {stable_mosaic.version = 11 : i64} {
  func.func @_conv_kernel(%arg0: i32, %arg1: memref<1x290x32xbf16, #tpu.memory_space<vmem>>, %arg2: memref<4x32x8xbf16, #tpu.memory_space<vmem>>, %arg3: memref<1x8xf32, #tpu.memory_space<vmem>>, %arg4: memref<1x272x8xbf16, #tpu.memory_space<vmem>>) attributes {dimension_semantics = [#tpu.dimension_semantics<parallel>], iteration_bounds = array<i64: 2>, scalar_prefetch = 0 : i64, scratch_operands = 0 : i64, tpu.core_type = #tpu.core_type<tc>, window_params = [{transform_indices = @transform_0, window_bounds = array<i64: 1, 290, 32>}, {pipeline_mode = #tpu.pipeline_mode<synchronous>, transform_indices = @transform_1, window_bounds = array<i64: 4, 32, 8>}, {pipeline_mode = #tpu.pipeline_mode<synchronous>, transform_indices = @transform_2, window_bounds = array<i64: 1, 8>}, {transform_indices = @transform_3, window_bounds = array<i64: 1, 272, 8>}]} {
    %cst = arith.constant 0.000000e+00 : f32
    %0 = vector.broadcast %cst : f32 to vector<272x8xf32>
    %c0 = arith.constant 0 : index
    %c0_0 = arith.constant 0 : index
    %c0_1 = arith.constant 0 : index
    %1 = vector.load %arg1[%c0, %c0_0, %c0_1] : memref<1x290x32xbf16, #tpu.memory_space<vmem>>, vector<1x272x32xbf16>
    %2 = vector.shape_cast %1 : vector<1x272x32xbf16> to vector<272x32xbf16>
    %c0_2 = arith.constant 0 : index
    %c0_3 = arith.constant 0 : index
    %c0_4 = arith.constant 0 : index
    %3 = vector.load %arg2[%c0_2, %c0_3, %c0_4] : memref<4x32x8xbf16, #tpu.memory_space<vmem>>, vector<1x32x8xbf16>
    %4 = vector.shape_cast %3 : vector<1x32x8xbf16> to vector<32x8xbf16>
    %cst_5 = arith.constant dense<0.000000e+00> : vector<272x8xf32>
    %5 = tpu.matmul %2, %4, %cst_5 {dimension_numbers = #tpu.dot_dimension_numbers<[1], [0], [0], [1], [0, 0, 1, 1], [], []>} : vector<272x32xbf16>, vector<32x8xbf16>, vector<272x8xf32> -> vector<272x8xf32>
    %6 = arith.addf %0, %5 : vector<272x8xf32>
    %c0_6 = arith.constant 0 : index
    %c1 = arith.constant 1 : index
    %c0_7 = arith.constant 0 : index
    %7 = vector.load %arg1[%c0_6, %c1, %c0_7] : memref<1x290x32xbf16, #tpu.memory_space<vmem>>, vector<1x272x32xbf16>
    %8 = vector.shape_cast %7 : vector<1x272x32xbf16> to vector<272x32xbf16>
    %c1_8 = arith.constant 1 : index
    %c0_9 = arith.constant 0 : index
    %c0_10 = arith.constant 0 : index
    %9 = vector.load %arg2[%c1_8, %c0_9, %c0_10] : memref<4x32x8xbf16, #tpu.memory_space<vmem>>, vector<1x32x8xbf16>
    %10 = vector.shape_cast %9 : vector<1x32x8xbf16> to vector<32x8xbf16>
    %cst_11 = arith.constant dense<0.000000e+00> : vector<272x8xf32>
    %11 = tpu.matmul %8, %10, %cst_11 {dimension_numbers = #tpu.dot_dimension_numbers<[1], [0], [0], [1], [0, 0, 1, 1], [], []>} : vector<272x32xbf16>, vector<32x8xbf16>, vector<272x8xf32> -> vector<272x8xf32>
    %12 = arith.addf %6, %11 : vector<272x8xf32>
    %c0_12 = arith.constant 0 : index
    %c17 = arith.constant 17 : index
    %c0_13 = arith.constant 0 : index
    %13 = vector.load %arg1[%c0_12, %c17, %c0_13] : memref<1x290x32xbf16, #tpu.memory_space<vmem>>, vector<1x272x32xbf16>
    %14 = vector.shape_cast %13 : vector<1x272x32xbf16> to vector<272x32xbf16>
    %c2 = arith.constant 2 : index
    %c0_14 = arith.constant 0 : index
    %c0_15 = arith.constant 0 : index
    %15 = vector.load %arg2[%c2, %c0_14, %c0_15] : memref<4x32x8xbf16, #tpu.memory_space<vmem>>, vector<1x32x8xbf16>
    %16 = vector.shape_cast %15 : vector<1x32x8xbf16> to vector<32x8xbf16>
    %cst_16 = arith.constant dense<0.000000e+00> : vector<272x8xf32>
    %17 = tpu.matmul %14, %16, %cst_16 {dimension_numbers = #tpu.dot_dimension_numbers<[1], [0], [0], [1], [0, 0, 1, 1], [], []>} : vector<272x32xbf16>, vector<32x8xbf16>, vector<272x8xf32> -> vector<272x8xf32>
    %18 = arith.addf %12, %17 : vector<272x8xf32>
    %c0_17 = arith.constant 0 : index
    %c18 = arith.constant 18 : index
    %c0_18 = arith.constant 0 : index
    %19 = vector.load %arg1[%c0_17, %c18, %c0_18] : memref<1x290x32xbf16, #tpu.memory_space<vmem>>, vector<1x272x32xbf16>
    %20 = vector.shape_cast %19 : vector<1x272x32xbf16> to vector<272x32xbf16>
    %c3 = arith.constant 3 : index
    %c0_19 = arith.constant 0 : index
    %c0_20 = arith.constant 0 : index
    %21 = vector.load %arg2[%c3, %c0_19, %c0_20] : memref<4x32x8xbf16, #tpu.memory_space<vmem>>, vector<1x32x8xbf16>
    %22 = vector.shape_cast %21 : vector<1x32x8xbf16> to vector<32x8xbf16>
    %cst_21 = arith.constant dense<0.000000e+00> : vector<272x8xf32>
    %23 = tpu.matmul %20, %22, %cst_21 {dimension_numbers = #tpu.dot_dimension_numbers<[1], [0], [0], [1], [0, 0, 1, 1], [], []>} : vector<272x32xbf16>, vector<32x8xbf16>, vector<272x8xf32> -> vector<272x8xf32>
    %24 = arith.addf %18, %23 : vector<272x8xf32>
    %c0_22 = arith.constant 0 : index
    %c0_23 = arith.constant 0 : index
    %25 = vector.load %arg3[%c0_22, %c0_23] : memref<1x8xf32, #tpu.memory_space<vmem>>, vector<1x8xf32>
    %26 = vector.broadcast %25 : vector<1x8xf32> to vector<272x8xf32>
    %27 = arith.addf %24, %26 : vector<272x8xf32>
    %cst_24 = arith.constant 0.000000e+00 : f32
    %28 = vector.broadcast %cst_24 : f32 to vector<272x8xf32>
    %29 = arith.cmpf oge, %27, %28 : vector<272x8xf32>
    %cst_25 = arith.constant 2.000000e-01 : f32
    %30 = vector.broadcast %cst_25 : f32 to vector<272x8xf32>
    %31 = arith.mulf %30, %27 : vector<272x8xf32>
    %32 = arith.select %29, %27, %31 : vector<272x8xi1>, vector<272x8xf32>
    %33 = arith.truncf %32 : vector<272x8xf32> to vector<272x8xbf16>
    %c0_26 = arith.constant 0 : index
    %c0_27 = arith.constant 0 : index
    %c0_28 = arith.constant 0 : index
    %34 = vector.load %arg4[%c0_26, %c0_27, %c0_28] : memref<1x272x8xbf16, #tpu.memory_space<vmem>>, vector<1x272x8xbf16>
    %35 = vector.shape_cast %34 : vector<1x272x8xbf16> to vector<272x8xbf16>
    %36 = vector.shape_cast %33 : vector<272x8xbf16> to vector<1x272x8xbf16>
    tpu.vector_store %arg4[%c0_26, %c0_27, %c0_28], %36 {strides = array<i32>} : memref<1x272x8xbf16, #tpu.memory_space<vmem>>, vector<1x272x8xbf16>,
    return
  }
  func.func @transform_0(%arg0: i32) -> (i32, i32, i32) {
    %c0_i32 = arith.constant 0 : i32
    %c0_i32_0 = arith.constant 0 : i32
    %c0_i32_1 = arith.constant 0 : i32
    return %arg0, %c0_i32, %c0_i32_0 : i32, i32, i32
  }
  func.func @transform_1(%arg0: i32) -> (i32, i32, i32) {
    %c0_i32 = arith.constant 0 : i32
    %c0_i32_0 = arith.constant 0 : i32
    %c0_i32_1 = arith.constant 0 : i32
    %c0_i32_2 = arith.constant 0 : i32
    return %c0_i32, %c0_i32_0, %c0_i32_1 : i32, i32, i32
  }
  func.func @transform_2(%arg0: i32) -> (i32, i32) {
    %c0_i32 = arith.constant 0 : i32
    %c0_i32_0 = arith.constant 0 : i32
    %c0_i32_1 = arith.constant 0 : i32
    return %c0_i32, %c0_i32_0 : i32, i32
  }
  func.func @transform_3(%arg0: i32) -> (i32, i32, i32) {
    %c0_i32 = arith.constant 0 : i32
    %c0_i32_0 = arith.constant 0 : i32
    %c0_i32_1 = arith.constant 0 : i32
    return %arg0, %c0_i32, %c0_i32_0 : i32, i32, i32
  }
}

module attributes {stable_mosaic.version = 11 : i64} {
  func.func @_conv_kernel(%arg0: i32, %arg1: memref<1x82x32xbf16, #tpu.memory_space<vmem>>, %arg2: memref<4x32x16xbf16, #tpu.memory_space<vmem>>, %arg3: memref<1x16xf32, #tpu.memory_space<vmem>>, %arg4: memref<72x1xf32, #tpu.memory_space<vmem>>, %arg5: memref<1x72x16xbf16, #tpu.memory_space<vmem>>, %arg6: memref<1x1x16xf32, #tpu.memory_space<vmem>>, %arg7: memref<1x1x16xf32, #tpu.memory_space<vmem>>) attributes {dimension_semantics = [#tpu.dimension_semantics<parallel>], iteration_bounds = array<i64: 2>, scalar_prefetch = 0 : i64, scratch_operands = 0 : i64, tpu.core_type = #tpu.core_type<tc>, window_params = [{transform_indices = @transform_0, window_bounds = array<i64: 1, 82, 32>}, {pipeline_mode = #tpu.pipeline_mode<synchronous>, transform_indices = @transform_1, window_bounds = array<i64: 4, 32, 16>}, {pipeline_mode = #tpu.pipeline_mode<synchronous>, transform_indices = @transform_2, window_bounds = array<i64: 1, 16>}, {pipeline_mode = #tpu.pipeline_mode<synchronous>, transform_indices = @transform_3, window_bounds = array<i64: 72, 1>}, {transform_indices = @transform_4, window_bounds = array<i64: 1, 72, 16>}, {transform_indices = @transform_5, window_bounds = array<i64: 1, 1, 16>}, {transform_indices = @transform_6, window_bounds = array<i64: 1, 1, 16>}]} {
    %cst = arith.constant 0.000000e+00 : f32
    %0 = vector.broadcast %cst : f32 to vector<72x16xf32>
    %c0 = arith.constant 0 : index
    %c0_0 = arith.constant 0 : index
    %c0_1 = arith.constant 0 : index
    %1 = vector.load %arg1[%c0, %c0_0, %c0_1] : memref<1x82x32xbf16, #tpu.memory_space<vmem>>, vector<1x72x32xbf16>
    %2 = vector.shape_cast %1 : vector<1x72x32xbf16> to vector<72x32xbf16>
    %c0_2 = arith.constant 0 : index
    %c0_3 = arith.constant 0 : index
    %c0_4 = arith.constant 0 : index
    %3 = vector.load %arg2[%c0_2, %c0_3, %c0_4] : memref<4x32x16xbf16, #tpu.memory_space<vmem>>, vector<1x32x16xbf16>
    %4 = vector.shape_cast %3 : vector<1x32x16xbf16> to vector<32x16xbf16>
    %cst_5 = arith.constant dense<0.000000e+00> : vector<72x16xf32>
    %5 = tpu.matmul %2, %4, %cst_5 {dimension_numbers = #tpu.dot_dimension_numbers<[1], [0], [0], [1], [0, 0, 1, 1], [], []>} : vector<72x32xbf16>, vector<32x16xbf16>, vector<72x16xf32> -> vector<72x16xf32>
    %6 = arith.addf %0, %5 : vector<72x16xf32>
    %c0_6 = arith.constant 0 : index
    %c1 = arith.constant 1 : index
    %c0_7 = arith.constant 0 : index
    %7 = vector.load %arg1[%c0_6, %c1, %c0_7] : memref<1x82x32xbf16, #tpu.memory_space<vmem>>, vector<1x72x32xbf16>
    %8 = vector.shape_cast %7 : vector<1x72x32xbf16> to vector<72x32xbf16>
    %c1_8 = arith.constant 1 : index
    %c0_9 = arith.constant 0 : index
    %c0_10 = arith.constant 0 : index
    %9 = vector.load %arg2[%c1_8, %c0_9, %c0_10] : memref<4x32x16xbf16, #tpu.memory_space<vmem>>, vector<1x32x16xbf16>
    %10 = vector.shape_cast %9 : vector<1x32x16xbf16> to vector<32x16xbf16>
    %cst_11 = arith.constant dense<0.000000e+00> : vector<72x16xf32>
    %11 = tpu.matmul %8, %10, %cst_11 {dimension_numbers = #tpu.dot_dimension_numbers<[1], [0], [0], [1], [0, 0, 1, 1], [], []>} : vector<72x32xbf16>, vector<32x16xbf16>, vector<72x16xf32> -> vector<72x16xf32>
    %12 = arith.addf %6, %11 : vector<72x16xf32>
    %c0_12 = arith.constant 0 : index
    %c9 = arith.constant 9 : index
    %c0_13 = arith.constant 0 : index
    %13 = vector.load %arg1[%c0_12, %c9, %c0_13] : memref<1x82x32xbf16, #tpu.memory_space<vmem>>, vector<1x72x32xbf16>
    %14 = vector.shape_cast %13 : vector<1x72x32xbf16> to vector<72x32xbf16>
    %c2 = arith.constant 2 : index
    %c0_14 = arith.constant 0 : index
    %c0_15 = arith.constant 0 : index
    %15 = vector.load %arg2[%c2, %c0_14, %c0_15] : memref<4x32x16xbf16, #tpu.memory_space<vmem>>, vector<1x32x16xbf16>
    %16 = vector.shape_cast %15 : vector<1x32x16xbf16> to vector<32x16xbf16>
    %cst_16 = arith.constant dense<0.000000e+00> : vector<72x16xf32>
    %17 = tpu.matmul %14, %16, %cst_16 {dimension_numbers = #tpu.dot_dimension_numbers<[1], [0], [0], [1], [0, 0, 1, 1], [], []>} : vector<72x32xbf16>, vector<32x16xbf16>, vector<72x16xf32> -> vector<72x16xf32>
    %18 = arith.addf %12, %17 : vector<72x16xf32>
    %c0_17 = arith.constant 0 : index
    %c10 = arith.constant 10 : index
    %c0_18 = arith.constant 0 : index
    %19 = vector.load %arg1[%c0_17, %c10, %c0_18] : memref<1x82x32xbf16, #tpu.memory_space<vmem>>, vector<1x72x32xbf16>
    %20 = vector.shape_cast %19 : vector<1x72x32xbf16> to vector<72x32xbf16>
    %c3 = arith.constant 3 : index
    %c0_19 = arith.constant 0 : index
    %c0_20 = arith.constant 0 : index
    %21 = vector.load %arg2[%c3, %c0_19, %c0_20] : memref<4x32x16xbf16, #tpu.memory_space<vmem>>, vector<1x32x16xbf16>
    %22 = vector.shape_cast %21 : vector<1x32x16xbf16> to vector<32x16xbf16>
    %cst_21 = arith.constant dense<0.000000e+00> : vector<72x16xf32>
    %23 = tpu.matmul %20, %22, %cst_21 {dimension_numbers = #tpu.dot_dimension_numbers<[1], [0], [0], [1], [0, 0, 1, 1], [], []>} : vector<72x32xbf16>, vector<32x16xbf16>, vector<72x16xf32> -> vector<72x16xf32>
    %24 = arith.addf %18, %23 : vector<72x16xf32>
    %c0_22 = arith.constant 0 : index
    %c0_23 = arith.constant 0 : index
    %25 = vector.load %arg3[%c0_22, %c0_23] : memref<1x16xf32, #tpu.memory_space<vmem>>, vector<1x16xf32>
    %26 = vector.broadcast %25 : vector<1x16xf32> to vector<72x16xf32>
    %27 = arith.addf %24, %26 : vector<72x16xf32>
    %c0_24 = arith.constant 0 : index
    %c0_25 = arith.constant 0 : index
    %28 = vector.load %arg4[%c0_24, %c0_25] : memref<72x1xf32, #tpu.memory_space<vmem>>, vector<72x1xf32>
    %29 = vector.broadcast %28 : vector<72x1xf32> to vector<72x16xf32>
    %30 = arith.mulf %27, %29 : vector<72x16xf32>
    %cst_26 = arith.constant dense<0.000000e+00> : vector<16xf32>
    %31 = vector.multi_reduction <add>, %30, %cst_26 [0] : vector<72x16xf32> to vector<16xf32>
    %32 = vector.shape_cast %31 : vector<16xf32> to vector<1x16xf32>
    %c0_27 = arith.constant 0 : index
    %c0_28 = arith.constant 0 : index
    %c0_29 = arith.constant 0 : index
    %33 = vector.load %arg6[%c0_27, %c0_28, %c0_29] : memref<1x1x16xf32, #tpu.memory_space<vmem>>, vector<1x1x16xf32>
    %34 = vector.shape_cast %33 : vector<1x1x16xf32> to vector<1x16xf32>
    %35 = vector.shape_cast %32 : vector<1x16xf32> to vector<1x1x16xf32>
    tpu.vector_store %arg6[%c0_27, %c0_28, %c0_29], %35 {strides = array<i32>} : memref<1x1x16xf32, #tpu.memory_space<vmem>>, vector<1x1x16xf32>,
    %36 = arith.mulf %30, %27 : vector<72x16xf32>
    %cst_30 = arith.constant dense<0.000000e+00> : vector<16xf32>
    %37 = vector.multi_reduction <add>, %36, %cst_30 [0] : vector<72x16xf32> to vector<16xf32>
    %38 = vector.shape_cast %37 : vector<16xf32> to vector<1x16xf32>
    %c0_31 = arith.constant 0 : index
    %c0_32 = arith.constant 0 : index
    %c0_33 = arith.constant 0 : index
    %39 = vector.load %arg7[%c0_31, %c0_32, %c0_33] : memref<1x1x16xf32, #tpu.memory_space<vmem>>, vector<1x1x16xf32>
    %40 = vector.shape_cast %39 : vector<1x1x16xf32> to vector<1x16xf32>
    %41 = vector.shape_cast %38 : vector<1x16xf32> to vector<1x1x16xf32>
    tpu.vector_store %arg7[%c0_31, %c0_32, %c0_33], %41 {strides = array<i32>} : memref<1x1x16xf32, #tpu.memory_space<vmem>>, vector<1x1x16xf32>,
    %42 = arith.truncf %27 : vector<72x16xf32> to vector<72x16xbf16>
    %c0_34 = arith.constant 0 : index
    %c0_35 = arith.constant 0 : index
    %c0_36 = arith.constant 0 : index
    %43 = vector.load %arg5[%c0_34, %c0_35, %c0_36] : memref<1x72x16xbf16, #tpu.memory_space<vmem>>, vector<1x72x16xbf16>
    %44 = vector.shape_cast %43 : vector<1x72x16xbf16> to vector<72x16xbf16>
    %45 = vector.shape_cast %42 : vector<72x16xbf16> to vector<1x72x16xbf16>
    tpu.vector_store %arg5[%c0_34, %c0_35, %c0_36], %45 {strides = array<i32>} : memref<1x72x16xbf16, #tpu.memory_space<vmem>>, vector<1x72x16xbf16>,
    return
  }
  func.func @transform_0(%arg0: i32) -> (i32, i32, i32) {
    %c0_i32 = arith.constant 0 : i32
    %c0_i32_0 = arith.constant 0 : i32
    %c0_i32_1 = arith.constant 0 : i32
    return %arg0, %c0_i32, %c0_i32_0 : i32, i32, i32
  }
  func.func @transform_1(%arg0: i32) -> (i32, i32, i32) {
    %c0_i32 = arith.constant 0 : i32
    %c0_i32_0 = arith.constant 0 : i32
    %c0_i32_1 = arith.constant 0 : i32
    %c0_i32_2 = arith.constant 0 : i32
    return %c0_i32, %c0_i32_0, %c0_i32_1 : i32, i32, i32
  }
  func.func @transform_2(%arg0: i32) -> (i32, i32) {
    %c0_i32 = arith.constant 0 : i32
    %c0_i32_0 = arith.constant 0 : i32
    %c0_i32_1 = arith.constant 0 : i32
    return %c0_i32, %c0_i32_0 : i32, i32
  }
  func.func @transform_3(%arg0: i32) -> (i32, i32) {
    %c0_i32 = arith.constant 0 : i32
    %c0_i32_0 = arith.constant 0 : i32
    %c0_i32_1 = arith.constant 0 : i32
    return %c0_i32, %c0_i32_0 : i32, i32
  }
  func.func @transform_4(%arg0: i32) -> (i32, i32, i32) {
    %c0_i32 = arith.constant 0 : i32
    %c0_i32_0 = arith.constant 0 : i32
    %c0_i32_1 = arith.constant 0 : i32
    return %arg0, %c0_i32, %c0_i32_0 : i32, i32, i32
  }
  func.func @transform_5(%arg0: i32) -> (i32, i32, i32) {
    %c0_i32 = arith.constant 0 : i32
    %c0_i32_0 = arith.constant 0 : i32
    %c0_i32_1 = arith.constant 0 : i32
    return %arg0, %c0_i32, %c0_i32_0 : i32, i32, i32
  }
  func.func @transform_6(%arg0: i32) -> (i32, i32, i32) {
    %c0_i32 = arith.constant 0 : i32
    %c0_i32_0 = arith.constant 0 : i32
    %c0_i32_1 = arith.constant 0 : i32
    return %arg0, %c0_i32, %c0_i32_0 : i32, i32, i32
  }
}

module attributes {stable_mosaic.version = 11 : i64} {
  func.func @_bn_apply_kernel(%arg0: i32, %arg1: memref<1x72x16xbf16, #tpu.memory_space<vmem>>, %arg2: memref<1x16xf32, #tpu.memory_space<vmem>>, %arg3: memref<1x16xf32, #tpu.memory_space<vmem>>, %arg4: memref<1x72x16xbf16, #tpu.memory_space<vmem>>) attributes {dimension_semantics = [#tpu.dimension_semantics<parallel>], iteration_bounds = array<i64: 2>, scalar_prefetch = 0 : i64, scratch_operands = 0 : i64, tpu.core_type = #tpu.core_type<tc>, window_params = [{transform_indices = @transform_0, window_bounds = array<i64: 1, 72, 16>}, {pipeline_mode = #tpu.pipeline_mode<synchronous>, transform_indices = @transform_1, window_bounds = array<i64: 1, 16>}, {pipeline_mode = #tpu.pipeline_mode<synchronous>, transform_indices = @transform_2, window_bounds = array<i64: 1, 16>}, {transform_indices = @transform_3, window_bounds = array<i64: 1, 72, 16>}]} {
    %c0 = arith.constant 0 : index
    %c0_0 = arith.constant 0 : index
    %c0_1 = arith.constant 0 : index
    %0 = vector.load %arg1[%c0, %c0_0, %c0_1] : memref<1x72x16xbf16, #tpu.memory_space<vmem>>, vector<1x72x16xbf16>
    %1 = vector.shape_cast %0 : vector<1x72x16xbf16> to vector<72x16xbf16>
    %2 = arith.extf %1 : vector<72x16xbf16> to vector<72x16xf32>
    %c0_2 = arith.constant 0 : index
    %c0_3 = arith.constant 0 : index
    %3 = vector.load %arg2[%c0_2, %c0_3] : memref<1x16xf32, #tpu.memory_space<vmem>>, vector<1x16xf32>
    %4 = vector.broadcast %3 : vector<1x16xf32> to vector<72x16xf32>
    %5 = arith.mulf %2, %4 : vector<72x16xf32>
    %c0_4 = arith.constant 0 : index
    %c0_5 = arith.constant 0 : index
    %6 = vector.load %arg3[%c0_4, %c0_5] : memref<1x16xf32, #tpu.memory_space<vmem>>, vector<1x16xf32>
    %7 = vector.broadcast %6 : vector<1x16xf32> to vector<72x16xf32>
    %8 = arith.addf %5, %7 : vector<72x16xf32>
    %cst = arith.constant 0.000000e+00 : f32
    %9 = vector.broadcast %cst : f32 to vector<72x16xf32>
    %10 = arith.cmpf oge, %8, %9 : vector<72x16xf32>
    %cst_6 = arith.constant 2.000000e-01 : f32
    %11 = vector.broadcast %cst_6 : f32 to vector<72x16xf32>
    %12 = arith.mulf %11, %8 : vector<72x16xf32>
    %13 = arith.select %10, %8, %12 : vector<72x16xi1>, vector<72x16xf32>
    %14 = arith.truncf %13 : vector<72x16xf32> to vector<72x16xbf16>
    %c0_7 = arith.constant 0 : index
    %c0_8 = arith.constant 0 : index
    %c0_9 = arith.constant 0 : index
    %15 = vector.load %arg4[%c0_7, %c0_8, %c0_9] : memref<1x72x16xbf16, #tpu.memory_space<vmem>>, vector<1x72x16xbf16>
    %16 = vector.shape_cast %15 : vector<1x72x16xbf16> to vector<72x16xbf16>
    %17 = vector.shape_cast %14 : vector<72x16xbf16> to vector<1x72x16xbf16>
    tpu.vector_store %arg4[%c0_7, %c0_8, %c0_9], %17 {strides = array<i32>} : memref<1x72x16xbf16, #tpu.memory_space<vmem>>, vector<1x72x16xbf16>,
    return
  }
  func.func @transform_0(%arg0: i32) -> (i32, i32, i32) {
    %c0_i32 = arith.constant 0 : i32
    %c0_i32_0 = arith.constant 0 : i32
    %c0_i32_1 = arith.constant 0 : i32
    return %arg0, %c0_i32, %c0_i32_0 : i32, i32, i32
  }
  func.func @transform_1(%arg0: i32) -> (i32, i32) {
    %c0_i32 = arith.constant 0 : i32
    %c0_i32_0 = arith.constant 0 : i32
    %c0_i32_1 = arith.constant 0 : i32
    return %c0_i32, %c0_i32_0 : i32, i32
  }
  func.func @transform_2(%arg0: i32) -> (i32, i32) {
    %c0_i32 = arith.constant 0 : i32
    %c0_i32_0 = arith.constant 0 : i32
    %c0_i32_1 = arith.constant 0 : i32
    return %c0_i32, %c0_i32_0 : i32, i32
  }
  func.func @transform_3(%arg0: i32) -> (i32, i32, i32) {
    %c0_i32 = arith.constant 0 : i32
    %c0_i32_0 = arith.constant 0 : i32
    %c0_i32_1 = arith.constant 0 : i32
    return %arg0, %c0_i32, %c0_i32_0 : i32, i32, i32
  }
}

module attributes {stable_mosaic.version = 11 : i64} {
  func.func @_conv_kernel(%arg0: i32, %arg1: memref<1x26x64xbf16, #tpu.memory_space<vmem>>, %arg2: memref<4x64x32xbf16, #tpu.memory_space<vmem>>, %arg3: memref<1x32xf32, #tpu.memory_space<vmem>>, %arg4: memref<20x1xf32, #tpu.memory_space<vmem>>, %arg5: memref<1x20x32xbf16, #tpu.memory_space<vmem>>, %arg6: memref<1x1x32xf32, #tpu.memory_space<vmem>>, %arg7: memref<1x1x32xf32, #tpu.memory_space<vmem>>) attributes {dimension_semantics = [#tpu.dimension_semantics<parallel>], iteration_bounds = array<i64: 2>, scalar_prefetch = 0 : i64, scratch_operands = 0 : i64, tpu.core_type = #tpu.core_type<tc>, window_params = [{transform_indices = @transform_0, window_bounds = array<i64: 1, 26, 64>}, {pipeline_mode = #tpu.pipeline_mode<synchronous>, transform_indices = @transform_1, window_bounds = array<i64: 4, 64, 32>}, {pipeline_mode = #tpu.pipeline_mode<synchronous>, transform_indices = @transform_2, window_bounds = array<i64: 1, 32>}, {pipeline_mode = #tpu.pipeline_mode<synchronous>, transform_indices = @transform_3, window_bounds = array<i64: 20, 1>}, {transform_indices = @transform_4, window_bounds = array<i64: 1, 20, 32>}, {transform_indices = @transform_5, window_bounds = array<i64: 1, 1, 32>}, {transform_indices = @transform_6, window_bounds = array<i64: 1, 1, 32>}]} {
    %cst = arith.constant 0.000000e+00 : f32
    %0 = vector.broadcast %cst : f32 to vector<20x32xf32>
    %c0 = arith.constant 0 : index
    %c0_0 = arith.constant 0 : index
    %c0_1 = arith.constant 0 : index
    %1 = vector.load %arg1[%c0, %c0_0, %c0_1] : memref<1x26x64xbf16, #tpu.memory_space<vmem>>, vector<1x20x64xbf16>
    %2 = vector.shape_cast %1 : vector<1x20x64xbf16> to vector<20x64xbf16>
    %c0_2 = arith.constant 0 : index
    %c0_3 = arith.constant 0 : index
    %c0_4 = arith.constant 0 : index
    %3 = vector.load %arg2[%c0_2, %c0_3, %c0_4] : memref<4x64x32xbf16, #tpu.memory_space<vmem>>, vector<1x64x32xbf16>
    %4 = vector.shape_cast %3 : vector<1x64x32xbf16> to vector<64x32xbf16>
    %cst_5 = arith.constant dense<0.000000e+00> : vector<20x32xf32>
    %5 = tpu.matmul %2, %4, %cst_5 {dimension_numbers = #tpu.dot_dimension_numbers<[1], [0], [0], [1], [0, 0, 1, 1], [], []>} : vector<20x64xbf16>, vector<64x32xbf16>, vector<20x32xf32> -> vector<20x32xf32>
    %6 = arith.addf %0, %5 : vector<20x32xf32>
    %c0_6 = arith.constant 0 : index
    %c1 = arith.constant 1 : index
    %c0_7 = arith.constant 0 : index
    %7 = vector.load %arg1[%c0_6, %c1, %c0_7] : memref<1x26x64xbf16, #tpu.memory_space<vmem>>, vector<1x20x64xbf16>
    %8 = vector.shape_cast %7 : vector<1x20x64xbf16> to vector<20x64xbf16>
    %c1_8 = arith.constant 1 : index
    %c0_9 = arith.constant 0 : index
    %c0_10 = arith.constant 0 : index
    %9 = vector.load %arg2[%c1_8, %c0_9, %c0_10] : memref<4x64x32xbf16, #tpu.memory_space<vmem>>, vector<1x64x32xbf16>
    %10 = vector.shape_cast %9 : vector<1x64x32xbf16> to vector<64x32xbf16>
    %cst_11 = arith.constant dense<0.000000e+00> : vector<20x32xf32>
    %11 = tpu.matmul %8, %10, %cst_11 {dimension_numbers = #tpu.dot_dimension_numbers<[1], [0], [0], [1], [0, 0, 1, 1], [], []>} : vector<20x64xbf16>, vector<64x32xbf16>, vector<20x32xf32> -> vector<20x32xf32>
    %12 = arith.addf %6, %11 : vector<20x32xf32>
    %c0_12 = arith.constant 0 : index
    %c5 = arith.constant 5 : index
    %c0_13 = arith.constant 0 : index
    %13 = vector.load %arg1[%c0_12, %c5, %c0_13] : memref<1x26x64xbf16, #tpu.memory_space<vmem>>, vector<1x20x64xbf16>
    %14 = vector.shape_cast %13 : vector<1x20x64xbf16> to vector<20x64xbf16>
    %c2 = arith.constant 2 : index
    %c0_14 = arith.constant 0 : index
    %c0_15 = arith.constant 0 : index
    %15 = vector.load %arg2[%c2, %c0_14, %c0_15] : memref<4x64x32xbf16, #tpu.memory_space<vmem>>, vector<1x64x32xbf16>
    %16 = vector.shape_cast %15 : vector<1x64x32xbf16> to vector<64x32xbf16>
    %cst_16 = arith.constant dense<0.000000e+00> : vector<20x32xf32>
    %17 = tpu.matmul %14, %16, %cst_16 {dimension_numbers = #tpu.dot_dimension_numbers<[1], [0], [0], [1], [0, 0, 1, 1], [], []>} : vector<20x64xbf16>, vector<64x32xbf16>, vector<20x32xf32> -> vector<20x32xf32>
    %18 = arith.addf %12, %17 : vector<20x32xf32>
    %c0_17 = arith.constant 0 : index
    %c6 = arith.constant 6 : index
    %c0_18 = arith.constant 0 : index
    %19 = vector.load %arg1[%c0_17, %c6, %c0_18] : memref<1x26x64xbf16, #tpu.memory_space<vmem>>, vector<1x20x64xbf16>
    %20 = vector.shape_cast %19 : vector<1x20x64xbf16> to vector<20x64xbf16>
    %c3 = arith.constant 3 : index
    %c0_19 = arith.constant 0 : index
    %c0_20 = arith.constant 0 : index
    %21 = vector.load %arg2[%c3, %c0_19, %c0_20] : memref<4x64x32xbf16, #tpu.memory_space<vmem>>, vector<1x64x32xbf16>
    %22 = vector.shape_cast %21 : vector<1x64x32xbf16> to vector<64x32xbf16>
    %cst_21 = arith.constant dense<0.000000e+00> : vector<20x32xf32>
    %23 = tpu.matmul %20, %22, %cst_21 {dimension_numbers = #tpu.dot_dimension_numbers<[1], [0], [0], [1], [0, 0, 1, 1], [], []>} : vector<20x64xbf16>, vector<64x32xbf16>, vector<20x32xf32> -> vector<20x32xf32>
    %24 = arith.addf %18, %23 : vector<20x32xf32>
    %c0_22 = arith.constant 0 : index
    %c0_23 = arith.constant 0 : index
    %25 = vector.load %arg3[%c0_22, %c0_23] : memref<1x32xf32, #tpu.memory_space<vmem>>, vector<1x32xf32>
    %26 = vector.broadcast %25 : vector<1x32xf32> to vector<20x32xf32>
    %27 = arith.addf %24, %26 : vector<20x32xf32>
    %c0_24 = arith.constant 0 : index
    %c0_25 = arith.constant 0 : index
    %28 = vector.load %arg4[%c0_24, %c0_25] : memref<20x1xf32, #tpu.memory_space<vmem>>, vector<20x1xf32>
    %29 = vector.broadcast %28 : vector<20x1xf32> to vector<20x32xf32>
    %30 = arith.mulf %27, %29 : vector<20x32xf32>
    %cst_26 = arith.constant dense<0.000000e+00> : vector<32xf32>
    %31 = vector.multi_reduction <add>, %30, %cst_26 [0] : vector<20x32xf32> to vector<32xf32>
    %32 = vector.shape_cast %31 : vector<32xf32> to vector<1x32xf32>
    %c0_27 = arith.constant 0 : index
    %c0_28 = arith.constant 0 : index
    %c0_29 = arith.constant 0 : index
    %33 = vector.load %arg6[%c0_27, %c0_28, %c0_29] : memref<1x1x32xf32, #tpu.memory_space<vmem>>, vector<1x1x32xf32>
    %34 = vector.shape_cast %33 : vector<1x1x32xf32> to vector<1x32xf32>
    %35 = vector.shape_cast %32 : vector<1x32xf32> to vector<1x1x32xf32>
    tpu.vector_store %arg6[%c0_27, %c0_28, %c0_29], %35 {strides = array<i32>} : memref<1x1x32xf32, #tpu.memory_space<vmem>>, vector<1x1x32xf32>,
    %36 = arith.mulf %30, %27 : vector<20x32xf32>
    %cst_30 = arith.constant dense<0.000000e+00> : vector<32xf32>
    %37 = vector.multi_reduction <add>, %36, %cst_30 [0] : vector<20x32xf32> to vector<32xf32>
    %38 = vector.shape_cast %37 : vector<32xf32> to vector<1x32xf32>
    %c0_31 = arith.constant 0 : index
    %c0_32 = arith.constant 0 : index
    %c0_33 = arith.constant 0 : index
    %39 = vector.load %arg7[%c0_31, %c0_32, %c0_33] : memref<1x1x32xf32, #tpu.memory_space<vmem>>, vector<1x1x32xf32>
    %40 = vector.shape_cast %39 : vector<1x1x32xf32> to vector<1x32xf32>
    %41 = vector.shape_cast %38 : vector<1x32xf32> to vector<1x1x32xf32>
    tpu.vector_store %arg7[%c0_31, %c0_32, %c0_33], %41 {strides = array<i32>} : memref<1x1x32xf32, #tpu.memory_space<vmem>>, vector<1x1x32xf32>,
    %42 = arith.truncf %27 : vector<20x32xf32> to vector<20x32xbf16>
    %c0_34 = arith.constant 0 : index
    %c0_35 = arith.constant 0 : index
    %c0_36 = arith.constant 0 : index
    %43 = vector.load %arg5[%c0_34, %c0_35, %c0_36] : memref<1x20x32xbf16, #tpu.memory_space<vmem>>, vector<1x20x32xbf16>
    %44 = vector.shape_cast %43 : vector<1x20x32xbf16> to vector<20x32xbf16>
    %45 = vector.shape_cast %42 : vector<20x32xbf16> to vector<1x20x32xbf16>
    tpu.vector_store %arg5[%c0_34, %c0_35, %c0_36], %45 {strides = array<i32>} : memref<1x20x32xbf16, #tpu.memory_space<vmem>>, vector<1x20x32xbf16>,
    return
  }
  func.func @transform_0(%arg0: i32) -> (i32, i32, i32) {
    %c0_i32 = arith.constant 0 : i32
    %c0_i32_0 = arith.constant 0 : i32
    %c0_i32_1 = arith.constant 0 : i32
    return %arg0, %c0_i32, %c0_i32_0 : i32, i32, i32
  }
  func.func @transform_1(%arg0: i32) -> (i32, i32, i32) {
    %c0_i32 = arith.constant 0 : i32
    %c0_i32_0 = arith.constant 0 : i32
    %c0_i32_1 = arith.constant 0 : i32
    %c0_i32_2 = arith.constant 0 : i32
    return %c0_i32, %c0_i32_0, %c0_i32_1 : i32, i32, i32
  }
  func.func @transform_2(%arg0: i32) -> (i32, i32) {
    %c0_i32 = arith.constant 0 : i32
    %c0_i32_0 = arith.constant 0 : i32
    %c0_i32_1 = arith.constant 0 : i32
    return %c0_i32, %c0_i32_0 : i32, i32
  }
  func.func @transform_3(%arg0: i32) -> (i32, i32) {
    %c0_i32 = arith.constant 0 : i32
    %c0_i32_0 = arith.constant 0 : i32
    %c0_i32_1 = arith.constant 0 : i32
    return %c0_i32, %c0_i32_0 : i32, i32
  }
  func.func @transform_4(%arg0: i32) -> (i32, i32, i32) {
    %c0_i32 = arith.constant 0 : i32
    %c0_i32_0 = arith.constant 0 : i32
    %c0_i32_1 = arith.constant 0 : i32
    return %arg0, %c0_i32, %c0_i32_0 : i32, i32, i32
  }
  func.func @transform_5(%arg0: i32) -> (i32, i32, i32) {
    %c0_i32 = arith.constant 0 : i32
    %c0_i32_0 = arith.constant 0 : i32
    %c0_i32_1 = arith.constant 0 : i32
    return %arg0, %c0_i32, %c0_i32_0 : i32, i32, i32
  }
  func.func @transform_6(%arg0: i32) -> (i32, i32, i32) {
    %c0_i32 = arith.constant 0 : i32
    %c0_i32_0 = arith.constant 0 : i32
    %c0_i32_1 = arith.constant 0 : i32
    return %arg0, %c0_i32, %c0_i32_0 : i32, i32, i32
  }
}

module attributes {stable_mosaic.version = 11 : i64} {
  func.func @_bn_apply_kernel(%arg0: i32, %arg1: memref<1x20x32xbf16, #tpu.memory_space<vmem>>, %arg2: memref<1x32xf32, #tpu.memory_space<vmem>>, %arg3: memref<1x32xf32, #tpu.memory_space<vmem>>, %arg4: memref<1x20x32xbf16, #tpu.memory_space<vmem>>) attributes {dimension_semantics = [#tpu.dimension_semantics<parallel>], iteration_bounds = array<i64: 2>, scalar_prefetch = 0 : i64, scratch_operands = 0 : i64, tpu.core_type = #tpu.core_type<tc>, window_params = [{transform_indices = @transform_0, window_bounds = array<i64: 1, 20, 32>}, {pipeline_mode = #tpu.pipeline_mode<synchronous>, transform_indices = @transform_1, window_bounds = array<i64: 1, 32>}, {pipeline_mode = #tpu.pipeline_mode<synchronous>, transform_indices = @transform_2, window_bounds = array<i64: 1, 32>}, {transform_indices = @transform_3, window_bounds = array<i64: 1, 20, 32>}]} {
    %c0 = arith.constant 0 : index
    %c0_0 = arith.constant 0 : index
    %c0_1 = arith.constant 0 : index
    %0 = vector.load %arg1[%c0, %c0_0, %c0_1] : memref<1x20x32xbf16, #tpu.memory_space<vmem>>, vector<1x20x32xbf16>
    %1 = vector.shape_cast %0 : vector<1x20x32xbf16> to vector<20x32xbf16>
    %2 = arith.extf %1 : vector<20x32xbf16> to vector<20x32xf32>
    %c0_2 = arith.constant 0 : index
    %c0_3 = arith.constant 0 : index
    %3 = vector.load %arg2[%c0_2, %c0_3] : memref<1x32xf32, #tpu.memory_space<vmem>>, vector<1x32xf32>
    %4 = vector.broadcast %3 : vector<1x32xf32> to vector<20x32xf32>
    %5 = arith.mulf %2, %4 : vector<20x32xf32>
    %c0_4 = arith.constant 0 : index
    %c0_5 = arith.constant 0 : index
    %6 = vector.load %arg3[%c0_4, %c0_5] : memref<1x32xf32, #tpu.memory_space<vmem>>, vector<1x32xf32>
    %7 = vector.broadcast %6 : vector<1x32xf32> to vector<20x32xf32>
    %8 = arith.addf %5, %7 : vector<20x32xf32>
    %cst = arith.constant 0.000000e+00 : f32
    %9 = vector.broadcast %cst : f32 to vector<20x32xf32>
    %10 = arith.cmpf oge, %8, %9 : vector<20x32xf32>
    %cst_6 = arith.constant 2.000000e-01 : f32
    %11 = vector.broadcast %cst_6 : f32 to vector<20x32xf32>
    %12 = arith.mulf %11, %8 : vector<20x32xf32>
    %13 = arith.select %10, %8, %12 : vector<20x32xi1>, vector<20x32xf32>
    %14 = arith.truncf %13 : vector<20x32xf32> to vector<20x32xbf16>
    %c0_7 = arith.constant 0 : index
    %c0_8 = arith.constant 0 : index
    %c0_9 = arith.constant 0 : index
    %15 = vector.load %arg4[%c0_7, %c0_8, %c0_9] : memref<1x20x32xbf16, #tpu.memory_space<vmem>>, vector<1x20x32xbf16>
    %16 = vector.shape_cast %15 : vector<1x20x32xbf16> to vector<20x32xbf16>
    %17 = vector.shape_cast %14 : vector<20x32xbf16> to vector<1x20x32xbf16>
    tpu.vector_store %arg4[%c0_7, %c0_8, %c0_9], %17 {strides = array<i32>} : memref<1x20x32xbf16, #tpu.memory_space<vmem>>, vector<1x20x32xbf16>,
    return
  }
  func.func @transform_0(%arg0: i32) -> (i32, i32, i32) {
    %c0_i32 = arith.constant 0 : i32
    %c0_i32_0 = arith.constant 0 : i32
    %c0_i32_1 = arith.constant 0 : i32
    return %arg0, %c0_i32, %c0_i32_0 : i32, i32, i32
  }
  func.func @transform_1(%arg0: i32) -> (i32, i32) {
    %c0_i32 = arith.constant 0 : i32
    %c0_i32_0 = arith.constant 0 : i32
    %c0_i32_1 = arith.constant 0 : i32
    return %c0_i32, %c0_i32_0 : i32, i32
  }
  func.func @transform_2(%arg0: i32) -> (i32, i32) {
    %c0_i32 = arith.constant 0 : i32
    %c0_i32_0 = arith.constant 0 : i32
    %c0_i32_1 = arith.constant 0 : i32
    return %c0_i32, %c0_i32_0 : i32, i32
  }
  func.func @transform_3(%arg0: i32) -> (i32, i32, i32) {
    %c0_i32 = arith.constant 0 : i32
    %c0_i32_0 = arith.constant 0 : i32
    %c0_i32_1 = arith.constant 0 : i32
    return %arg0, %c0_i32, %c0_i32_0 : i32, i32, i32
  }
}

module attributes {stable_mosaic.version = 11 : i64} {
  func.func @_bn_apply_kernel(%arg0: i32, %arg1: memref<1x18x64xbf16, #tpu.memory_space<vmem>>, %arg2: memref<1x64xf32, #tpu.memory_space<vmem>>, %arg3: memref<1x64xf32, #tpu.memory_space<vmem>>, %arg4: memref<1x18x64xbf16, #tpu.memory_space<vmem>>) attributes {dimension_semantics = [#tpu.dimension_semantics<parallel>], iteration_bounds = array<i64: 2>, scalar_prefetch = 0 : i64, scratch_operands = 0 : i64, tpu.core_type = #tpu.core_type<tc>, window_params = [{transform_indices = @transform_0, window_bounds = array<i64: 1, 18, 64>}, {pipeline_mode = #tpu.pipeline_mode<synchronous>, transform_indices = @transform_1, window_bounds = array<i64: 1, 64>}, {pipeline_mode = #tpu.pipeline_mode<synchronous>, transform_indices = @transform_2, window_bounds = array<i64: 1, 64>}, {transform_indices = @transform_3, window_bounds = array<i64: 1, 18, 64>}]} {
    %c0 = arith.constant 0 : index
    %c0_0 = arith.constant 0 : index
    %c0_1 = arith.constant 0 : index
    %0 = vector.load %arg1[%c0, %c0_0, %c0_1] : memref<1x18x64xbf16, #tpu.memory_space<vmem>>, vector<1x18x64xbf16>
    %1 = vector.shape_cast %0 : vector<1x18x64xbf16> to vector<18x64xbf16>
    %2 = arith.extf %1 : vector<18x64xbf16> to vector<18x64xf32>
    %c0_2 = arith.constant 0 : index
    %c0_3 = arith.constant 0 : index
    %3 = vector.load %arg2[%c0_2, %c0_3] : memref<1x64xf32, #tpu.memory_space<vmem>>, vector<1x64xf32>
    %4 = vector.broadcast %3 : vector<1x64xf32> to vector<18x64xf32>
    %5 = arith.mulf %2, %4 : vector<18x64xf32>
    %c0_4 = arith.constant 0 : index
    %c0_5 = arith.constant 0 : index
    %6 = vector.load %arg3[%c0_4, %c0_5] : memref<1x64xf32, #tpu.memory_space<vmem>>, vector<1x64xf32>
    %7 = vector.broadcast %6 : vector<1x64xf32> to vector<18x64xf32>
    %8 = arith.addf %5, %7 : vector<18x64xf32>
    %cst = arith.constant 0.000000e+00 : f32
    %9 = vector.broadcast %cst : f32 to vector<18x64xf32>
    %10 = arith.cmpf oge, %8, %9 : vector<18x64xf32>
    %cst_6 = arith.constant 2.000000e-01 : f32
    %11 = vector.broadcast %cst_6 : f32 to vector<18x64xf32>
    %12 = arith.mulf %11, %8 : vector<18x64xf32>
    %13 = arith.select %10, %8, %12 : vector<18x64xi1>, vector<18x64xf32>
    %14 = arith.truncf %13 : vector<18x64xf32> to vector<18x64xbf16>
    %c0_7 = arith.constant 0 : index
    %c0_8 = arith.constant 0 : index
    %c0_9 = arith.constant 0 : index
    %15 = vector.load %arg4[%c0_7, %c0_8, %c0_9] : memref<1x18x64xbf16, #tpu.memory_space<vmem>>, vector<1x18x64xbf16>
    %16 = vector.shape_cast %15 : vector<1x18x64xbf16> to vector<18x64xbf16>
    %17 = vector.shape_cast %14 : vector<18x64xbf16> to vector<1x18x64xbf16>
    tpu.vector_store %arg4[%c0_7, %c0_8, %c0_9], %17 {strides = array<i32>} : memref<1x18x64xbf16, #tpu.memory_space<vmem>>, vector<1x18x64xbf16>,
    return
  }
  func.func @transform_0(%arg0: i32) -> (i32, i32, i32) {
    %c0_i32 = arith.constant 0 : i32
    %c0_i32_0 = arith.constant 0 : i32
    %c0_i32_1 = arith.constant 0 : i32
    return %arg0, %c0_i32, %c0_i32_0 : i32, i32, i32
  }
  func.func @transform_1(%arg0: i32) -> (i32, i32) {
    %c0_i32 = arith.constant 0 : i32
    %c0_i32_0 = arith.constant 0 : i32
    %c0_i32_1 = arith.constant 0 : i32
    return %c0_i32, %c0_i32_0 : i32, i32
  }
  func.func @transform_2(%arg0: i32) -> (i32, i32) {
    %c0_i32 = arith.constant 0 : i32
    %c0_i32_0 = arith.constant 0 : i32
    %c0_i32_1 = arith.constant 0 : i32
    return %c0_i32, %c0_i32_0 : i32, i32
  }
  func.func @transform_3(%arg0: i32) -> (i32, i32, i32) {
    %c0_i32 = arith.constant 0 : i32
    %c0_i32_0 = arith.constant 0 : i32
    %c0_i32_1 = arith.constant 0 : i32
    return %arg0, %c0_i32, %c0_i32_0 : i32, i32, i32
  }
}

module attributes {stable_mosaic.version = 11 : i64} {
  func.func @_conv_kernel(%arg0: i32, %arg1: memref<1x39x32xbf16, #tpu.memory_space<vmem>>, %arg2: memref<16x32x64xbf16, #tpu.memory_space<vmem>>, %arg3: memref<1x64xf32, #tpu.memory_space<vmem>>, %arg4: memref<18x1xf32, #tpu.memory_space<vmem>>, %arg5: memref<1x18x64xbf16, #tpu.memory_space<vmem>>, %arg6: memref<1x1x64xf32, #tpu.memory_space<vmem>>, %arg7: memref<1x1x64xf32, #tpu.memory_space<vmem>>) attributes {dimension_semantics = [#tpu.dimension_semantics<parallel>], iteration_bounds = array<i64: 2>, scalar_prefetch = 0 : i64, scratch_operands = 0 : i64, tpu.core_type = #tpu.core_type<tc>, window_params = [{transform_indices = @transform_0, window_bounds = array<i64: 1, 39, 32>}, {pipeline_mode = #tpu.pipeline_mode<synchronous>, transform_indices = @transform_1, window_bounds = array<i64: 16, 32, 64>}, {pipeline_mode = #tpu.pipeline_mode<synchronous>, transform_indices = @transform_2, window_bounds = array<i64: 1, 64>}, {pipeline_mode = #tpu.pipeline_mode<synchronous>, transform_indices = @transform_3, window_bounds = array<i64: 18, 1>}, {transform_indices = @transform_4, window_bounds = array<i64: 1, 18, 64>}, {transform_indices = @transform_5, window_bounds = array<i64: 1, 1, 64>}, {transform_indices = @transform_6, window_bounds = array<i64: 1, 1, 64>}]} {
    %cst = arith.constant 0.000000e+00 : f32
    %0 = vector.broadcast %cst : f32 to vector<18x64xf32>
    %c0 = arith.constant 0 : index
    %c0_0 = arith.constant 0 : index
    %c0_1 = arith.constant 0 : index
    %1 = vector.load %arg1[%c0, %c0_0, %c0_1] : memref<1x39x32xbf16, #tpu.memory_space<vmem>>, vector<1x18x32xbf16>
    %2 = vector.shape_cast %1 : vector<1x18x32xbf16> to vector<18x32xbf16>
    %c0_2 = arith.constant 0 : index
    %c0_3 = arith.constant 0 : index
    %c0_4 = arith.constant 0 : index
    %3 = vector.load %arg2[%c0_2, %c0_3, %c0_4] : memref<16x32x64xbf16, #tpu.memory_space<vmem>>, vector<1x32x64xbf16>
    %4 = vector.shape_cast %3 : vector<1x32x64xbf16> to vector<32x64xbf16>
    %cst_5 = arith.constant dense<0.000000e+00> : vector<18x64xf32>
    %5 = tpu.matmul %2, %4, %cst_5 {dimension_numbers = #tpu.dot_dimension_numbers<[1], [0], [0], [1], [0, 0, 1, 1], [], []>} : vector<18x32xbf16>, vector<32x64xbf16>, vector<18x64xf32> -> vector<18x64xf32>
    %6 = arith.addf %0, %5 : vector<18x64xf32>
    %c0_6 = arith.constant 0 : index
    %c1 = arith.constant 1 : index
    %c0_7 = arith.constant 0 : index
    %7 = vector.load %arg1[%c0_6, %c1, %c0_7] : memref<1x39x32xbf16, #tpu.memory_space<vmem>>, vector<1x18x32xbf16>
    %8 = vector.shape_cast %7 : vector<1x18x32xbf16> to vector<18x32xbf16>
    %c1_8 = arith.constant 1 : index
    %c0_9 = arith.constant 0 : index
    %c0_10 = arith.constant 0 : index
    %9 = vector.load %arg2[%c1_8, %c0_9, %c0_10] : memref<16x32x64xbf16, #tpu.memory_space<vmem>>, vector<1x32x64xbf16>
    %10 = vector.shape_cast %9 : vector<1x32x64xbf16> to vector<32x64xbf16>
    %cst_11 = arith.constant dense<0.000000e+00> : vector<18x64xf32>
    %11 = tpu.matmul %8, %10, %cst_11 {dimension_numbers = #tpu.dot_dimension_numbers<[1], [0], [0], [1], [0, 0, 1, 1], [], []>} : vector<18x32xbf16>, vector<32x64xbf16>, vector<18x64xf32> -> vector<18x64xf32>
    %12 = arith.addf %6, %11 : vector<18x64xf32>
    %c0_12 = arith.constant 0 : index
    %c2 = arith.constant 2 : index
    %c0_13 = arith.constant 0 : index
    %13 = vector.load %arg1[%c0_12, %c2, %c0_13] : memref<1x39x32xbf16, #tpu.memory_space<vmem>>, vector<1x18x32xbf16>
    %14 = vector.shape_cast %13 : vector<1x18x32xbf16> to vector<18x32xbf16>
    %c2_14 = arith.constant 2 : index
    %c0_15 = arith.constant 0 : index
    %c0_16 = arith.constant 0 : index
    %15 = vector.load %arg2[%c2_14, %c0_15, %c0_16] : memref<16x32x64xbf16, #tpu.memory_space<vmem>>, vector<1x32x64xbf16>
    %16 = vector.shape_cast %15 : vector<1x32x64xbf16> to vector<32x64xbf16>
    %cst_17 = arith.constant dense<0.000000e+00> : vector<18x64xf32>
    %17 = tpu.matmul %14, %16, %cst_17 {dimension_numbers = #tpu.dot_dimension_numbers<[1], [0], [0], [1], [0, 0, 1, 1], [], []>} : vector<18x32xbf16>, vector<32x64xbf16>, vector<18x64xf32> -> vector<18x64xf32>
    %18 = arith.addf %12, %17 : vector<18x64xf32>
    %c0_18 = arith.constant 0 : index
    %c3 = arith.constant 3 : index
    %c0_19 = arith.constant 0 : index
    %19 = vector.load %arg1[%c0_18, %c3, %c0_19] : memref<1x39x32xbf16, #tpu.memory_space<vmem>>, vector<1x18x32xbf16>
    %20 = vector.shape_cast %19 : vector<1x18x32xbf16> to vector<18x32xbf16>
    %c3_20 = arith.constant 3 : index
    %c0_21 = arith.constant 0 : index
    %c0_22 = arith.constant 0 : index
    %21 = vector.load %arg2[%c3_20, %c0_21, %c0_22] : memref<16x32x64xbf16, #tpu.memory_space<vmem>>, vector<1x32x64xbf16>
    %22 = vector.shape_cast %21 : vector<1x32x64xbf16> to vector<32x64xbf16>
    %cst_23 = arith.constant dense<0.000000e+00> : vector<18x64xf32>
    %23 = tpu.matmul %20, %22, %cst_23 {dimension_numbers = #tpu.dot_dimension_numbers<[1], [0], [0], [1], [0, 0, 1, 1], [], []>} : vector<18x32xbf16>, vector<32x64xbf16>, vector<18x64xf32> -> vector<18x64xf32>
    %24 = arith.addf %18, %23 : vector<18x64xf32>
    %c0_24 = arith.constant 0 : index
    %c6 = arith.constant 6 : index
    %c0_25 = arith.constant 0 : index
    %25 = vector.load %arg1[%c0_24, %c6, %c0_25] : memref<1x39x32xbf16, #tpu.memory_space<vmem>>, vector<1x18x32xbf16>
    %26 = vector.shape_cast %25 : vector<1x18x32xbf16> to vector<18x32xbf16>
    %c4 = arith.constant 4 : index
    %c0_26 = arith.constant 0 : index
    %c0_27 = arith.constant 0 : index
    %27 = vector.load %arg2[%c4, %c0_26, %c0_27] : memref<16x32x64xbf16, #tpu.memory_space<vmem>>, vector<1x32x64xbf16>
    %28 = vector.shape_cast %27 : vector<1x32x64xbf16> to vector<32x64xbf16>
    %cst_28 = arith.constant dense<0.000000e+00> : vector<18x64xf32>
    %29 = tpu.matmul %26, %28, %cst_28 {dimension_numbers = #tpu.dot_dimension_numbers<[1], [0], [0], [1], [0, 0, 1, 1], [], []>} : vector<18x32xbf16>, vector<32x64xbf16>, vector<18x64xf32> -> vector<18x64xf32>
    %30 = arith.addf %24, %29 : vector<18x64xf32>
    %c0_29 = arith.constant 0 : index
    %c7 = arith.constant 7 : index
    %c0_30 = arith.constant 0 : index
    %31 = vector.load %arg1[%c0_29, %c7, %c0_30] : memref<1x39x32xbf16, #tpu.memory_space<vmem>>, vector<1x18x32xbf16>
    %32 = vector.shape_cast %31 : vector<1x18x32xbf16> to vector<18x32xbf16>
    %c5 = arith.constant 5 : index
    %c0_31 = arith.constant 0 : index
    %c0_32 = arith.constant 0 : index
    %33 = vector.load %arg2[%c5, %c0_31, %c0_32] : memref<16x32x64xbf16, #tpu.memory_space<vmem>>, vector<1x32x64xbf16>
    %34 = vector.shape_cast %33 : vector<1x32x64xbf16> to vector<32x64xbf16>
    %cst_33 = arith.constant dense<0.000000e+00> : vector<18x64xf32>
    %35 = tpu.matmul %32, %34, %cst_33 {dimension_numbers = #tpu.dot_dimension_numbers<[1], [0], [0], [1], [0, 0, 1, 1], [], []>} : vector<18x32xbf16>, vector<32x64xbf16>, vector<18x64xf32> -> vector<18x64xf32>
    %36 = arith.addf %30, %35 : vector<18x64xf32>
    %c0_34 = arith.constant 0 : index
    %c8 = arith.constant 8 : index
    %c0_35 = arith.constant 0 : index
    %37 = vector.load %arg1[%c0_34, %c8, %c0_35] : memref<1x39x32xbf16, #tpu.memory_space<vmem>>, vector<1x18x32xbf16>
    %38 = vector.shape_cast %37 : vector<1x18x32xbf16> to vector<18x32xbf16>
    %c6_36 = arith.constant 6 : index
    %c0_37 = arith.constant 0 : index
    %c0_38 = arith.constant 0 : index
    %39 = vector.load %arg2[%c6_36, %c0_37, %c0_38] : memref<16x32x64xbf16, #tpu.memory_space<vmem>>, vector<1x32x64xbf16>
    %40 = vector.shape_cast %39 : vector<1x32x64xbf16> to vector<32x64xbf16>
    %cst_39 = arith.constant dense<0.000000e+00> : vector<18x64xf32>
    %41 = tpu.matmul %38, %40, %cst_39 {dimension_numbers = #tpu.dot_dimension_numbers<[1], [0], [0], [1], [0, 0, 1, 1], [], []>} : vector<18x32xbf16>, vector<32x64xbf16>, vector<18x64xf32> -> vector<18x64xf32>
    %42 = arith.addf %36, %41 : vector<18x64xf32>
    %c0_40 = arith.constant 0 : index
    %c9 = arith.constant 9 : index
    %c0_41 = arith.constant 0 : index
    %43 = vector.load %arg1[%c0_40, %c9, %c0_41] : memref<1x39x32xbf16, #tpu.memory_space<vmem>>, vector<1x18x32xbf16>
    %44 = vector.shape_cast %43 : vector<1x18x32xbf16> to vector<18x32xbf16>
    %c7_42 = arith.constant 7 : index
    %c0_43 = arith.constant 0 : index
    %c0_44 = arith.constant 0 : index
    %45 = vector.load %arg2[%c7_42, %c0_43, %c0_44] : memref<16x32x64xbf16, #tpu.memory_space<vmem>>, vector<1x32x64xbf16>
    %46 = vector.shape_cast %45 : vector<1x32x64xbf16> to vector<32x64xbf16>
    %cst_45 = arith.constant dense<0.000000e+00> : vector<18x64xf32>
    %47 = tpu.matmul %44, %46, %cst_45 {dimension_numbers = #tpu.dot_dimension_numbers<[1], [0], [0], [1], [0, 0, 1, 1], [], []>} : vector<18x32xbf16>, vector<32x64xbf16>, vector<18x64xf32> -> vector<18x64xf32>
    %48 = arith.addf %42, %47 : vector<18x64xf32>
    %c0_46 = arith.constant 0 : index
    %c12 = arith.constant 12 : index
    %c0_47 = arith.constant 0 : index
    %49 = vector.load %arg1[%c0_46, %c12, %c0_47] : memref<1x39x32xbf16, #tpu.memory_space<vmem>>, vector<1x18x32xbf16>
    %50 = vector.shape_cast %49 : vector<1x18x32xbf16> to vector<18x32xbf16>
    %c8_48 = arith.constant 8 : index
    %c0_49 = arith.constant 0 : index
    %c0_50 = arith.constant 0 : index
    %51 = vector.load %arg2[%c8_48, %c0_49, %c0_50] : memref<16x32x64xbf16, #tpu.memory_space<vmem>>, vector<1x32x64xbf16>
    %52 = vector.shape_cast %51 : vector<1x32x64xbf16> to vector<32x64xbf16>
    %cst_51 = arith.constant dense<0.000000e+00> : vector<18x64xf32>
    %53 = tpu.matmul %50, %52, %cst_51 {dimension_numbers = #tpu.dot_dimension_numbers<[1], [0], [0], [1], [0, 0, 1, 1], [], []>} : vector<18x32xbf16>, vector<32x64xbf16>, vector<18x64xf32> -> vector<18x64xf32>
    %54 = arith.addf %48, %53 : vector<18x64xf32>
    %c0_52 = arith.constant 0 : index
    %c13 = arith.constant 13 : index
    %c0_53 = arith.constant 0 : index
    %55 = vector.load %arg1[%c0_52, %c13, %c0_53] : memref<1x39x32xbf16, #tpu.memory_space<vmem>>, vector<1x18x32xbf16>
    %56 = vector.shape_cast %55 : vector<1x18x32xbf16> to vector<18x32xbf16>
    %c9_54 = arith.constant 9 : index
    %c0_55 = arith.constant 0 : index
    %c0_56 = arith.constant 0 : index
    %57 = vector.load %arg2[%c9_54, %c0_55, %c0_56] : memref<16x32x64xbf16, #tpu.memory_space<vmem>>, vector<1x32x64xbf16>
    %58 = vector.shape_cast %57 : vector<1x32x64xbf16> to vector<32x64xbf16>
    %cst_57 = arith.constant dense<0.000000e+00> : vector<18x64xf32>
    %59 = tpu.matmul %56, %58, %cst_57 {dimension_numbers = #tpu.dot_dimension_numbers<[1], [0], [0], [1], [0, 0, 1, 1], [], []>} : vector<18x32xbf16>, vector<32x64xbf16>, vector<18x64xf32> -> vector<18x64xf32>
    %60 = arith.addf %54, %59 : vector<18x64xf32>
    %c0_58 = arith.constant 0 : index
    %c14 = arith.constant 14 : index
    %c0_59 = arith.constant 0 : index
    %61 = vector.load %arg1[%c0_58, %c14, %c0_59] : memref<1x39x32xbf16, #tpu.memory_space<vmem>>, vector<1x18x32xbf16>
    %62 = vector.shape_cast %61 : vector<1x18x32xbf16> to vector<18x32xbf16>
    %c10 = arith.constant 10 : index
    %c0_60 = arith.constant 0 : index
    %c0_61 = arith.constant 0 : index
    %63 = vector.load %arg2[%c10, %c0_60, %c0_61] : memref<16x32x64xbf16, #tpu.memory_space<vmem>>, vector<1x32x64xbf16>
    %64 = vector.shape_cast %63 : vector<1x32x64xbf16> to vector<32x64xbf16>
    %cst_62 = arith.constant dense<0.000000e+00> : vector<18x64xf32>
    %65 = tpu.matmul %62, %64, %cst_62 {dimension_numbers = #tpu.dot_dimension_numbers<[1], [0], [0], [1], [0, 0, 1, 1], [], []>} : vector<18x32xbf16>, vector<32x64xbf16>, vector<18x64xf32> -> vector<18x64xf32>
    %66 = arith.addf %60, %65 : vector<18x64xf32>
    %c0_63 = arith.constant 0 : index
    %c15 = arith.constant 15 : index
    %c0_64 = arith.constant 0 : index
    %67 = vector.load %arg1[%c0_63, %c15, %c0_64] : memref<1x39x32xbf16, #tpu.memory_space<vmem>>, vector<1x18x32xbf16>
    %68 = vector.shape_cast %67 : vector<1x18x32xbf16> to vector<18x32xbf16>
    %c11 = arith.constant 11 : index
    %c0_65 = arith.constant 0 : index
    %c0_66 = arith.constant 0 : index
    %69 = vector.load %arg2[%c11, %c0_65, %c0_66] : memref<16x32x64xbf16, #tpu.memory_space<vmem>>, vector<1x32x64xbf16>
    %70 = vector.shape_cast %69 : vector<1x32x64xbf16> to vector<32x64xbf16>
    %cst_67 = arith.constant dense<0.000000e+00> : vector<18x64xf32>
    %71 = tpu.matmul %68, %70, %cst_67 {dimension_numbers = #tpu.dot_dimension_numbers<[1], [0], [0], [1], [0, 0, 1, 1], [], []>} : vector<18x32xbf16>, vector<32x64xbf16>, vector<18x64xf32> -> vector<18x64xf32>
    %72 = arith.addf %66, %71 : vector<18x64xf32>
    %c0_68 = arith.constant 0 : index
    %c18 = arith.constant 18 : index
    %c0_69 = arith.constant 0 : index
    %73 = vector.load %arg1[%c0_68, %c18, %c0_69] : memref<1x39x32xbf16, #tpu.memory_space<vmem>>, vector<1x18x32xbf16>
    %74 = vector.shape_cast %73 : vector<1x18x32xbf16> to vector<18x32xbf16>
    %c12_70 = arith.constant 12 : index
    %c0_71 = arith.constant 0 : index
    %c0_72 = arith.constant 0 : index
    %75 = vector.load %arg2[%c12_70, %c0_71, %c0_72] : memref<16x32x64xbf16, #tpu.memory_space<vmem>>, vector<1x32x64xbf16>
    %76 = vector.shape_cast %75 : vector<1x32x64xbf16> to vector<32x64xbf16>
    %cst_73 = arith.constant dense<0.000000e+00> : vector<18x64xf32>
    %77 = tpu.matmul %74, %76, %cst_73 {dimension_numbers = #tpu.dot_dimension_numbers<[1], [0], [0], [1], [0, 0, 1, 1], [], []>} : vector<18x32xbf16>, vector<32x64xbf16>, vector<18x64xf32> -> vector<18x64xf32>
    %78 = arith.addf %72, %77 : vector<18x64xf32>
    %c0_74 = arith.constant 0 : index
    %c19 = arith.constant 19 : index
    %c0_75 = arith.constant 0 : index
    %79 = vector.load %arg1[%c0_74, %c19, %c0_75] : memref<1x39x32xbf16, #tpu.memory_space<vmem>>, vector<1x18x32xbf16>
    %80 = vector.shape_cast %79 : vector<1x18x32xbf16> to vector<18x32xbf16>
    %c13_76 = arith.constant 13 : index
    %c0_77 = arith.constant 0 : index
    %c0_78 = arith.constant 0 : index
    %81 = vector.load %arg2[%c13_76, %c0_77, %c0_78] : memref<16x32x64xbf16, #tpu.memory_space<vmem>>, vector<1x32x64xbf16>
    %82 = vector.shape_cast %81 : vector<1x32x64xbf16> to vector<32x64xbf16>
    %cst_79 = arith.constant dense<0.000000e+00> : vector<18x64xf32>
    %83 = tpu.matmul %80, %82, %cst_79 {dimension_numbers = #tpu.dot_dimension_numbers<[1], [0], [0], [1], [0, 0, 1, 1], [], []>} : vector<18x32xbf16>, vector<32x64xbf16>, vector<18x64xf32> -> vector<18x64xf32>
    %84 = arith.addf %78, %83 : vector<18x64xf32>
    %c0_80 = arith.constant 0 : index
    %c20 = arith.constant 20 : index
    %c0_81 = arith.constant 0 : index
    %85 = vector.load %arg1[%c0_80, %c20, %c0_81] : memref<1x39x32xbf16, #tpu.memory_space<vmem>>, vector<1x18x32xbf16>
    %86 = vector.shape_cast %85 : vector<1x18x32xbf16> to vector<18x32xbf16>
    %c14_82 = arith.constant 14 : index
    %c0_83 = arith.constant 0 : index
    %c0_84 = arith.constant 0 : index
    %87 = vector.load %arg2[%c14_82, %c0_83, %c0_84] : memref<16x32x64xbf16, #tpu.memory_space<vmem>>, vector<1x32x64xbf16>
    %88 = vector.shape_cast %87 : vector<1x32x64xbf16> to vector<32x64xbf16>
    %cst_85 = arith.constant dense<0.000000e+00> : vector<18x64xf32>
    %89 = tpu.matmul %86, %88, %cst_85 {dimension_numbers = #tpu.dot_dimension_numbers<[1], [0], [0], [1], [0, 0, 1, 1], [], []>} : vector<18x32xbf16>, vector<32x64xbf16>, vector<18x64xf32> -> vector<18x64xf32>
    %90 = arith.addf %84, %89 : vector<18x64xf32>
    %c0_86 = arith.constant 0 : index
    %c21 = arith.constant 21 : index
    %c0_87 = arith.constant 0 : index
    %91 = vector.load %arg1[%c0_86, %c21, %c0_87] : memref<1x39x32xbf16, #tpu.memory_space<vmem>>, vector<1x18x32xbf16>
    %92 = vector.shape_cast %91 : vector<1x18x32xbf16> to vector<18x32xbf16>
    %c15_88 = arith.constant 15 : index
    %c0_89 = arith.constant 0 : index
    %c0_90 = arith.constant 0 : index
    %93 = vector.load %arg2[%c15_88, %c0_89, %c0_90] : memref<16x32x64xbf16, #tpu.memory_space<vmem>>, vector<1x32x64xbf16>
    %94 = vector.shape_cast %93 : vector<1x32x64xbf16> to vector<32x64xbf16>
    %cst_91 = arith.constant dense<0.000000e+00> : vector<18x64xf32>
    %95 = tpu.matmul %92, %94, %cst_91 {dimension_numbers = #tpu.dot_dimension_numbers<[1], [0], [0], [1], [0, 0, 1, 1], [], []>} : vector<18x32xbf16>, vector<32x64xbf16>, vector<18x64xf32> -> vector<18x64xf32>
    %96 = arith.addf %90, %95 : vector<18x64xf32>
    %c0_92 = arith.constant 0 : index
    %c0_93 = arith.constant 0 : index
    %97 = vector.load %arg3[%c0_92, %c0_93] : memref<1x64xf32, #tpu.memory_space<vmem>>, vector<1x64xf32>
    %98 = vector.broadcast %97 : vector<1x64xf32> to vector<18x64xf32>
    %99 = arith.addf %96, %98 : vector<18x64xf32>
    %c0_94 = arith.constant 0 : index
    %c0_95 = arith.constant 0 : index
    %100 = vector.load %arg4[%c0_94, %c0_95] : memref<18x1xf32, #tpu.memory_space<vmem>>, vector<18x1xf32>
    %101 = vector.broadcast %100 : vector<18x1xf32> to vector<18x64xf32>
    %102 = arith.mulf %99, %101 : vector<18x64xf32>
    %cst_96 = arith.constant dense<0.000000e+00> : vector<64xf32>
    %103 = vector.multi_reduction <add>, %102, %cst_96 [0] : vector<18x64xf32> to vector<64xf32>
    %104 = vector.shape_cast %103 : vector<64xf32> to vector<1x64xf32>
    %c0_97 = arith.constant 0 : index
    %c0_98 = arith.constant 0 : index
    %c0_99 = arith.constant 0 : index
    %105 = vector.load %arg6[%c0_97, %c0_98, %c0_99] : memref<1x1x64xf32, #tpu.memory_space<vmem>>, vector<1x1x64xf32>
    %106 = vector.shape_cast %105 : vector<1x1x64xf32> to vector<1x64xf32>
    %107 = vector.shape_cast %104 : vector<1x64xf32> to vector<1x1x64xf32>
    tpu.vector_store %arg6[%c0_97, %c0_98, %c0_99], %107 {strides = array<i32>} : memref<1x1x64xf32, #tpu.memory_space<vmem>>, vector<1x1x64xf32>,
    %108 = arith.mulf %102, %99 : vector<18x64xf32>
    %cst_100 = arith.constant dense<0.000000e+00> : vector<64xf32>
    %109 = vector.multi_reduction <add>, %108, %cst_100 [0] : vector<18x64xf32> to vector<64xf32>
    %110 = vector.shape_cast %109 : vector<64xf32> to vector<1x64xf32>
    %c0_101 = arith.constant 0 : index
    %c0_102 = arith.constant 0 : index
    %c0_103 = arith.constant 0 : index
    %111 = vector.load %arg7[%c0_101, %c0_102, %c0_103] : memref<1x1x64xf32, #tpu.memory_space<vmem>>, vector<1x1x64xf32>
    %112 = vector.shape_cast %111 : vector<1x1x64xf32> to vector<1x64xf32>
    %113 = vector.shape_cast %110 : vector<1x64xf32> to vector<1x1x64xf32>
    tpu.vector_store %arg7[%c0_101, %c0_102, %c0_103], %113 {strides = array<i32>} : memref<1x1x64xf32, #tpu.memory_space<vmem>>, vector<1x1x64xf32>,
    %114 = arith.truncf %99 : vector<18x64xf32> to vector<18x64xbf16>
    %c0_104 = arith.constant 0 : index
    %c0_105 = arith.constant 0 : index
    %c0_106 = arith.constant 0 : index
    %115 = vector.load %arg5[%c0_104, %c0_105, %c0_106] : memref<1x18x64xbf16, #tpu.memory_space<vmem>>, vector<1x18x64xbf16>
    %116 = vector.shape_cast %115 : vector<1x18x64xbf16> to vector<18x64xbf16>
    %117 = vector.shape_cast %114 : vector<18x64xbf16> to vector<1x18x64xbf16>
    tpu.vector_store %arg5[%c0_104, %c0_105, %c0_106], %117 {strides = array<i32>} : memref<1x18x64xbf16, #tpu.memory_space<vmem>>, vector<1x18x64xbf16>,
    return
  }
  func.func @transform_0(%arg0: i32) -> (i32, i32, i32) {
    %c0_i32 = arith.constant 0 : i32
    %c0_i32_0 = arith.constant 0 : i32
    %c0_i32_1 = arith.constant 0 : i32
    return %arg0, %c0_i32, %c0_i32_0 : i32, i32, i32
  }
  func.func @transform_1(%arg0: i32) -> (i32, i32, i32) {
    %c0_i32 = arith.constant 0 : i32
    %c0_i32_0 = arith.constant 0 : i32
    %c0_i32_1 = arith.constant 0 : i32
    %c0_i32_2 = arith.constant 0 : i32
    return %c0_i32, %c0_i32_0, %c0_i32_1 : i32, i32, i32
  }
  func.func @transform_2(%arg0: i32) -> (i32, i32) {
    %c0_i32 = arith.constant 0 : i32
    %c0_i32_0 = arith.constant 0 : i32
    %c0_i32_1 = arith.constant 0 : i32
    return %c0_i32, %c0_i32_0 : i32, i32
  }
  func.func @transform_3(%arg0: i32) -> (i32, i32) {
    %c0_i32 = arith.constant 0 : i32
    %c0_i32_0 = arith.constant 0 : i32
    %c0_i32_1 = arith.constant 0 : i32
    return %c0_i32, %c0_i32_0 : i32, i32
  }
  func.func @transform_4(%arg0: i32) -> (i32, i32, i32) {
    %c0_i32 = arith.constant 0 : i32
    %c0_i32_0 = arith.constant 0 : i32
    %c0_i32_1 = arith.constant 0 : i32
    return %arg0, %c0_i32, %c0_i32_0 : i32, i32, i32
  }
  func.func @transform_5(%arg0: i32) -> (i32, i32, i32) {
    %c0_i32 = arith.constant 0 : i32
    %c0_i32_0 = arith.constant 0 : i32
    %c0_i32_1 = arith.constant 0 : i32
    return %arg0, %c0_i32, %c0_i32_0 : i32, i32, i32
  }
  func.func @transform_6(%arg0: i32) -> (i32, i32, i32) {
    %c0_i32 = arith.constant 0 : i32
    %c0_i32_0 = arith.constant 0 : i32
    %c0_i32_1 = arith.constant 0 : i32
    return %arg0, %c0_i32, %c0_i32_0 : i32, i32, i32
  }
}

module attributes {stable_mosaic.version = 11 : i64} {
  func.func @_conv_kernel(%arg0: i32, %arg1: memref<1x28x64xbf16, #tpu.memory_space<vmem>>, %arg2: memref<16x64x1xbf16, #tpu.memory_space<vmem>>, %arg3: memref<1x1xf32, #tpu.memory_space<vmem>>, %arg4: memref<1x10x1xf32, #tpu.memory_space<vmem>>) attributes {dimension_semantics = [#tpu.dimension_semantics<parallel>], iteration_bounds = array<i64: 2>, scalar_prefetch = 0 : i64, scratch_operands = 0 : i64, tpu.core_type = #tpu.core_type<tc>, window_params = [{transform_indices = @transform_0, window_bounds = array<i64: 1, 28, 64>}, {pipeline_mode = #tpu.pipeline_mode<synchronous>, transform_indices = @transform_1, window_bounds = array<i64: 16, 64, 1>}, {pipeline_mode = #tpu.pipeline_mode<synchronous>, transform_indices = @transform_2, window_bounds = array<i64: 1, 1>}, {transform_indices = @transform_3, window_bounds = array<i64: 1, 10, 1>}]} {
    %cst = arith.constant 0.000000e+00 : f32
    %0 = vector.broadcast %cst : f32 to vector<10x1xf32>
    %c0 = arith.constant 0 : index
    %c0_0 = arith.constant 0 : index
    %c0_1 = arith.constant 0 : index
    %1 = vector.load %arg1[%c0, %c0_0, %c0_1] : memref<1x28x64xbf16, #tpu.memory_space<vmem>>, vector<1x10x64xbf16>
    %2 = vector.shape_cast %1 : vector<1x10x64xbf16> to vector<10x64xbf16>
    %c0_2 = arith.constant 0 : index
    %c0_3 = arith.constant 0 : index
    %c0_4 = arith.constant 0 : index
    %3 = vector.load %arg2[%c0_2, %c0_3, %c0_4] : memref<16x64x1xbf16, #tpu.memory_space<vmem>>, vector<1x64x1xbf16>
    %4 = vector.shape_cast %3 : vector<1x64x1xbf16> to vector<64x1xbf16>
    %cst_5 = arith.constant dense<0.000000e+00> : vector<10x1xf32>
    %5 = tpu.matmul %2, %4, %cst_5 {dimension_numbers = #tpu.dot_dimension_numbers<[1], [0], [0], [1], [0, 0, 1, 1], [], []>} : vector<10x64xbf16>, vector<64x1xbf16>, vector<10x1xf32> -> vector<10x1xf32>
    %6 = arith.addf %0, %5 : vector<10x1xf32>
    %c0_6 = arith.constant 0 : index
    %c1 = arith.constant 1 : index
    %c0_7 = arith.constant 0 : index
    %7 = vector.load %arg1[%c0_6, %c1, %c0_7] : memref<1x28x64xbf16, #tpu.memory_space<vmem>>, vector<1x10x64xbf16>
    %8 = vector.shape_cast %7 : vector<1x10x64xbf16> to vector<10x64xbf16>
    %c1_8 = arith.constant 1 : index
    %c0_9 = arith.constant 0 : index
    %c0_10 = arith.constant 0 : index
    %9 = vector.load %arg2[%c1_8, %c0_9, %c0_10] : memref<16x64x1xbf16, #tpu.memory_space<vmem>>, vector<1x64x1xbf16>
    %10 = vector.shape_cast %9 : vector<1x64x1xbf16> to vector<64x1xbf16>
    %cst_11 = arith.constant dense<0.000000e+00> : vector<10x1xf32>
    %11 = tpu.matmul %8, %10, %cst_11 {dimension_numbers = #tpu.dot_dimension_numbers<[1], [0], [0], [1], [0, 0, 1, 1], [], []>} : vector<10x64xbf16>, vector<64x1xbf16>, vector<10x1xf32> -> vector<10x1xf32>
    %12 = arith.addf %6, %11 : vector<10x1xf32>
    %c0_12 = arith.constant 0 : index
    %c2 = arith.constant 2 : index
    %c0_13 = arith.constant 0 : index
    %13 = vector.load %arg1[%c0_12, %c2, %c0_13] : memref<1x28x64xbf16, #tpu.memory_space<vmem>>, vector<1x10x64xbf16>
    %14 = vector.shape_cast %13 : vector<1x10x64xbf16> to vector<10x64xbf16>
    %c2_14 = arith.constant 2 : index
    %c0_15 = arith.constant 0 : index
    %c0_16 = arith.constant 0 : index
    %15 = vector.load %arg2[%c2_14, %c0_15, %c0_16] : memref<16x64x1xbf16, #tpu.memory_space<vmem>>, vector<1x64x1xbf16>
    %16 = vector.shape_cast %15 : vector<1x64x1xbf16> to vector<64x1xbf16>
    %cst_17 = arith.constant dense<0.000000e+00> : vector<10x1xf32>
    %17 = tpu.matmul %14, %16, %cst_17 {dimension_numbers = #tpu.dot_dimension_numbers<[1], [0], [0], [1], [0, 0, 1, 1], [], []>} : vector<10x64xbf16>, vector<64x1xbf16>, vector<10x1xf32> -> vector<10x1xf32>
    %18 = arith.addf %12, %17 : vector<10x1xf32>
    %c0_18 = arith.constant 0 : index
    %c3 = arith.constant 3 : index
    %c0_19 = arith.constant 0 : index
    %19 = vector.load %arg1[%c0_18, %c3, %c0_19] : memref<1x28x64xbf16, #tpu.memory_space<vmem>>, vector<1x10x64xbf16>
    %20 = vector.shape_cast %19 : vector<1x10x64xbf16> to vector<10x64xbf16>
    %c3_20 = arith.constant 3 : index
    %c0_21 = arith.constant 0 : index
    %c0_22 = arith.constant 0 : index
    %21 = vector.load %arg2[%c3_20, %c0_21, %c0_22] : memref<16x64x1xbf16, #tpu.memory_space<vmem>>, vector<1x64x1xbf16>
    %22 = vector.shape_cast %21 : vector<1x64x1xbf16> to vector<64x1xbf16>
    %cst_23 = arith.constant dense<0.000000e+00> : vector<10x1xf32>
    %23 = tpu.matmul %20, %22, %cst_23 {dimension_numbers = #tpu.dot_dimension_numbers<[1], [0], [0], [1], [0, 0, 1, 1], [], []>} : vector<10x64xbf16>, vector<64x1xbf16>, vector<10x1xf32> -> vector<10x1xf32>
    %24 = arith.addf %18, %23 : vector<10x1xf32>
    %c0_24 = arith.constant 0 : index
    %c5 = arith.constant 5 : index
    %c0_25 = arith.constant 0 : index
    %25 = vector.load %arg1[%c0_24, %c5, %c0_25] : memref<1x28x64xbf16, #tpu.memory_space<vmem>>, vector<1x10x64xbf16>
    %26 = vector.shape_cast %25 : vector<1x10x64xbf16> to vector<10x64xbf16>
    %c4 = arith.constant 4 : index
    %c0_26 = arith.constant 0 : index
    %c0_27 = arith.constant 0 : index
    %27 = vector.load %arg2[%c4, %c0_26, %c0_27] : memref<16x64x1xbf16, #tpu.memory_space<vmem>>, vector<1x64x1xbf16>
    %28 = vector.shape_cast %27 : vector<1x64x1xbf16> to vector<64x1xbf16>
    %cst_28 = arith.constant dense<0.000000e+00> : vector<10x1xf32>
    %29 = tpu.matmul %26, %28, %cst_28 {dimension_numbers = #tpu.dot_dimension_numbers<[1], [0], [0], [1], [0, 0, 1, 1], [], []>} : vector<10x64xbf16>, vector<64x1xbf16>, vector<10x1xf32> -> vector<10x1xf32>
    %30 = arith.addf %24, %29 : vector<10x1xf32>
    %c0_29 = arith.constant 0 : index
    %c6 = arith.constant 6 : index
    %c0_30 = arith.constant 0 : index
    %31 = vector.load %arg1[%c0_29, %c6, %c0_30] : memref<1x28x64xbf16, #tpu.memory_space<vmem>>, vector<1x10x64xbf16>
    %32 = vector.shape_cast %31 : vector<1x10x64xbf16> to vector<10x64xbf16>
    %c5_31 = arith.constant 5 : index
    %c0_32 = arith.constant 0 : index
    %c0_33 = arith.constant 0 : index
    %33 = vector.load %arg2[%c5_31, %c0_32, %c0_33] : memref<16x64x1xbf16, #tpu.memory_space<vmem>>, vector<1x64x1xbf16>
    %34 = vector.shape_cast %33 : vector<1x64x1xbf16> to vector<64x1xbf16>
    %cst_34 = arith.constant dense<0.000000e+00> : vector<10x1xf32>
    %35 = tpu.matmul %32, %34, %cst_34 {dimension_numbers = #tpu.dot_dimension_numbers<[1], [0], [0], [1], [0, 0, 1, 1], [], []>} : vector<10x64xbf16>, vector<64x1xbf16>, vector<10x1xf32> -> vector<10x1xf32>
    %36 = arith.addf %30, %35 : vector<10x1xf32>
    %c0_35 = arith.constant 0 : index
    %c7 = arith.constant 7 : index
    %c0_36 = arith.constant 0 : index
    %37 = vector.load %arg1[%c0_35, %c7, %c0_36] : memref<1x28x64xbf16, #tpu.memory_space<vmem>>, vector<1x10x64xbf16>
    %38 = vector.shape_cast %37 : vector<1x10x64xbf16> to vector<10x64xbf16>
    %c6_37 = arith.constant 6 : index
    %c0_38 = arith.constant 0 : index
    %c0_39 = arith.constant 0 : index
    %39 = vector.load %arg2[%c6_37, %c0_38, %c0_39] : memref<16x64x1xbf16, #tpu.memory_space<vmem>>, vector<1x64x1xbf16>
    %40 = vector.shape_cast %39 : vector<1x64x1xbf16> to vector<64x1xbf16>
    %cst_40 = arith.constant dense<0.000000e+00> : vector<10x1xf32>
    %41 = tpu.matmul %38, %40, %cst_40 {dimension_numbers = #tpu.dot_dimension_numbers<[1], [0], [0], [1], [0, 0, 1, 1], [], []>} : vector<10x64xbf16>, vector<64x1xbf16>, vector<10x1xf32> -> vector<10x1xf32>
    %42 = arith.addf %36, %41 : vector<10x1xf32>
    %c0_41 = arith.constant 0 : index
    %c8 = arith.constant 8 : index
    %c0_42 = arith.constant 0 : index
    %43 = vector.load %arg1[%c0_41, %c8, %c0_42] : memref<1x28x64xbf16, #tpu.memory_space<vmem>>, vector<1x10x64xbf16>
    %44 = vector.shape_cast %43 : vector<1x10x64xbf16> to vector<10x64xbf16>
    %c7_43 = arith.constant 7 : index
    %c0_44 = arith.constant 0 : index
    %c0_45 = arith.constant 0 : index
    %45 = vector.load %arg2[%c7_43, %c0_44, %c0_45] : memref<16x64x1xbf16, #tpu.memory_space<vmem>>, vector<1x64x1xbf16>
    %46 = vector.shape_cast %45 : vector<1x64x1xbf16> to vector<64x1xbf16>
    %cst_46 = arith.constant dense<0.000000e+00> : vector<10x1xf32>
    %47 = tpu.matmul %44, %46, %cst_46 {dimension_numbers = #tpu.dot_dimension_numbers<[1], [0], [0], [1], [0, 0, 1, 1], [], []>} : vector<10x64xbf16>, vector<64x1xbf16>, vector<10x1xf32> -> vector<10x1xf32>
    %48 = arith.addf %42, %47 : vector<10x1xf32>
    %c0_47 = arith.constant 0 : index
    %c10 = arith.constant 10 : index
    %c0_48 = arith.constant 0 : index
    %49 = vector.load %arg1[%c0_47, %c10, %c0_48] : memref<1x28x64xbf16, #tpu.memory_space<vmem>>, vector<1x10x64xbf16>
    %50 = vector.shape_cast %49 : vector<1x10x64xbf16> to vector<10x64xbf16>
    %c8_49 = arith.constant 8 : index
    %c0_50 = arith.constant 0 : index
    %c0_51 = arith.constant 0 : index
    %51 = vector.load %arg2[%c8_49, %c0_50, %c0_51] : memref<16x64x1xbf16, #tpu.memory_space<vmem>>, vector<1x64x1xbf16>
    %52 = vector.shape_cast %51 : vector<1x64x1xbf16> to vector<64x1xbf16>
    %cst_52 = arith.constant dense<0.000000e+00> : vector<10x1xf32>
    %53 = tpu.matmul %50, %52, %cst_52 {dimension_numbers = #tpu.dot_dimension_numbers<[1], [0], [0], [1], [0, 0, 1, 1], [], []>} : vector<10x64xbf16>, vector<64x1xbf16>, vector<10x1xf32> -> vector<10x1xf32>
    %54 = arith.addf %48, %53 : vector<10x1xf32>
    %c0_53 = arith.constant 0 : index
    %c11 = arith.constant 11 : index
    %c0_54 = arith.constant 0 : index
    %55 = vector.load %arg1[%c0_53, %c11, %c0_54] : memref<1x28x64xbf16, #tpu.memory_space<vmem>>, vector<1x10x64xbf16>
    %56 = vector.shape_cast %55 : vector<1x10x64xbf16> to vector<10x64xbf16>
    %c9 = arith.constant 9 : index
    %c0_55 = arith.constant 0 : index
    %c0_56 = arith.constant 0 : index
    %57 = vector.load %arg2[%c9, %c0_55, %c0_56] : memref<16x64x1xbf16, #tpu.memory_space<vmem>>, vector<1x64x1xbf16>
    %58 = vector.shape_cast %57 : vector<1x64x1xbf16> to vector<64x1xbf16>
    %cst_57 = arith.constant dense<0.000000e+00> : vector<10x1xf32>
    %59 = tpu.matmul %56, %58, %cst_57 {dimension_numbers = #tpu.dot_dimension_numbers<[1], [0], [0], [1], [0, 0, 1, 1], [], []>} : vector<10x64xbf16>, vector<64x1xbf16>, vector<10x1xf32> -> vector<10x1xf32>
    %60 = arith.addf %54, %59 : vector<10x1xf32>
    %c0_58 = arith.constant 0 : index
    %c12 = arith.constant 12 : index
    %c0_59 = arith.constant 0 : index
    %61 = vector.load %arg1[%c0_58, %c12, %c0_59] : memref<1x28x64xbf16, #tpu.memory_space<vmem>>, vector<1x10x64xbf16>
    %62 = vector.shape_cast %61 : vector<1x10x64xbf16> to vector<10x64xbf16>
    %c10_60 = arith.constant 10 : index
    %c0_61 = arith.constant 0 : index
    %c0_62 = arith.constant 0 : index
    %63 = vector.load %arg2[%c10_60, %c0_61, %c0_62] : memref<16x64x1xbf16, #tpu.memory_space<vmem>>, vector<1x64x1xbf16>
    %64 = vector.shape_cast %63 : vector<1x64x1xbf16> to vector<64x1xbf16>
    %cst_63 = arith.constant dense<0.000000e+00> : vector<10x1xf32>
    %65 = tpu.matmul %62, %64, %cst_63 {dimension_numbers = #tpu.dot_dimension_numbers<[1], [0], [0], [1], [0, 0, 1, 1], [], []>} : vector<10x64xbf16>, vector<64x1xbf16>, vector<10x1xf32> -> vector<10x1xf32>
    %66 = arith.addf %60, %65 : vector<10x1xf32>
    %c0_64 = arith.constant 0 : index
    %c13 = arith.constant 13 : index
    %c0_65 = arith.constant 0 : index
    %67 = vector.load %arg1[%c0_64, %c13, %c0_65] : memref<1x28x64xbf16, #tpu.memory_space<vmem>>, vector<1x10x64xbf16>
    %68 = vector.shape_cast %67 : vector<1x10x64xbf16> to vector<10x64xbf16>
    %c11_66 = arith.constant 11 : index
    %c0_67 = arith.constant 0 : index
    %c0_68 = arith.constant 0 : index
    %69 = vector.load %arg2[%c11_66, %c0_67, %c0_68] : memref<16x64x1xbf16, #tpu.memory_space<vmem>>, vector<1x64x1xbf16>
    %70 = vector.shape_cast %69 : vector<1x64x1xbf16> to vector<64x1xbf16>
    %cst_69 = arith.constant dense<0.000000e+00> : vector<10x1xf32>
    %71 = tpu.matmul %68, %70, %cst_69 {dimension_numbers = #tpu.dot_dimension_numbers<[1], [0], [0], [1], [0, 0, 1, 1], [], []>} : vector<10x64xbf16>, vector<64x1xbf16>, vector<10x1xf32> -> vector<10x1xf32>
    %72 = arith.addf %66, %71 : vector<10x1xf32>
    %c0_70 = arith.constant 0 : index
    %c15 = arith.constant 15 : index
    %c0_71 = arith.constant 0 : index
    %73 = vector.load %arg1[%c0_70, %c15, %c0_71] : memref<1x28x64xbf16, #tpu.memory_space<vmem>>, vector<1x10x64xbf16>
    %74 = vector.shape_cast %73 : vector<1x10x64xbf16> to vector<10x64xbf16>
    %c12_72 = arith.constant 12 : index
    %c0_73 = arith.constant 0 : index
    %c0_74 = arith.constant 0 : index
    %75 = vector.load %arg2[%c12_72, %c0_73, %c0_74] : memref<16x64x1xbf16, #tpu.memory_space<vmem>>, vector<1x64x1xbf16>
    %76 = vector.shape_cast %75 : vector<1x64x1xbf16> to vector<64x1xbf16>
    %cst_75 = arith.constant dense<0.000000e+00> : vector<10x1xf32>
    %77 = tpu.matmul %74, %76, %cst_75 {dimension_numbers = #tpu.dot_dimension_numbers<[1], [0], [0], [1], [0, 0, 1, 1], [], []>} : vector<10x64xbf16>, vector<64x1xbf16>, vector<10x1xf32> -> vector<10x1xf32>
    %78 = arith.addf %72, %77 : vector<10x1xf32>
    %c0_76 = arith.constant 0 : index
    %c16 = arith.constant 16 : index
    %c0_77 = arith.constant 0 : index
    %79 = vector.load %arg1[%c0_76, %c16, %c0_77] : memref<1x28x64xbf16, #tpu.memory_space<vmem>>, vector<1x10x64xbf16>
    %80 = vector.shape_cast %79 : vector<1x10x64xbf16> to vector<10x64xbf16>
    %c13_78 = arith.constant 13 : index
    %c0_79 = arith.constant 0 : index
    %c0_80 = arith.constant 0 : index
    %81 = vector.load %arg2[%c13_78, %c0_79, %c0_80] : memref<16x64x1xbf16, #tpu.memory_space<vmem>>, vector<1x64x1xbf16>
    %82 = vector.shape_cast %81 : vector<1x64x1xbf16> to vector<64x1xbf16>
    %cst_81 = arith.constant dense<0.000000e+00> : vector<10x1xf32>
    %83 = tpu.matmul %80, %82, %cst_81 {dimension_numbers = #tpu.dot_dimension_numbers<[1], [0], [0], [1], [0, 0, 1, 1], [], []>} : vector<10x64xbf16>, vector<64x1xbf16>, vector<10x1xf32> -> vector<10x1xf32>
    %84 = arith.addf %78, %83 : vector<10x1xf32>
    %c0_82 = arith.constant 0 : index
    %c17 = arith.constant 17 : index
    %c0_83 = arith.constant 0 : index
    %85 = vector.load %arg1[%c0_82, %c17, %c0_83] : memref<1x28x64xbf16, #tpu.memory_space<vmem>>, vector<1x10x64xbf16>
    %86 = vector.shape_cast %85 : vector<1x10x64xbf16> to vector<10x64xbf16>
    %c14 = arith.constant 14 : index
    %c0_84 = arith.constant 0 : index
    %c0_85 = arith.constant 0 : index
    %87 = vector.load %arg2[%c14, %c0_84, %c0_85] : memref<16x64x1xbf16, #tpu.memory_space<vmem>>, vector<1x64x1xbf16>
    %88 = vector.shape_cast %87 : vector<1x64x1xbf16> to vector<64x1xbf16>
    %cst_86 = arith.constant dense<0.000000e+00> : vector<10x1xf32>
    %89 = tpu.matmul %86, %88, %cst_86 {dimension_numbers = #tpu.dot_dimension_numbers<[1], [0], [0], [1], [0, 0, 1, 1], [], []>} : vector<10x64xbf16>, vector<64x1xbf16>, vector<10x1xf32> -> vector<10x1xf32>
    %90 = arith.addf %84, %89 : vector<10x1xf32>
    %c0_87 = arith.constant 0 : index
    %c18 = arith.constant 18 : index
    %c0_88 = arith.constant 0 : index
    %91 = vector.load %arg1[%c0_87, %c18, %c0_88] : memref<1x28x64xbf16, #tpu.memory_space<vmem>>, vector<1x10x64xbf16>
    %92 = vector.shape_cast %91 : vector<1x10x64xbf16> to vector<10x64xbf16>
    %c15_89 = arith.constant 15 : index
    %c0_90 = arith.constant 0 : index
    %c0_91 = arith.constant 0 : index
    %93 = vector.load %arg2[%c15_89, %c0_90, %c0_91] : memref<16x64x1xbf16, #tpu.memory_space<vmem>>, vector<1x64x1xbf16>
    %94 = vector.shape_cast %93 : vector<1x64x1xbf16> to vector<64x1xbf16>
    %cst_92 = arith.constant dense<0.000000e+00> : vector<10x1xf32>
    %95 = tpu.matmul %92, %94, %cst_92 {dimension_numbers = #tpu.dot_dimension_numbers<[1], [0], [0], [1], [0, 0, 1, 1], [], []>} : vector<10x64xbf16>, vector<64x1xbf16>, vector<10x1xf32> -> vector<10x1xf32>
    %96 = arith.addf %90, %95 : vector<10x1xf32>
    %c0_93 = arith.constant 0 : index
    %c0_94 = arith.constant 0 : index
    %97 = vector.load %arg3[%c0_93, %c0_94] : memref<1x1xf32, #tpu.memory_space<vmem>>, vector<1x1xf32>
    %98 = vector.broadcast %97 : vector<1x1xf32> to vector<10x1xf32>
    %99 = arith.addf %96, %98 : vector<10x1xf32>
    %c0_95 = arith.constant 0 : index
    %c0_96 = arith.constant 0 : index
    %c0_97 = arith.constant 0 : index
    %100 = vector.load %arg4[%c0_95, %c0_96, %c0_97] : memref<1x10x1xf32, #tpu.memory_space<vmem>>, vector<1x10x1xf32>
    %101 = vector.shape_cast %100 : vector<1x10x1xf32> to vector<10x1xf32>
    %102 = vector.shape_cast %99 : vector<10x1xf32> to vector<1x10x1xf32>
    tpu.vector_store %arg4[%c0_95, %c0_96, %c0_97], %102 {strides = array<i32>} : memref<1x10x1xf32, #tpu.memory_space<vmem>>, vector<1x10x1xf32>,
    return
  }
  func.func @transform_0(%arg0: i32) -> (i32, i32, i32) {
    %c0_i32 = arith.constant 0 : i32
    %c0_i32_0 = arith.constant 0 : i32
    %c0_i32_1 = arith.constant 0 : i32
    return %arg0, %c0_i32, %c0_i32_0 : i32, i32, i32
  }
  func.func @transform_1(%arg0: i32) -> (i32, i32, i32) {
    %c0_i32 = arith.constant 0 : i32
    %c0_i32_0 = arith.constant 0 : i32
    %c0_i32_1 = arith.constant 0 : i32
    %c0_i32_2 = arith.constant 0 : i32
    return %c0_i32, %c0_i32_0, %c0_i32_1 : i32, i32, i32
  }
  func.func @transform_2(%arg0: i32) -> (i32, i32) {
    %c0_i32 = arith.constant 0 : i32
    %c0_i32_0 = arith.constant 0 : i32
    %c0_i32_1 = arith.constant 0 : i32
    return %c0_i32, %c0_i32_0 : i32, i32
  }
  func.func @transform_3(%arg0: i32) -> (i32, i32, i32) {
    %c0_i32 = arith.constant 0 : i32
    %c0_i32_0 = arith.constant 0 : i32
    %c0_i32_1 = arith.constant 0 : i32
    return %arg0, %c0_i32, %c0_i32_0 : i32, i32, i32
  }
}

</mosaic_0001>

<bundles_post_ra>
// kernel: discriminator_patch_forward.8
= control target key start
LH: loop header
LB: loop body
LE: loop exit
PB: predicated region body
PF: predicated region fallthrough
CT: control target
= control target key end

     0   :  { %s2044_s12 = smov 0   ;;  %s2432_s0 = inlined_call_operand.vmem [shape: bf16[2,290,32], index: 0, kind: input, shape index: {}]   ;;  %s2433_s1 = inlined_call_operand.vmem [shape: bf16[4,32,8], index: 1, kind: input, shape index: {}]   ;;  %s2434_s2 = inlined_call_operand.vmem [shape: f32[1,8], index: 2, kind: input, shape index: {}]   ;;  %s2435_s3 = inlined_call_operand.vmem [shape: bf16[2,272,8], index: 3, kind: output, shape index: {}]  }
   0x1 LB: > { %s1702_s13 = sadd.s32 4294967295, %s2022_s12   ;;  %p1706_p0 = scmp.ge.s32.totalorder %s2022_s12, 1  ;;  %s2022_s12 = sphi %s2044_s12, %s13_s12  }
   0x2   : > { %p137_p1 = scmp.lt.s32.totalorder %s2022_s12, 3 }
   0x4   : > { %p138_p2 = pnand %p1706_p0, %p137_p1 }
   0x5   : > { %p161_p3 = scmp.lt.s32.totalorder (!%p138_p2), %s1702_s13, 1 }
   0x6   : > { %141 = sbr.rel (%p138_p2) target bundleno = 433 (0x1b1), region = 32 }
   0xb   : > { %v1973_v0 = vld [vmem:[%s2433_s1 + $0x8] sm:$0xff]  ;;  %v1995_v1 = vld [vmem:[%s2433_s1 + $0x38] sm:$0xff]  ;;  %v1972_v4 = vld [vmem:[%s2433_s1] sm:$0xff]  ;;  %s2437_s13 = smov (!%p161_p3, %s1702_s13), 1  ;;  %vm457_vm0 = vcmask 261120   ;;  %vm1211_vm1 = vcmask 1046528  }
   0xc   : > { %v1993_v2 = vld [vmem:[%s2433_s1 + $0x28] sm:$0xff]  ;;  %v1975_v3 = vld [vmem:[%s2433_s1 + $0x18] sm:$0xff]  ;;  %655 = vmatpush.bf16.msra.mxu1 %v1973_v0  ;;  %1316 = vmatpush.bf16.msra.mxu3 %v1995_v1  ;;  %v1994_v5 = vld [vmem:[%s2433_s1 + $0x30] sm:$0xff]  ;;  %s2004_s30 = smul.u32 148, %s2437_s13  ;;  %vm304_vm2 = vsmask.f32 7424 }
   0xd   : > { %1080 = vmatpush.bf16.msra.mxu2 %v1993_v2  ;;  %515 = vmatpush.bf16.msra.mxu0 %v1975_v3  ;;  %v1992_v6 = vld [vmem:[%s2433_s1 + $0x20] sm:$0xff]  ;;  %v1974_v7 = vld [vmem:[%s2433_s1 + $0x10] sm:$0xff]  ;;  %s2005_s9 = smul.u32 136, %s2437_s13  ;;  %vm1612_vm4 = vcmask 60416  }
   0xe   : > { %s2082_s6 = scalar_lea.vmem %s2432_s0, %s2004_s30 }
   0xf   : > { %v1955_v8 = vld [vmem:[%s2082_s6] sm:$0xff]  ;;  %v2001_v9 = vld [vmem:[%s2082_s6 + $0x8] sm:$0xf0]  ;;  %v1976_v10 = vld [vmem:[%s2082_s6 + $0x10] sm:$0xff]  ;;  %s2190_s14 = scalar_lea.vmem %s2435_s3, %s2005_s9 }
  0x10   : > { %656 = vmatpush.bf16.msra.mxu1 %v1972_v4  ;;  %1317 = vmatpush.bf16.msra.mxu3 %v1994_v5  ;;  %v2002_v11 = vld [vmem:[%s2082_s6 + $0x8] sm:$0xe]  ;;  %v308_v14 = vshll.u32 %v1955_v8, 16  ;;  %v1213_v16 = vrot.slane %v1976_v10, 1  ;;  %v879_v19 = vshll.u32 %v1976_v10, 16  ;;  %v306_v20 = vshrl.u32 %v1955_v8, 16 }
  0x11   : > { %1081 = vmatpush.bf16.msra.mxu2 %v1992_v6  ;;  %516 = vmatpush.bf16.msra.mxu0 %v1974_v7  ;;  %v2000_v12 = vld [vmem:[%s2082_s6 + $0x8] sm:$0xff]   ;;  %v2003_v15 = vor.u32 %v2002_v11, %v2001_v9  ;;  %v1957_v32 = vld [vmem:[%s2082_s6 + $0x10] sm:$0xff]  ;;  %v1977_v33 = vld [vmem:[%s2082_s6 + $0x18] sm:$0xff]  ;;  %v883_v36 = vshrl.u32 %v1976_v10, 16 }
  0x12   : > { %v1956_v13 = vld [vmem:[%s2082_s6 + $0x8] sm:$0xff]  ;;  %v872_v17 = vshrl.u32 %v2000_v12, 16  ;;  %v874_v18 = vshll.u32 %v2000_v12, 16  ;;  %v310_v23 = vrot.slane %v308_v14, 1  ;;  %v881_v25 = vrot.slane %v879_v19, 1  ;;  %v1958_v46 = vld [vmem:[%s2082_s6 + $0x18] sm:$0xff] }
  0x13   : > { %1814 = vmatmul.msk.bf16.vlgmr.msra.gmra.mxu1 %vm457_vm0, %v1955_v8  ;;  %v313_v21 = vshll.u32 %v1956_v13, 16  ;;  %v1212_v22 = vrot.slane %v2003_v15, 1  ;;  %v317_v34 = vshrl.u32 %v1956_v13, 16  ;;  %v321_v35 = vshll.u32 %v1957_v32, 16  ;;  %v1978_v47 = vld [vmem:[%s2082_s6 + $0x20] sm:$0xff]  ;;  %v1979_v61 = vld [vmem:[%s2082_s6 + $0x28] sm:$0xff] }
  0x14   : > { %v876_v24 = vrot.slane %v874_v18, 1  ;;  %v311_v28 = vor.u32 %v310_v23, %v306_v20  ;;  %v887_v37 = vshll.u32 %v1977_v33, 16  ;;  %v1215_v38 = vrot.slane %v1977_v33, 1  ;;  %v1959_v60 = vld [vmem:[%s2082_s6 + $0x20] sm:$0xff]  ;;  %v1960_v10 = vld [vmem:[%s2082_s6 + $0x28] sm:$0xff]  ;;  %v1980_v11 = vld [vmem:[%s2082_s6 + $0x30] sm:$0xff] }
  0x15   : > { %v315_v26 = vrot.slane %v313_v21, 1  ;;  %v1214_v27 = vsel %vm1211_vm1, %v1212_v22, %v1213_v16  ;;  %v323_v40 = vrot.slane %v321_v35, 1  ;;  %v885_v41 = vor.u32 %v883_v36, %v881_v25 }
  0x16   : > { %1936 = vmatmul.msk.bf16.vlgmr.msra.gmra.mxu3 %vm457_vm0, %v1214_v27  ;;  %v877_v29 = vor.u32 %v876_v24, %v872_v17  ;;  %v889_v42 = vrot.slane %v887_v37, 1  ;;  %v1216_v43 = vsel %vm1211_vm1, %v1213_v16, %v1215_v38  ;;  %v325_v48 = vshrl.u32 %v1957_v32, 16  ;;  %v1961_v24 = vld [vmem:[%s2082_s6 + $0x30] sm:$0xff] }
  0x17   : > { %v316_v30 = vsel %vm304_vm2, %v311_v28, %v315_v26  ;;  %v319_v39 = vor.u32 %v317_v34, %v315_v26  ;;  %v329_v49 = vshll.u32 %v1958_v46, 16  ;;  %v891_v50 = vshrl.u32 %v1977_v33, 16 }
  0x18   : > { %v882_v31 = vsel %vm304_vm2, %v877_v29, %v881_v25  ;;  %1789 = vmatmul.msk.bf16.vlgmr.msra.gmra.mxu0 %vm457_vm0, %v316_v30  ;;  %v890_v45 = vsel %vm304_vm2, %v885_v41, %v889_v42  ;;  %v895_v51 = vshll.u32 %v1978_v47, 16  ;;  %v1217_v52 = vrot.slane %v1978_v47, 1  ;;  %v1981_v25 = vld [vmem:[%s2082_s6 + $0x38] sm:$0xff] }
  0x19   : > { %1907 = vmatmul.msk.bf16.vlgmr.msra.gmra.mxu2 %vm457_vm0, %v882_v31  ;;  %v324_v44 = vsel %vm304_vm2, %v319_v39, %v323_v40  ;;  %v327_v53 = vor.u32 %v325_v48, %v323_v40  ;;  %v331_v54 = vrot.slane %v329_v49, 1  ;;  %v893_v55 = vor.u32 %v891_v50, %v889_v42  ;;  %v1982_v39 = vld [vmem:[%s2082_s6 + $0x40] sm:$0xff] }
  0x1a   : > { %v897_v56 = vrot.slane %v895_v51, 1  ;;  %v1218_v57 = vsel %vm1211_vm1, %v1215_v38, %v1217_v52  ;;  %v333_v62 = vshrl.u32 %v1958_v46, 16  ;;  %v337_v63 = vshll.u32 %v1959_v60, 16  ;;  %v1962_v38 = vld [vmem:[%s2082_s6 + $0x38] sm:$0xff] }
  0x1b   : > { %v332_v58 = vsel %vm304_vm2, %v327_v53, %v331_v54  ;;  %v899_v0 = vshrl.u32 %v1978_v47, 16  ;;  %v903_v1 = vshll.u32 %v1979_v61, 16  ;;  %v1219_v2 = vrot.slane %v1979_v61, 1  ;;  %v1983_v53 = vld [vmem:[%s2082_s6 + $0x48] sm:$0xff] }
  0x1c   : > { %v898_v59 = vsel %vm304_vm2, %v893_v55, %v897_v56  ;;  %v335_v3 = vor.u32 %v333_v62, %v331_v54  ;;  %v339_v4 = vrot.slane %v337_v63, 1  ;;  %v341_v12 = vshrl.u32 %v1959_v60, 16 }
  0x1d   : > { %v901_v5 = vor.u32 %v899_v0, %v897_v56  ;;  %v905_v6 = vrot.slane %v903_v1, 1  ;;  %v1220_v7 = vsel %vm1211_vm1, %v1217_v52, %v1219_v2  ;;  %v907_v14 = vshrl.u32 %v1979_v61, 16  ;;  %v1963_v52 = vld [vmem:[%s2082_s6 + $0x40] sm:$0xff] }
  0x1e   : > { %v340_v8 = vsel %vm304_vm2, %v335_v3, %v339_v4  ;;  %v911_v15 = vshll.u32 %v1980_v11, 16  ;;  %v1221_v16 = vrot.slane %v1980_v11, 1  ;;  %v343_v17 = vor.u32 %v341_v12, %v339_v4  ;;  %v1984_v3 = vld [vmem:[%s2082_s6 + $0x50] sm:$0xff] }
  0x1f   : > { %v906_v9 = vsel %vm304_vm2, %v901_v5, %v905_v6  ;;  %v909_v19 = vor.u32 %v907_v14, %v905_v6  ;;  %v349_v26 = vshrl.u32 %v1960_v10, 16  ;;  %v353_v27 = vshll.u32 %v1961_v24, 16 }
  0x20   : > { %v913_v20 = vrot.slane %v911_v15, 1  ;;  %v1222_v21 = vsel %vm1211_vm1, %v1219_v2, %v1221_v16  ;;  %v915_v28 = vshrl.u32 %v1980_v11, 16  ;;  %v919_v29 = vshll.u32 %v1981_v25, 16  ;;  %v1964_v2 = vld [vmem:[%s2082_s6 + $0x48] sm:$0xff] }
  0x21   : > { %v1223_v30 = vrot.slane %v1981_v25, 1  ;;  %v357_v40 = vshrl.u32 %v1961_v24, 16  ;;  %v361_v41 = vshll.u32 %v1962_v38, 16  ;;  %v923_v42 = vshrl.u32 %v1981_v25, 16  ;;  %v2178_v25 = vld [vmem:[%s2434_s2] ss:$0 sm:$0xff] }
  0x22   : > { %v914_v23 = vsel %vm304_vm2, %v909_v19, %v913_v20  ;;  %v917_v33 = vor.u32 %v915_v28, %v913_v20  ;;  %v921_v34 = vrot.slane %v919_v29, 1  ;;  %v365_v54 = vshrl.u32 %v1962_v38, 16 }
  0x23   : > { %1815 = vmatmul.msk.bf16.gmra.mxu1 %vm457_vm0, %v1956_v13  ;;  %v345_v13 = vshll.u32 %v1960_v10, 16  ;;  %v1224_v35 = vsel %vm1211_vm1, %v1221_v16, %v1223_v30  ;;  %v369_v55 = vshll.u32 %v1963_v52, 16  ;;  %v931_v56 = vshrl.u32 %v1982_v39, 16 }
  0x24   : > { %v922_v37 = vsel %vm304_vm2, %v917_v33, %v921_v34  ;;  %v925_v47 = vor.u32 %v923_v42, %v921_v34  ;;  %v373_v4 = vshrl.u32 %v1963_v52, 16  ;;  %v377_v5 = vshll.u32 %v1964_v2, 16 }
  0x25   : > { %v347_v18 = vrot.slane %v345_v13, 1 }
  0x26   : > { %1937 = vmatmul.msk.bf16.gmra.mxu3 %vm457_vm0, %v1216_v43  ;;  %v927_v43 = vshll.u32 %v1982_v39, 16  ;;  %v379_v11 = vrot.slane %v377_v5, 1 }
  0x27   : > { %v348_v22 = vsel %vm304_vm2, %v343_v17, %v347_v18  ;;  %v351_v31 = vor.u32 %v349_v26, %v347_v18 }
  0x28   : > { %1790 = vmatmul.msk.bf16.gmra.mxu0 %vm457_vm0, %v324_v44  ;;  %v1225_v44 = vrot.slane %v1982_v39, 1  ;;  %v929_v48 = vrot.slane %v927_v43, 1 }
  0x29   : > { %1908 = vmatmul.msk.bf16.gmra.mxu2 %vm457_vm0, %v890_v45 }
  0x2a   : > { %v1226_v49 = vsel %vm1211_vm1, %v1223_v30, %v1225_v44  ;;  %v930_v51 = vsel %vm304_vm2, %v925_v47, %v929_v48  ;;  %v933_v61 = vor.u32 %v931_v56, %v929_v48  ;;  %v947_v30 = vshrl.u32 %v1984_v3, 16  ;;  %v2204_v56 = vld [vmem:[%s2082_s6 + $0x60] sm:$0xff] }
  0x2b   : > { %v1233_v5 = vrot.slane %v2204_v56, 1 }
  0x33   : > { %1816 = vmatmul.msk.bf16.gmra.mxu1 %vm457_vm0, %v1957_v32  ;;  %v355_v32 = vrot.slane %v353_v27, 1  ;;  %v381_v27 = vshrl.u32 %v1964_v2, 16 }
  0x35   : > { %v356_v36 = vsel %vm304_vm2, %v351_v31, %v355_v32  ;;  %v359_v45 = vor.u32 %v357_v40, %v355_v32 }
  0x36   : > { %1938 = vmatmul.msk.bf16.gmra.mxu3 %vm457_vm0, %v1218_v57  ;;  %v935_v57 = vshll.u32 %v1983_v53, 16 }
  0x38   : > { %1791 = vmatmul.msk.bf16.gmra.mxu0 %vm457_vm0, %v332_v58  ;;  %v1227_v58 = vrot.slane %v1983_v53, 1  ;;  %v937_v62 = vrot.slane %v935_v57, 1 }
  0x39   : > { %1909 = vmatmul.msk.bf16.gmra.mxu2 %vm457_vm0, %v898_v59 }
  0x3a   : > { %v1228_v63 = vsel %vm1211_vm1, %v1225_v44, %v1227_v58  ;;  %v938_v1 = vsel %vm304_vm2, %v933_v61, %v937_v62 }
  0x43   : > { %1817 = vmatmul.msk.bf16.gmra.mxu1 %vm457_vm0, %v1958_v46  ;;  %v363_v46 = vrot.slane %v361_v41, 1 }
  0x45   : > { %v364_v50 = vsel %vm304_vm2, %v359_v45, %v363_v46  ;;  %v367_v59 = vor.u32 %v365_v54, %v363_v46 }
  0x46   : > { %1939 = vmatmul.msk.bf16.gmra.mxu3 %vm457_vm0, %v1220_v7  ;;  %v939_v7 = vshrl.u32 %v1983_v53, 16 }
  0x48   : > { %1792 = vmatmul.msk.bf16.gmra.mxu0 %vm457_vm0, %v340_v8  ;;  %v943_v8 = vshll.u32 %v1984_v3, 16  ;;  %v941_v12 = vor.u32 %v939_v7, %v937_v62 }
  0x49   : > { %1910 = vmatmul.msk.bf16.gmra.mxu2 %vm457_vm0, %v906_v9  ;;  %v1229_v9 = vrot.slane %v1984_v3, 1  ;;  %v959_v3 = vshll.u32 %v2204_v56, 16 }
  0x4a   : > { %v945_v13 = vrot.slane %v943_v8, 1 }
  0x4b   : > { %v1230_v14 = vsel %vm1211_vm1, %v1227_v58, %v1229_v9 }
  0x4c   : > { %v946_v17 = vsel %vm304_vm2, %v941_v12, %v945_v13 }
  0x53   : > { %1818 = vmatmul.msk.bf16.gmra.mxu1 %vm457_vm0, %v1959_v60  ;;  %v371_v60 = vrot.slane %v369_v55, 1  ;;  %v2201_v55 = vld [vmem:[%s2082_s6 + $0x58] sm:$0xff] }
  0x55   : > { %v372_v0 = vsel %vm304_vm2, %v367_v59, %v371_v60 }
  0x56   : > { %1940 = vmatmul.msk.bf16.gmra.mxu3 %vm457_vm0, %v1222_v21  ;;  %v2170_v21 = vld [vmem:[%s2082_s6 + $0x50] sm:$0xff] }
  0x57   : > { %v385_v28 = vshll.u32 %v2170_v21, 16  ;;  %v389_v62 = vshrl.u32 %v2170_v21, 16 }
  0x58   : > { %1793 = vmatmul.msk.bf16.gmra.mxu0 %vm457_vm0, %v348_v22  ;;  %v2173_v22 = vld [vmem:[%s2082_s6 + $0x58] sm:$0xff] }
  0x59   : > { %1911 = vmatmul.msk.bf16.gmra.mxu2 %vm457_vm0, %v914_v23  ;;  %v951_v31 = vshll.u32 %v2173_v22, 16  ;;  %v1231_v33 = vrot.slane %v2173_v22, 1 }
  0x5b   : > { %v953_v39 = vrot.slane %v951_v31, 1  ;;  %v1232_v42 = vsel %vm1211_vm1, %v1229_v9, %v1231_v33 }
  0x63   : > { %1819 = vmatmul.msk.bf16.gmra.mxu1 %vm457_vm0, %v1960_v10  ;;  %v375_v10 = vor.u32 %v373_v4, %v371_v60 }
  0x65   : > { %v380_v16 = vsel %vm304_vm2, %v375_v10, %v379_v11 }
  0x66   : > { %1941 = vmatmul.msk.bf16.gmra.mxu3 %vm457_vm0, %v1224_v35 }
  0x68   : > { %1794 = vmatmul.msk.bf16.gmra.mxu0 %vm457_vm0, %v356_v36  ;;  %v383_v36 = vor.u32 %v381_v27, %v379_v11  ;;  %v961_v11 = vrot.slane %v959_v3, 1 }
  0x69   : > { %1912 = vmatmul.msk.bf16.gmra.mxu2 %vm457_vm0, %v922_v37  ;;  %v387_v37 = vrot.slane %v385_v28, 1  ;;  %v2226_v28 = vld [vmem:[%s2082_s6 + $0x60] sm:$0xff] }
  0x6b   : > { %v388_v47 = vsel %vm304_vm2, %v383_v36, %v387_v37  ;;  %v391_v8 = vor.u32 %v389_v62, %v387_v37  ;;  %v401_v36 = vshll.u32 %v2226_v28, 16 }
  0x73   : > { %1820 = vmatmul.msk.bf16.gmra.mxu1 %vm457_vm0, %v1961_v24 }
  0x76   : > { %1942 = vmatmul.msk.bf16.gmra.mxu3 %vm457_vm0, %v1226_v49 }
  0x78   : > { %1795 = vmatmul.msk.bf16.gmra.mxu0 %vm457_vm0, %v364_v50 }
  0x79   : > { %1913 = vmatmul.msk.bf16.gmra.mxu2 %vm457_vm0, %v930_v51 }
  0x83   : > { %1821 = vmatmul.msk.bf16.gmra.mxu1 %vm457_vm0, %v1962_v38  ;;  %v949_v38 = vor.u32 %v947_v30, %v945_v13 }
  0x85   : > { %v954_v49 = vsel %vm304_vm2, %v949_v38, %v953_v39 }
  0x86   : > { %1943 = vmatmul.msk.bf16.gmra.mxu3 %vm457_vm0, %v1228_v63  ;;  %v393_v63 = vshll.u32 %v2201_v55, 16 }
  0x88   : > { %1796 = vmatmul.msk.bf16.gmra.mxu0 %vm457_vm0, %v372_v0  ;;  %v395_v9 = vrot.slane %v393_v63, 1 }
  0x89   : > { %1914 = vmatmul.msk.bf16.gmra.mxu2 %vm457_vm0, %v938_v1 }
  0x90   : > { %v658_v6 = vpop.f32.mrf.mxu1 }
  0x93   : > { %1822 = vmatmul.msk.bf16.gmra.mxu1 %vm457_vm0, %v1963_v52 }
  0x95   : > { %v518_v15 = vpop.f32.mrf.mxu0 }
  0x96   : > { %1944 = vmatmul.msk.bf16.gmra.mxu3 %vm457_vm0, %v1230_v14  ;;  %v659_v19 = vadd.f32 %v658_v6, %v518_v15  ;;  %v1234_v14 = vsel %vm1211_vm1, %v1231_v33, %v1233_v5 }
  0x98   : > { %v660_v18 = vpop.f32.mrf.mxu1  ;;  %1797 = vmatmul.msk.bf16.gmra.mxu0 %vm457_vm0, %v380_v16 }
  0x99   : > { %1915 = vmatmul.msk.bf16.gmra.mxu2 %vm457_vm0, %v946_v17  ;;  %v1319_v20 = vpop.f32.mrf.mxu3 }
  0x9c   : > { %v1083_v23 = vpop.f32.mrf.mxu2 }
  0x9d   : > { %v1168_v24 = vadd.f32 %v1083_v23, %v659_v19  ;;  %v520_v26 = vpop.f32.mrf.mxu0  ;;  %v396_v19 = vsel %vm304_vm2, %v391_v8, %v395_v9 }
  0x9e   : > { %v661_v41 = vadd.f32 %v660_v18, %v520_v26 }
  0x9f   : > { %v1404_v32 = vadd.f32 %v1319_v20, %v1168_v24 }
  0xa0   : > { %v663_v29 = vpop.f32.mrf.mxu1 }
  0xa1   : > { %v1442_v34 = vadd.f32 %v2178_v25, %v1404_v32  ;;  %v1321_v35 = vpop.f32.mrf.mxu3 }
  0xa3   : > { %1823 = vmatmul.msk.bf16.gmra.mxu1 %vm457_vm0, %v1964_v2  ;;  %vm1476_vm3 = vcmp.ge.f32.partialorder %v1442_v34, 0.0  ;;  %v1510_v40 = vmul.f32 0.2, %v1442_v34  ;;  %v955_v2 = vshrl.u32 %v2173_v22, 16 }
  0xa4   : > { %v1085_v43 = vpop.f32.mrf.mxu2 }
  0xa5   : > { %v1544_v44 = vsel %vm1476_vm3, %v1442_v34, %v1510_v40  ;;  %v1169_v45 = vadd.f32 %v1085_v43, %v661_v41  ;;  %v523_v46 = vpop.f32.mrf.mxu0  ;;  %v957_v10 = vor.u32 %v955_v2, %v953_v39  ;;  %v963_v39 = vshrl.u32 %v2204_v56, 16 }
  0xa6   : > { %v1578_v48 = vpack.c.bf16 %v1544_v44, %v1544_v44  ;;  %1945 = vmatmul.msk.bf16.gmra.mxu3 %vm457_vm0, %v1232_v42  ;;  %v664_v53 = vadd.f32 %v663_v29, %v523_v46  ;;  %v2229_v29 = vld [vmem:[%s2082_s6 + $0x68] sm:$0xff]  ;;  %v403_v46 = vrot.slane %v401_v36, 1 }
  0xa7   : > { %v1405_v51 = vadd.f32 %v1321_v35, %v1169_v45  ;;  %v397_v35 = vshrl.u32 %v2201_v55, 16  ;;  %v967_v40 = vshll.u32 %v2229_v29, 16  ;;  %v1235_v42 = vrot.slane %v2229_v29, 1 }
  0xa8   : > { %v665_v50 = vpop.f32.mrf.mxu1  ;;  %1613 = vst.msk [vmem:[%s2190_s14] sm:$0xf] %vm1612_vm4, %v1578_v48  ;;  %1798 = vmatmul.msk.bf16.gmra.mxu0 %vm457_vm0, %v388_v47  ;;  %v965_v47 = vor.u32 %v963_v39, %v961_v11 }
  0xa9   : > { %v1443_v52 = vadd.f32 %v2178_v25, %v1405_v51  ;;  %1916 = vmatmul.msk.bf16.gmra.mxu2 %vm457_vm0, %v954_v49  ;;  %v1324_v54 = vpop.f32.mrf.mxu3  ;;  %v399_v45 = vor.u32 %v397_v35, %v395_v9  ;;  %v969_v48 = vrot.slane %v967_v40, 1  ;;  %v1236_v51 = vsel %vm1211_vm1, %v1233_v5, %v1235_v42 }
  0xab   : > { %vm1477_vm5 = vcmp.ge.f32.partialorder %v1443_v52, 0.0  ;;  %v1511_v57 = vmul.f32 0.2, %v1443_v52 }
  0xac   : > { %v1088_v58 = vpop.f32.mrf.mxu2 }
  0xad   : > { %v1545_v59 = vsel %vm1477_vm5, %v1443_v52, %v1511_v57  ;;  %v1170_v60 = vadd.f32 %v1088_v58, %v664_v53  ;;  %v525_v61 = vpop.f32.mrf.mxu0  ;;  %v404_v57 = vsel %vm304_vm2, %v399_v45, %v403_v46 }
  0xae   : > { %v1579_v0 = vpack.c.bf16 %v1545_v59, %v1545_v59  ;;  %v666_v13 = vadd.f32 %v665_v50, %v525_v61 }
  0xaf   : > { %v1406_v4 = vadd.f32 %v1324_v54, %v1170_v60 }
  0xb0   : > { %v668_v1 = vpop.f32.mrf.mxu1  ;;  %1614 = vst.msk [vmem:[%s2190_s14 + $0x4] sm:$0xf] %vm1612_vm4, %v1579_v0  ;;  %v2251_v0 = vld [vmem:[%s2082_s6 + $0x68] sm:$0xff] }
  0xb1   : > { %v1444_v6 = vadd.f32 %v2178_v25, %v1406_v4  ;;  %v1326_v7 = vpop.f32.mrf.mxu3  ;;  %v409_v8 = vshll.u32 %v2251_v0, 16 }
  0xb3   : > { %1824 = vmatmul.msk.bf16.gmra.mxu1 %vm457_vm0, %v2170_v21  ;;  %vm1478_vm6 = vcmp.ge.f32.partialorder %v1444_v6, 0.0  ;;  %v1512_v12 = vmul.f32 0.2, %v1444_v6  ;;  %v962_v21 = vsel %vm304_vm2, %v957_v10, %v961_v11  ;;  %v971_v11 = vshrl.u32 %v2229_v29, 16 }
  0xb4   : > { %v1090_v15 = vpop.f32.mrf.mxu2 }
  0xb5   : > { %v1546_v16 = vsel %vm1478_vm6, %v1444_v6, %v1512_v12  ;;  %v1171_v17 = vadd.f32 %v1090_v15, %v666_v13  ;;  %v528_v18 = vpop.f32.mrf.mxu0 }
  0xb6   : > { %v1580_v20 = vpack.c.bf16 %v1546_v16, %v1546_v16  ;;  %1946 = vmatmul.msk.bf16.gmra.mxu3 %vm457_vm0, %v1234_v14  ;;  %v669_v26 = vadd.f32 %v668_v1, %v528_v18  ;;  %v2254_v1 = vld [vmem:[%s2082_s6 + $0x70] sm:$0xff]  ;;  %v411_v18 = vrot.slane %v409_v8, 1 }
  0xb7   : > { %v1407_v23 = vadd.f32 %v1326_v7, %v1171_v17  ;;  %v405_v7 = vshrl.u32 %v2226_v28, 16  ;;  %v975_v12 = vshll.u32 %v2254_v1, 16  ;;  %v1237_v14 = vrot.slane %v2254_v1, 1 }
  0xb8   : > { %v670_v22 = vpop.f32.mrf.mxu1  ;;  %1615 = vst.msk [vmem:[%s2190_s14 + $0x8] sm:$0xf] %vm1612_vm4, %v1580_v20  ;;  %1799 = vmatmul.msk.bf16.gmra.mxu0 %vm457_vm0, %v396_v19  ;;  %v973_v19 = vor.u32 %v971_v11, %v969_v48 }
  0xb9   : > { %v1445_v24 = vadd.f32 %v2178_v25, %v1407_v23  ;;  %1917 = vmatmul.msk.bf16.gmra.mxu2 %vm457_vm0, %v962_v21  ;;  %v1329_v27 = vpop.f32.mrf.mxu3  ;;  %v407_v17 = vor.u32 %v405_v7, %v403_v46  ;;  %v977_v20 = vrot.slane %v975_v12, 1  ;;  %v1238_v23 = vsel %vm1211_vm1, %v1235_v42, %v1237_v14 }
  0xbb   : > { %vm1479_vm7 = vcmp.ge.f32.partialorder %v1445_v24, 0.0  ;;  %v1513_v30 = vmul.f32 0.2, %v1445_v24 }
  0xbc   : > { %v1093_v31 = vpop.f32.mrf.mxu2 }
  0xbd   : > { %v1547_v32 = vsel %vm1479_vm7, %v1445_v24, %v1513_v30  ;;  %v1172_v33 = vadd.f32 %v1093_v31, %v669_v26  ;;  %v530_v34 = vpop.f32.mrf.mxu0  ;;  %v412_v30 = vsel %vm304_vm2, %v407_v17, %v411_v18 }
  0xbe   : > { %v1581_v37 = vpack.c.bf16 %v1547_v32, %v1547_v32  ;;  %v671_v50 = vadd.f32 %v670_v22, %v530_v34 }
  0xbf   : > { %v1408_v41 = vadd.f32 %v1329_v27, %v1172_v33 }
  0xc0   : > { %v673_v38 = vpop.f32.mrf.mxu1  ;;  %1616 = vst.msk [vmem:[%s2190_s14 + $0xc] sm:$0xf] %vm1612_vm4, %v1581_v37  ;;  %v2276_v37 = vld [vmem:[%s2082_s6 + $0x70] sm:$0xff] }
  0xc1   : > { %v1446_v43 = vadd.f32 %v2178_v25, %v1408_v41  ;;  %v1331_v44 = vpop.f32.mrf.mxu3  ;;  %v417_v45 = vshll.u32 %v2276_v37, 16 }
  0xc3   : > { %1825 = vmatmul.msk.bf16.gmra.mxu1 %vm457_vm0, %v2201_v55  ;;  %vm1480_vm8 = vcmp.ge.f32.partialorder %v1446_v43, 0.0  ;;  %v1514_v49 = vmul.f32 0.2, %v1446_v43  ;;  %v970_v55 = vsel %vm304_vm2, %v965_v47, %v969_v48  ;;  %v979_v48 = vshrl.u32 %v2254_v1, 16 }
  0xc4   : > { %v1095_v52 = vpop.f32.mrf.mxu2 }
  0xc5   : > { %v1548_v53 = vsel %vm1480_vm8, %v1446_v43, %v1514_v49  ;;  %v1173_v54 = vadd.f32 %v1095_v52, %v671_v50  ;;  %v533_v56 = vpop.f32.mrf.mxu0 }
  0xc6   : > { %v1582_v58 = vpack.c.bf16 %v1548_v53, %v1548_v53  ;;  %1947 = vmatmul.msk.bf16.gmra.mxu3 %vm457_vm0, %v1236_v51  ;;  %v674_v62 = vadd.f32 %v673_v38, %v533_v56  ;;  %v2279_v38 = vld [vmem:[%s2082_s6 + $0x78] sm:$0xff]  ;;  %v419_v56 = vrot.slane %v417_v45, 1 }
  0xc7   : > { %v1409_v60 = vadd.f32 %v1331_v44, %v1173_v54  ;;  %v413_v44 = vshrl.u32 %v2251_v0, 16  ;;  %v983_v49 = vshll.u32 %v2279_v38, 16  ;;  %v1239_v51 = vrot.slane %v2279_v38, 1 }
  0xc8   : > { %v675_v59 = vpop.f32.mrf.mxu1  ;;  %1617 = vst.msk [vmem:[%s2190_s14 + $0x10] sm:$0xf] %vm1612_vm4, %v1582_v58  ;;  %1800 = vmatmul.msk.bf16.gmra.mxu0 %vm457_vm0, %v404_v57  ;;  %v981_v57 = vor.u32 %v979_v48, %v977_v20 }
  0xc9   : > { %v1447_v61 = vadd.f32 %v2178_v25, %v1409_v60  ;;  %1918 = vmatmul.msk.bf16.gmra.mxu2 %vm457_vm0, %v970_v55  ;;  %v1334_v63 = vpop.f32.mrf.mxu3  ;;  %v415_v54 = vor.u32 %v413_v44, %v411_v18  ;;  %v985_v58 = vrot.slane %v983_v49, 1  ;;  %v1240_v60 = vsel %vm1211_vm1, %v1237_v14, %v1239_v51 }
  0xcb   : > { %vm1481_vm9 = vcmp.ge.f32.partialorder %v1447_v61, 0.0  ;;  %v1515_v2 = vmul.f32 0.2, %v1447_v61 }
  0xcc   : > { %v1098_v3 = vpop.f32.mrf.mxu2 }
  0xcd   : > { %v1549_v4 = vsel %vm1481_vm9, %v1447_v61, %v1515_v2  ;;  %v1174_v5 = vadd.f32 %v1098_v3, %v674_v62  ;;  %v535_v6 = vpop.f32.mrf.mxu0  ;;  %v420_v2 = vsel %vm304_vm2, %v415_v54, %v419_v56 }
  0xce   : > { %v1583_v9 = vpack.c.bf16 %v1549_v4, %v1549_v4  ;;  %v676_v22 = vadd.f32 %v675_v59, %v535_v6 }
  0xcf   : > { %v1410_v13 = vadd.f32 %v1334_v63, %v1174_v5 }
  0xd0   : > { %v678_v10 = vpop.f32.mrf.mxu1  ;;  %1618 = vst.msk [vmem:[%s2190_s14 + $0x14] sm:$0xf] %vm1612_vm4, %v1583_v9  ;;  %v2301_v9 = vld [vmem:[%s2082_s6 + $0x78] sm:$0xff] }
  0xd1   : > { %v1448_v15 = vadd.f32 %v2178_v25, %v1410_v13  ;;  %v1336_v16 = vpop.f32.mrf.mxu3  ;;  %v425_v17 = vshll.u32 %v2301_v9, 16 }
  0xd3   : > { %1826 = vmatmul.msk.bf16.gmra.mxu1 %vm457_vm0, %v2226_v28  ;;  %vm1482_vm10 = vcmp.ge.f32.partialorder %v1448_v15, 0.0  ;;  %v1516_v21 = vmul.f32 0.2, %v1448_v15  ;;  %v978_v28 = vsel %vm304_vm2, %v973_v19, %v977_v20  ;;  %v987_v20 = vshrl.u32 %v2279_v38, 16 }
  0xd4   : > { %v1100_v24 = vpop.f32.mrf.mxu2 }
  0xd5   : > { %v1550_v26 = vsel %vm1482_vm10, %v1448_v15, %v1516_v21  ;;  %v1175_v27 = vadd.f32 %v1100_v24, %v676_v22  ;;  %v538_v29 = vpop.f32.mrf.mxu0 }
  0xd6   : > { %v1584_v31 = vpack.c.bf16 %v1550_v26, %v1550_v26  ;;  %1948 = vmatmul.msk.bf16.gmra.mxu3 %vm457_vm0, %v1238_v23  ;;  %v679_v35 = vadd.f32 %v678_v10, %v538_v29  ;;  %v2304_v10 = vld [vmem:[%s2082_s6 + $0x80] sm:$0xff]  ;;  %v427_v29 = vrot.slane %v425_v17, 1 }
  0xd7   : > { %v1411_v33 = vadd.f32 %v1336_v16, %v1175_v27  ;;  %v421_v16 = vshrl.u32 %v2276_v37, 16  ;;  %v991_v21 = vshll.u32 %v2304_v10, 16  ;;  %v1241_v23 = vrot.slane %v2304_v10, 1 }
  0xd8   : > { %v680_v32 = vpop.f32.mrf.mxu1  ;;  %1619 = vst.msk [vmem:[%s2190_s14 + $0x18] sm:$0xf] %vm1612_vm4, %v1584_v31  ;;  %1801 = vmatmul.msk.bf16.gmra.mxu0 %vm457_vm0, %v412_v30  ;;  %v989_v30 = vor.u32 %v987_v20, %v985_v58 }
  0xd9   : > { %v1449_v34 = vadd.f32 %v2178_v25, %v1411_v33  ;;  %1919 = vmatmul.msk.bf16.gmra.mxu2 %vm457_vm0, %v978_v28  ;;  %v1339_v36 = vpop.f32.mrf.mxu3  ;;  %v423_v27 = vor.u32 %v421_v16, %v419_v56  ;;  %v993_v31 = vrot.slane %v991_v21, 1  ;;  %v1242_v33 = vsel %vm1211_vm1, %v1239_v51, %v1241_v23 }
  0xdb   : > { %vm1483_vm11 = vcmp.ge.f32.partialorder %v1449_v34, 0.0  ;;  %v1517_v39 = vmul.f32 0.2, %v1449_v34 }
  0xdc   : > { %v1103_v40 = vpop.f32.mrf.mxu2 }
  0xdd   : > { %v1551_v41 = vsel %vm1483_vm11, %v1449_v34, %v1517_v39  ;;  %v1176_v42 = vadd.f32 %v1103_v40, %v679_v35  ;;  %v540_v43 = vpop.f32.mrf.mxu0  ;;  %v428_v39 = vsel %vm304_vm2, %v423_v27, %v427_v29 }
  0xde   : > { %v1585_v46 = vpack.c.bf16 %v1551_v41, %v1551_v41  ;;  %v681_v59 = vadd.f32 %v680_v32, %v540_v43 }
  0xdf   : > { %v1412_v50 = vadd.f32 %v1339_v36, %v1176_v42 }
  0xe0   : > { %v683_v47 = vpop.f32.mrf.mxu1  ;;  %1620 = vst.msk [vmem:[%s2190_s14 + $0x1c] sm:$0xf] %vm1612_vm4, %v1585_v46  ;;  %v2326_v46 = vld [vmem:[%s2082_s6 + $0x80] sm:$0xff] }
  0xe1   : > { %v1450_v52 = vadd.f32 %v2178_v25, %v1412_v50  ;;  %v1341_v53 = vpop.f32.mrf.mxu3  ;;  %v433_v54 = vshll.u32 %v2326_v46, 16 }
  0xe3   : > { %1827 = vmatmul.msk.bf16.gmra.mxu1 %vm457_vm0, %v2251_v0  ;;  %vm1484_vm12 = vcmp.ge.f32.partialorder %v1450_v52, 0.0  ;;  %v1518_v55 = vmul.f32 0.2, %v1450_v52  ;;  %v986_v0 = vsel %vm304_vm2, %v981_v57, %v985_v58  ;;  %v995_v58 = vshrl.u32 %v2304_v10, 16 }
  0xe4   : > { %v1105_v61 = vpop.f32.mrf.mxu2 }
  0xe5   : > { %v1552_v62 = vsel %vm1484_vm12, %v1450_v52, %v1518_v55  ;;  %v1177_v63 = vadd.f32 %v1105_v61, %v681_v59  ;;  %v543_v1 = vpop.f32.mrf.mxu0 }
  0xe6   : > { %v1586_v3 = vpack.c.bf16 %v1552_v62, %v1552_v62  ;;  %1949 = vmatmul.msk.bf16.gmra.mxu3 %vm457_vm0, %v1240_v60  ;;  %v684_v7 = vadd.f32 %v683_v47, %v543_v1  ;;  %v2329_v47 = vld [vmem:[%s2082_s6 + $0x88] sm:$0xff]  ;;  %v435_v1 = vrot.slane %v433_v54, 1 }
  0xe7   : > { %v1413_v5 = vadd.f32 %v1341_v53, %v1177_v63  ;;  %v429_v53 = vshrl.u32 %v2301_v9, 16  ;;  %v999_v55 = vshll.u32 %v2329_v47, 16  ;;  %v1243_v60 = vrot.slane %v2329_v47, 1 }
  0xe8   : > { %v685_v4 = vpop.f32.mrf.mxu1  ;;  %1621 = vst.msk [vmem:[%s2190_s14 + $0x20] sm:$0xf] %vm1612_vm4, %v1586_v3  ;;  %1802 = vmatmul.msk.bf16.gmra.mxu0 %vm457_vm0, %v420_v2  ;;  %v997_v2 = vor.u32 %v995_v58, %v993_v31 }
  0xe9   : > { %v1451_v6 = vadd.f32 %v2178_v25, %v1413_v5  ;;  %1920 = vmatmul.msk.bf16.gmra.mxu2 %vm457_vm0, %v986_v0  ;;  %v1344_v8 = vpop.f32.mrf.mxu3  ;;  %v431_v63 = vor.u32 %v429_v53, %v427_v29  ;;  %v1001_v3 = vrot.slane %v999_v55, 1  ;;  %v210_v0 = vld [vmem:[%s2082_s6 + $0x88] sm:$0x1] }
  0xeb   : > { %vm1485_vm13 = vcmp.ge.f32.partialorder %v1451_v6, 0.0  ;;  %v1519_v11 = vmul.f32 0.2, %v1451_v6 }
  0xec   : > { %v1108_v12 = vpop.f32.mrf.mxu2 }
  0xed   : > { %v1553_v13 = vsel %vm1485_vm13, %v1451_v6, %v1519_v11  ;;  %v1178_v14 = vadd.f32 %v1108_v12, %v684_v7  ;;  %v545_v15 = vpop.f32.mrf.mxu0  ;;  %v1244_v6 = vsel %vm1211_vm1, %v1241_v23, %v1243_v60  ;;  %v777_v7 = vld [vmem:[%s2082_s6 + $0x90] sm:$0x1] }
  0xee   : > { %v1587_v18 = vpack.c.bf16 %v1553_v13, %v1553_v13  ;;  %v686_v32 = vadd.f32 %v685_v4, %v545_v15  ;;  %v436_v13 = vsel %vm304_vm2, %v431_v63, %v435_v1  ;;  %v1002_v15 = vsel %vm304_vm2, %v997_v2, %v1001_v3 }
  0xef   : > { %v1414_v22 = vadd.f32 %v1344_v8, %v1178_v14  ;;  %v285_v14 = vunpack.c.l.b16 %v210_v0  ;;  %v852_v17 = vunpack.c.l.b16 %v777_v7 }
  0xf0   : > { %v688_v19 = vpop.f32.mrf.mxu1  ;;  %1622 = vst.msk [vmem:[%s2190_s14 + $0x24] sm:$0xf] %vm1612_vm4, %v1587_v18 }
  0xf1   : > { %v1452_v24 = vadd.f32 %v2178_v25, %v1414_v22  ;;  %v1346_v26 = vpop.f32.mrf.mxu3  ;;  %v303_v22 = vpack.c.b16 %v285_v14, %v285_v14  ;;  %v870_v23 = vpack.c.b16 %v852_v17, %v852_v17 }
  0xf3   : > { %1828 = vmatmul.msk.bf16.gmra.mxu1 %vm457_vm0, %v2276_v37  ;;  %vm1486_vm14 = vcmp.ge.f32.partialorder %v1452_v24, 0.0  ;;  %v1520_v28 = vmul.f32 0.2, %v1452_v24  ;;  %v994_v37 = vsel %vm304_vm2, %v989_v30, %v993_v31  ;;  %v437_v31 = vshrl.u32 %v2326_v46, 16 }
  0xf4   : > { %v1110_v34 = vpop.f32.mrf.mxu2 }
  0xf5   : > { %v1554_v35 = vsel %vm1486_vm14, %v1452_v24, %v1520_v28  ;;  %v1179_v36 = vadd.f32 %v1110_v34, %v686_v32  ;;  %v548_v38 = vpop.f32.mrf.mxu0  ;;  %v441_v28 = vshll.u32 %v303_v22, 16  ;;  %v1003_v34 = vshrl.u32 %v2329_v47, 16 }
  0xf6   : > { %v1588_v40 = vpack.c.bf16 %v1554_v35, %v1554_v35  ;;  %1950 = vmatmul.msk.bf16.gmra.mxu3 %vm457_vm0, %v1242_v33  ;;  %v689_v44 = vadd.f32 %v688_v19, %v548_v38  ;;  %v1007_v35 = vshll.u32 %v870_v23, 16  ;;  %v1245_v38 = vrot.slane %v870_v23, 1 }
  0xf7   : > { %v1415_v42 = vadd.f32 %v1346_v26, %v1179_v36 }
  0xf8   : > { %v690_v41 = vpop.f32.mrf.mxu1  ;;  %1623 = vst.msk [vmem:[%s2190_s14 + $0x28] sm:$0xf] %vm1612_vm4, %v1588_v40  ;;  %1803 = vmatmul.msk.bf16.gmra.mxu0 %vm457_vm0, %v428_v39  ;;  %v1246_v47 = vsel %vm1211_vm1, %v1243_v60, %v1245_v38 }
  0xf9   : > { %v1453_v43 = vadd.f32 %v2178_v25, %v1415_v42  ;;  %1921 = vmatmul.msk.bf16.gmra.mxu2 %vm457_vm0, %v994_v37  ;;  %v1349_v45 = vpop.f32.mrf.mxu3  ;;  %v439_v37 = vor.u32 %v437_v31, %v435_v1  ;;  %v1005_v42 = vor.u32 %v1003_v34, %v1001_v3 }
  0xfb   : > { %vm1487_vm15 = vcmp.ge.f32.partialorder %v1453_v43, 0.0  ;;  %v1521_v48 = vmul.f32 0.2, %v1453_v43 }
  0xfc   : > { %v1113_v49 = vpop.f32.mrf.mxu2 }
  0xfd   : > { %v1555_v50 = vsel %vm1487_vm15, %v1453_v43, %v1521_v48  ;;  %v1180_v51 = vadd.f32 %v1113_v49, %v689_v44  ;;  %v550_v52 = vpop.f32.mrf.mxu0  ;;  %v1009_v43 = vrot.slane %v1007_v35, 1 }
  0xfe   : > { %v1589_v56 = vpack.c.bf16 %v1555_v50, %v1555_v50  ;;  %v691_v5 = vadd.f32 %v690_v41, %v550_v52  ;;  %v443_v41 = vrot.slane %v441_v28, 1 }
  0xff   : > { %v1416_v59 = vadd.f32 %v1349_v45, %v1180_v51 }
 0x100   : > { %v693_v57 = vpop.f32.mrf.mxu1  ;;  %1624 = vst.msk [vmem:[%s2190_s14 + $0x2c] sm:$0xf] %vm1612_vm4, %v1589_v56  ;;  %v444_v52 = vsel %vm304_vm2, %v439_v37, %v443_v41 }
 0x101   : > { %v1454_v61 = vadd.f32 %v2178_v25, %v1416_v59  ;;  %v1351_v62 = vpop.f32.mrf.mxu3 }
 0x103   : > { %1829 = vmatmul.msk.bf16.gmra.mxu1 %vm457_vm0, %v2301_v9  ;;  %vm1488_vm3 = vcmp.ge.f32.partialorder %v1454_v61, 0.0  ;;  %v1522_v4 = vmul.f32 0.2, %v1454_v61 }
 0x104   : > { %v1115_v8 = vpop.f32.mrf.mxu2 }
 0x105   : > { %v1556_v10 = vsel %vm1488_vm3, %v1454_v61, %v1522_v4  ;;  %v1181_v11 = vadd.f32 %v1115_v8, %v691_v5  ;;  %v553_v12 = vpop.f32.mrf.mxu0 }
 0x106   : > { %v1590_v9 = vpack.c.bf16 %v1556_v10, %v1556_v10  ;;  %1951 = vmatmul.msk.bf16.gmra.mxu3 %vm457_vm0, %v1244_v6  ;;  %v694_v20 = vadd.f32 %v693_v57, %v553_v12 }
 0x107   : > { %v1417_v18 = vadd.f32 %v1351_v62, %v1181_v11 }
 0x108   : > { %v695_v16 = vpop.f32.mrf.mxu1  ;;  %1625 = vst.msk [vmem:[%s2190_s14 + $0x30] sm:$0xf] %vm1612_vm4, %v1590_v9  ;;  %1804 = vmatmul.msk.bf16.gmra.mxu0 %vm457_vm0, %v436_v13 }
 0x109   : > { %v1455_v19 = vadd.f32 %v2178_v25, %v1417_v18  ;;  %1922 = vmatmul.msk.bf16.gmra.mxu2 %vm457_vm0, %v1002_v15  ;;  %v1354_v21 = vpop.f32.mrf.mxu3 }
 0x10b   : > { %vm1489_vm5 = vcmp.ge.f32.partialorder %v1455_v19, 0.0  ;;  %v1523_v24 = vmul.f32 0.2, %v1455_v19 }
 0x10c   : > { %v1118_v26 = vpop.f32.mrf.mxu2 }
 0x10d   : > { %v1557_v27 = vsel %vm1489_vm5, %v1455_v19, %v1523_v24  ;;  %v1182_v29 = vadd.f32 %v1118_v26, %v694_v20  ;;  %v555_v30 = vpop.f32.mrf.mxu0 }
 0x10e   : > { %v1591_v32 = vpack.c.bf16 %v1557_v27, %v1557_v27  ;;  %v696_v45 = vadd.f32 %v695_v16, %v555_v30 }
 0x10f   : > { %v1418_v36 = vadd.f32 %v1354_v21, %v1182_v29 }
 0x110   : > { %v698_v33 = vpop.f32.mrf.mxu1  ;;  %1626 = vst.msk [vmem:[%s2190_s14 + $0x34] sm:$0xf] %vm1612_vm4, %v1591_v32 }
 0x111   : > { %v1456_v39 = vadd.f32 %v2178_v25, %v1418_v36  ;;  %v1356_v40 = vpop.f32.mrf.mxu3 }
 0x113   : > { %1830 = vmatmul.msk.bf16.gmra.mxu1 %vm457_vm0, %v2326_v46  ;;  %vm1490_vm6 = vcmp.ge.f32.partialorder %v1456_v39, 0.0  ;;  %v1524_v44 = vmul.f32 0.2, %v1456_v39  ;;  %v1010_v46 = vsel %vm304_vm2, %v1005_v42, %v1009_v43 }
 0x114   : > { %v1120_v48 = vpop.f32.mrf.mxu2 }
 0x115   : > { %v1558_v49 = vsel %vm1490_vm6, %v1456_v39, %v1524_v44  ;;  %v1183_v50 = vadd.f32 %v1120_v48, %v696_v45  ;;  %v558_v51 = vpop.f32.mrf.mxu0 }
 0x116   : > { %v1592_v53 = vpack.c.bf16 %v1558_v49, %v1558_v49  ;;  %1952 = vmatmul.msk.bf16.gmra.mxu3 %vm457_vm0, %v1246_v47  ;;  %v699_v58 = vadd.f32 %v698_v33, %v558_v51 }
 0x117   : > { %v1419_v56 = vadd.f32 %v1356_v40, %v1183_v50 }
 0x118   : > { %v700_v54 = vpop.f32.mrf.mxu1  ;;  %1627 = vst.msk [vmem:[%s2190_s14 + $0x38] sm:$0xf] %vm1612_vm4, %v1592_v53  ;;  %1805 = vmatmul.msk.bf16.gmra.mxu0 %vm457_vm0, %v444_v52 }
 0x119   : > { %v1457_v57 = vadd.f32 %v2178_v25, %v1419_v56  ;;  %1923 = vmatmul.msk.bf16.gmra.mxu2 %vm457_vm0, %v1010_v46  ;;  %v1359_v55 = vpop.f32.mrf.mxu3 }
 0x11b   : > { %vm1491_vm1 = vcmp.ge.f32.partialorder %v1457_v57, 0.0  ;;  %v1525_v59 = vmul.f32 0.2, %v1457_v57 }
 0x11c   : > { %v1123_v60 = vpop.f32.mrf.mxu2 }
 0x11d   : > { %v1559_v61 = vsel %vm1491_vm1, %v1457_v57, %v1525_v59  ;;  %v1184_v62 = vadd.f32 %v1123_v60, %v699_v58  ;;  %v560_v63 = vpop.f32.mrf.mxu0 }
 0x11e   : > { %v1593_v1 = vpack.c.bf16 %v1559_v61, %v1559_v61  ;;  %v701_v6 = vadd.f32 %v700_v54, %v560_v63 }
 0x11f   : > { %v1420_v3 = vadd.f32 %v1359_v55, %v1184_v62 }
 0x120   : > { %v703_v2 = vpop.f32.mrf.mxu1  ;;  %1628 = vst.msk [vmem:[%s2190_s14 + $0x3c] sm:$0xf] %vm1612_vm4, %v1593_v1 }
 0x121   : > { %v1458_v0 = vadd.f32 %v2178_v25, %v1420_v3  ;;  %v1361_v4 = vpop.f32.mrf.mxu3 }
 0x123   : > { %vm1492_vm2 = vcmp.ge.f32.partialorder %v1458_v0, 0.0  ;;  %v1526_v5 = vmul.f32 0.2, %v1458_v0 }
 0x124   : > { %v1125_v7 = vpop.f32.mrf.mxu2 }
 0x125   : > { %v1560_v8 = vsel %vm1492_vm2, %v1458_v0, %v1526_v5  ;;  %v1185_v10 = vadd.f32 %v1125_v7, %v701_v6  ;;  %v563_v11 = vpop.f32.mrf.mxu0 }
 0x126   : > { %v1594_v12 = vpack.c.bf16 %v1560_v8, %v1560_v8  ;;  %v704_v15 = vadd.f32 %v703_v2, %v563_v11 }
 0x127   : > { %v1421_v14 = vadd.f32 %v1361_v4, %v1185_v10 }
 0x128   : > { %v705_v13 = vpop.f32.mrf.mxu1  ;;  %1629 = vst.msk [vmem:[%s2190_s14 + $0x40] sm:$0xf] %vm1612_vm4, %v1594_v12 }
 0x129   : > { %v1459_v9 = vadd.f32 %v2178_v25, %v1421_v14  ;;  %v1364_v16 = vpop.f32.mrf.mxu3 }
 0x12b   : > { %vm1493_vm0 = vcmp.ge.f32.partialorder %v1459_v9, 0.0  ;;  %v1527_v17 = vmul.f32 0.2, %v1459_v9 }
 0x12c   : > { %v1128_v18 = vpop.f32.mrf.mxu2 }
 0x12d   : > { %v1561_v19 = vsel %vm1493_vm0, %v1459_v9, %v1527_v17  ;;  %v1186_v20 = vadd.f32 %v1128_v18, %v704_v15  ;;  %v565_v21 = vpop.f32.mrf.mxu0 }
 0x12e   : > { %v1595_v22 = vpack.c.bf16 %v1561_v19, %v1561_v19  ;;  %v706_v30 = vadd.f32 %v705_v13, %v565_v21 }
 0x12f   : > { %v1422_v24 = vadd.f32 %v1364_v16, %v1186_v20 }
 0x130   : > { %v708_v23 = vpop.f32.mrf.mxu1  ;;  %1630 = vst.msk [vmem:[%s2190_s14 + $0x44] sm:$0xf] %vm1612_vm4, %v1595_v22 }
 0x131   : > { %v1460_v26 = vadd.f32 %v2178_v25, %v1422_v24  ;;  %v1366_v27 = vpop.f32.mrf.mxu3 }
 0x133   : > { %vm1494_vm7 = vcmp.ge.f32.partialorder %v1460_v26, 0.0  ;;  %v1528_v29 = vmul.f32 0.2, %v1460_v26 }
 0x134   : > { %v1130_v31 = vpop.f32.mrf.mxu2 }
 0x135   : > { %v1562_v28 = vsel %vm1494_vm7, %v1460_v26, %v1528_v29  ;;  %v1187_v32 = vadd.f32 %v1130_v31, %v706_v30  ;;  %v568_v33 = vpop.f32.mrf.mxu0 }
 0x136   : > { %v1596_v34 = vpack.c.bf16 %v1562_v28, %v1562_v28  ;;  %v709_v39 = vadd.f32 %v708_v23, %v568_v33 }
 0x137   : > { %v1423_v36 = vadd.f32 %v1366_v27, %v1187_v32 }
 0x138   : > { %v710_v35 = vpop.f32.mrf.mxu1  ;;  %1631 = vst.msk [vmem:[%s2190_s14 + $0x48] sm:$0xf] %vm1612_vm4, %v1596_v34 }
 0x139   : > { %v1461_v38 = vadd.f32 %v2178_v25, %v1423_v36  ;;  %v1369_v40 = vpop.f32.mrf.mxu3 }
 0x13b   : > { %vm1495_vm8 = vcmp.ge.f32.partialorder %v1461_v38, 0.0  ;;  %v1529_v37 = vmul.f32 0.2, %v1461_v38 }
 0x13c   : > { %v1133_v41 = vpop.f32.mrf.mxu2 }
 0x13d   : > { %v1563_v42 = vsel %vm1495_vm8, %v1461_v38, %v1529_v37  ;;  %v1188_v43 = vadd.f32 %v1133_v41, %v709_v39  ;;  %v570_v44 = vpop.f32.mrf.mxu0 }
 0x13e   : > { %v1597_v45 = vpack.c.bf16 %v1563_v42, %v1563_v42  ;;  %v711_v52 = vadd.f32 %v710_v35, %v570_v44 }
 0x13f   : > { %v1424_v48 = vadd.f32 %v1369_v40, %v1188_v43 }
 0x140   : > { %v713_v47 = vpop.f32.mrf.mxu1  ;;  %1632 = vst.msk [vmem:[%s2190_s14 + $0x4c] sm:$0xf] %vm1612_vm4, %v1597_v45 }
 0x141   : > { %v1462_v49 = vadd.f32 %v2178_v25, %v1424_v48  ;;  %v1371_v50 = vpop.f32.mrf.mxu3 }
 0x143   : > { %vm1496_vm9 = vcmp.ge.f32.partialorder %v1462_v49, 0.0  ;;  %v1530_v51 = vmul.f32 0.2, %v1462_v49 }
 0x144   : > { %v1135_v53 = vpop.f32.mrf.mxu2 }
 0x145   : > { %v1564_v46 = vsel %vm1496_vm9, %v1462_v49, %v1530_v51  ;;  %v1189_v54 = vadd.f32 %v1135_v53, %v711_v52  ;;  %v573_v56 = vpop.f32.mrf.mxu0 }
 0x146   : > { %v1598_v57 = vpack.c.bf16 %v1564_v46, %v1564_v46  ;;  %v714_v60 = vadd.f32 %v713_v47, %v573_v56 }
 0x147   : > { %v1425_v55 = vadd.f32 %v1371_v50, %v1189_v54 }
 0x148   : > { %v715_v58 = vpop.f32.mrf.mxu1  ;;  %1633 = vst.msk [vmem:[%s2190_s14 + $0x50] sm:$0xf] %vm1612_vm4, %v1598_v57 }
 0x149   : > { %v1463_v59 = vadd.f32 %v2178_v25, %v1425_v55  ;;  %v1374_v61 = vpop.f32.mrf.mxu3 }
 0x14b   : > { %vm1497_vm10 = vcmp.ge.f32.partialorder %v1463_v59, 0.0  ;;  %v1531_v62 = vmul.f32 0.2, %v1463_v59 }
 0x14c   : > { %v1138_v63 = vpop.f32.mrf.mxu2 }
 0x14d   : > { %v1565_v1 = vsel %vm1497_vm10, %v1463_v59, %v1531_v62  ;;  %v1190_v2 = vadd.f32 %v1138_v63, %v714_v60  ;;  %v575_v3 = vpop.f32.mrf.mxu0 }
 0x14e   : > { %v1599_v0 = vpack.c.bf16 %v1565_v1, %v1565_v1  ;;  %v716_v10 = vadd.f32 %v715_v58, %v575_v3 }
 0x14f   : > { %v1426_v5 = vadd.f32 %v1374_v61, %v1190_v2 }
 0x150   : > { %v718_v4 = vpop.f32.mrf.mxu1  ;;  %1634 = vst.msk [vmem:[%s2190_s14 + $0x54] sm:$0xf] %vm1612_vm4, %v1599_v0 }
 0x151   : > { %v1464_v6 = vadd.f32 %v2178_v25, %v1426_v5  ;;  %v1376_v7 = vpop.f32.mrf.mxu3 }
 0x153   : > { %vm1498_vm11 = vcmp.ge.f32.partialorder %v1464_v6, 0.0  ;;  %v1532_v8 = vmul.f32 0.2, %v1464_v6 }
 0x154   : > { %v1140_v11 = vpop.f32.mrf.mxu2 }
 0x155   : > { %v1566_v12 = vsel %vm1498_vm11, %v1464_v6, %v1532_v8  ;;  %v1191_v13 = vadd.f32 %v1140_v11, %v716_v10  ;;  %v578_v14 = vpop.f32.mrf.mxu0  ;;  %v2409_v8 = vld [vmem:[%s2434_s2] ss:$0 sm:$0xff] }
 0x156   : > { %v1600_v9 = vpack.c.bf16 %v1566_v12, %v1566_v12  ;;  %v719_v18 = vadd.f32 %v718_v4, %v578_v14 }
 0x157   : > { %v1427_v16 = vadd.f32 %v1376_v7, %v1191_v13 }
 0x158   : > { %v720_v15 = vpop.f32.mrf.mxu1  ;;  %1635 = vst.msk [vmem:[%s2190_s14 + $0x58] sm:$0xf] %vm1612_vm4, %v1600_v9 }
 0x159   : > { %v1465_v17 = vadd.f32 %v2178_v25, %v1427_v16  ;;  %v1379_v19 = vpop.f32.mrf.mxu3 }
 0x15b   : > { %vm1499_vm12 = vcmp.ge.f32.partialorder %v1465_v17, 0.0  ;;  %v1533_v20 = vmul.f32 0.2, %v1465_v17 }
 0x15c   : > { %v1143_v21 = vpop.f32.mrf.mxu2 }
 0x15d   : > { %v1567_v22 = vsel %vm1499_vm12, %v1465_v17, %v1533_v20  ;;  %v1192_v23 = vadd.f32 %v1143_v21, %v719_v18  ;;  %v580_v24 = vpop.f32.mrf.mxu0 }
 0x15e   : > { %v1601_v26 = vpack.c.bf16 %v1567_v22, %v1567_v22  ;;  %v721_v32 = vadd.f32 %v720_v15, %v580_v24 }
 0x15f   : > { %v1428_v29 = vadd.f32 %v1379_v19, %v1192_v23 }
 0x160   : > { %v723_v27 = vpop.f32.mrf.mxu1  ;;  %1636 = vst.msk [vmem:[%s2190_s14 + $0x5c] sm:$0xf] %vm1612_vm4, %v1601_v26 }
 0x161   : > { %v1466_v30 = vadd.f32 %v2178_v25, %v1428_v29  ;;  %v1381_v31 = vpop.f32.mrf.mxu3 }
 0x163   : > { %vm1500_vm13 = vcmp.ge.f32.partialorder %v1466_v30, 0.0  ;;  %v1534_v28 = vmul.f32 0.2, %v1466_v30 }
 0x164   : > { %v1145_v33 = vpop.f32.mrf.mxu2 }
 0x165   : > { %v1568_v34 = vsel %vm1500_vm13, %v1466_v30, %v1534_v28  ;;  %v1193_v35 = vadd.f32 %v1145_v33, %v721_v32  ;;  %v583_v36 = vpop.f32.mrf.mxu0 }
 0x166   : > { %v1602_v38 = vpack.c.bf16 %v1568_v34, %v1568_v34  ;;  %v724_v41 = vadd.f32 %v723_v27, %v583_v36 }
 0x167   : > { %v1429_v40 = vadd.f32 %v1381_v31, %v1193_v35 }
 0x168   : > { %v725_v39 = vpop.f32.mrf.mxu1  ;;  %1637 = vst.msk [vmem:[%s2190_s14 + $0x60] sm:$0xf] %vm1612_vm4, %v1602_v38 }
 0x169   : > { %v1467_v37 = vadd.f32 %v2178_v25, %v1429_v40  ;;  %v1384_v42 = vpop.f32.mrf.mxu3 }
 0x16b   : > { %vm1501_vm14 = vcmp.ge.f32.partialorder %v1467_v37, 0.0  ;;  %v1535_v43 = vmul.f32 0.2, %v1467_v37 }
 0x16c   : > { %v1148_v44 = vpop.f32.mrf.mxu2 }
 0x16d   : > { %v1569_v45 = vsel %vm1501_vm14, %v1467_v37, %v1535_v43  ;;  %v1194_v47 = vadd.f32 %v1148_v44, %v724_v41  ;;  %v585_v48 = vpop.f32.mrf.mxu0 }
 0x16e   : > { %v1603_v49 = vpack.c.bf16 %v1569_v45, %v1569_v45  ;;  %v726_v54 = vadd.f32 %v725_v39, %v585_v48 }
 0x16f   : > { %v1430_v50 = vadd.f32 %v1384_v42, %v1194_v47 }
 0x170   : > { %1638 = vst.msk [vmem:[%s2190_s14 + $0x64] sm:$0xf] %vm1612_vm4, %v1603_v49  ;;  %v728_v51 = vpop.f32.mrf.mxu1 }
 0x171   : > { %v1468_v52 = vadd.f32 %v2178_v25, %v1430_v50  ;;  %v1386_v53 = vpop.f32.mrf.mxu3 }
 0x173   : > { %vm1502_vm15 = vcmp.ge.f32.partialorder %v1468_v52, 0.0  ;;  %v1536_v46 = vmul.f32 0.2, %v1468_v52 }
 0x174   : > { %v1150_v56 = vpop.f32.mrf.mxu2 }
 0x175   : > { %v1570_v57 = vsel %vm1502_vm15, %v1468_v52, %v1536_v46  ;;  %v1195_v58 = vadd.f32 %v1150_v56, %v726_v54  ;;  %v588_v55 = vpop.f32.mrf.mxu0 }
 0x176   : > { %v1604_v59 = vpack.c.bf16 %v1570_v57, %v1570_v57  ;;  %v729_v62 = vadd.f32 %v728_v51, %v588_v55 }
 0x177   : > { %v1431_v60 = vadd.f32 %v1386_v53, %v1195_v58 }
 0x178   : > { %1639 = vst.msk [vmem:[%s2190_s14 + $0x68] sm:$0xf] %vm1612_vm4, %v1604_v59  ;;  %v730_v1 = vpop.f32.mrf.mxu1 }
 0x179   : > { %v1469_v61 = vadd.f32 %v2178_v25, %v1431_v60  ;;  %v1389_v63 = vpop.f32.mrf.mxu3 }
 0x17b   : > { %vm1503_vm3 = vcmp.ge.f32.partialorder %v1469_v61, 0.0  ;;  %v1537_v2 = vmul.f32 0.2, %v1469_v61 }
 0x17c   : > { %v1153_v3 = vpop.f32.mrf.mxu2 }
 0x17d   : > { %v1571_v0 = vsel %vm1503_vm3, %v1469_v61, %v1537_v2  ;;  %v1196_v4 = vadd.f32 %v1153_v3, %v729_v62  ;;  %v590_v5 = vpop.f32.mrf.mxu0 }
 0x17e   : > { %v1605_v6 = vpack.c.bf16 %v1571_v0, %v1571_v0  ;;  %v731_v12 = vadd.f32 %v730_v1, %v590_v5 }
 0x17f   : > { %v1432_v7 = vadd.f32 %v1389_v63, %v1196_v4 }
 0x180   : > { %1640 = vst.msk [vmem:[%s2190_s14 + $0x6c] sm:$0xf] %vm1612_vm4, %v1605_v6  ;;  %v733_v13 = vpop.f32.mrf.mxu1 }
 0x181   : > { %v1470_v25 = vadd.f32 %v2409_v8, %v1432_v7  ;;  %v1391_v10 = vpop.f32.mrf.mxu3 }
 0x183   : > { %vm1504_vm5 = vcmp.ge.f32.partialorder %v1470_v25, 0.0  ;;  %v1538_v11 = vmul.f32 0.2, %v1470_v25 }
 0x184   : > { %v1155_v14 = vpop.f32.mrf.mxu2 }
 0x185   : > { %v1572_v9 = vsel %vm1504_vm5, %v1470_v25, %v1538_v11  ;;  %v1197_v15 = vadd.f32 %v1155_v14, %v731_v12  ;;  %v593_v16 = vpop.f32.mrf.mxu0 }
 0x186   : > { %v1606_v17 = vpack.c.bf16 %v1572_v9, %v1572_v9  ;;  %v734_v20 = vadd.f32 %v733_v13, %v593_v16 }
 0x187   : > { %v1433_v18 = vadd.f32 %v1391_v10, %v1197_v15 }
 0x188   : > { %1641 = vst.msk [vmem:[%s2190_s14 + $0x70] sm:$0xf] %vm1612_vm4, %v1606_v17  ;;  %v735_v30 = vpop.f32.mrf.mxu1 }
 0x189   : > { %v1471_v19 = vadd.f32 %v2409_v8, %v1433_v18  ;;  %v1394_v21 = vpop.f32.mrf.mxu3 }
 0x18b   : > { %vm1505_vm6 = vcmp.ge.f32.partialorder %v1471_v19, 0.0  ;;  %v1539_v22 = vmul.f32 0.2, %v1471_v19 }
 0x18c   : > { %v1158_v23 = vpop.f32.mrf.mxu2 }
 0x18d   : > { %v1573_v24 = vsel %vm1505_vm6, %v1471_v19, %v1539_v22  ;;  %v1198_v26 = vadd.f32 %v1158_v23, %v734_v20  ;;  %v595_v27 = vpop.f32.mrf.mxu0 }
 0x18e   : > { %v1607_v29 = vpack.c.bf16 %v1573_v24, %v1573_v24  ;;  %v736_v34 = vadd.f32 %v735_v30, %v595_v27 }
 0x18f   : > { %v1434_v31 = vadd.f32 %v1394_v21, %v1198_v26 }
 0x190   : > { %1642 = vst.msk [vmem:[%s2190_s14 + $0x74] sm:$0xf] %vm1612_vm4, %v1607_v29  ;;  %v738_v41 = vpop.f32.mrf.mxu1 }
 0x191   : > { %v1472_v28 = vadd.f32 %v2409_v8, %v1434_v31  ;;  %v1396_v32 = vpop.f32.mrf.mxu3 }
 0x193   : > { %vm1506_vm1 = vcmp.ge.f32.partialorder %v1472_v28, 0.0  ;;  %v1540_v33 = vmul.f32 0.2, %v1472_v28 }
 0x194   : > { %v1160_v35 = vpop.f32.mrf.mxu2 }
 0x195   : > { %v1574_v36 = vsel %vm1506_vm1, %v1472_v28, %v1540_v33  ;;  %v1199_v38 = vadd.f32 %v1160_v35, %v736_v34  ;;  %v598_v40 = vpop.f32.mrf.mxu0 }
 0x196   : > { %v1608_v39 = vpack.c.bf16 %v1574_v36, %v1574_v36  ;;  %v739_v43 = vadd.f32 %v738_v41, %v598_v40 }
 0x197   : > { %v1435_v37 = vadd.f32 %v1396_v32, %v1199_v38 }
 0x198   : > { %1643 = vst.msk [vmem:[%s2190_s14 + $0x78] sm:$0xf] %vm1612_vm4, %v1608_v39  ;;  %v740_v46 = vpop.f32.mrf.mxu1 }
 0x199   : > { %v1473_v42 = vadd.f32 %v2409_v8, %v1435_v37  ;;  %v1399_v45 = vpop.f32.mrf.mxu3 }
 0x19b   : > { %vm1507_vm2 = vcmp.ge.f32.partialorder %v1473_v42, 0.0  ;;  %v1541_v44 = vmul.f32 0.2, %v1473_v42 }
 0x19c   : > { %v1163_v47 = vpop.f32.mrf.mxu2 }
 0x19d   : > { %v1575_v48 = vsel %vm1507_vm2, %v1473_v42, %v1541_v44  ;;  %v1200_v49 = vadd.f32 %v1163_v47, %v739_v43  ;;  %v600_v52 = vpop.f32.mrf.mxu0 }
 0x19e   : > { %v1609_v50 = vpack.c.bf16 %v1575_v48, %v1575_v48  ;;  %v741_v56 = vadd.f32 %v740_v46, %v600_v52 }
 0x19f   : > { %v1436_v51 = vadd.f32 %v1399_v45, %v1200_v49 }
 0x1a0   : > { %1644 = vst.msk [vmem:[%s2190_s14 + $0x7c] sm:$0xf] %vm1612_vm4, %v1609_v50 }
 0x1a1   : > { %v1474_v53 = vadd.f32 %v2409_v8, %v1436_v51  ;;  %v1401_v60 = vpop.f32.mrf.mxu3 }
 0x1a3   : > { %vm1508_vm0 = vcmp.ge.f32.partialorder %v1474_v53, 0.0  ;;  %v1542_v54 = vmul.f32 0.2, %v1474_v53 }
 0x1a4   : > { %v1165_v57 = vpop.f32.mrf.mxu2 }
 0x1a5   : > { %v1576_v58 = vsel %vm1508_vm0, %v1474_v53, %v1542_v54  ;;  %v1201_v55 = vadd.f32 %v1165_v57, %v741_v56 }
 0x1a6   : > { %v1610_v59 = vpack.c.bf16 %v1576_v58, %v1576_v58 }
 0x1a7   : > { %v1437_v61 = vadd.f32 %v1401_v60, %v1201_v55 }
 0x1a8   : > { %1645 = vst.msk [vmem:[%s2190_s14 + $0x80] sm:$0xf] %vm1612_vm4, %v1610_v59 }
 0x1a9   : > { %v1475_v62 = vadd.f32 %v2409_v8, %v1437_v61 }
 0x1ab   : > { %vm1509_vm7 = vcmp.ge.f32.partialorder %v1475_v62, 0.0  ;;  %v1543_v63 = vmul.f32 0.2, %v1475_v62 }
 0x1ad   : > { %v1577_v1 = vsel %vm1509_vm7, %v1475_v62, %v1543_v63 }
 0x1ae   : > { %v1611_v2 = vpack.c.bf16 %v1577_v1, %v1577_v1 }
 0x1b0   : > { %1646 = vst.msk [vmem:[%s2190_s14 + $0x84] sm:$0xf] %vm1612_vm4, %v1611_v2 }
 0x1b1 PF: > { %s13_s12 = sadd.s32 1, %s2022_s12  }
 0x1b2   : > { %p10_p4 = scmp.ge.s32.totalorder %s13_s12, 4  }
 0x1b4   :  { %12 = sbr.rel (!%p10_p4) target bundleno = 1 (0x1), region = 65 }

// kernel: discriminator_patch_forward.10
= control target key start
LH: loop header
LB: loop body
LE: loop exit
PB: predicated region body
PF: predicated region fallthrough
CT: control target
= control target key end

     0   :  { %s383_s12 = smov 0   ;;  %s462_s0 = inlined_call_operand.vmem [shape: bf16[2,72,16], index: 0, kind: input, shape index: {}]   ;;  %s463_s1 = inlined_call_operand.vmem [shape: f32[1,16], index: 1, kind: input, shape index: {}]   ;;  %s464_s2 = inlined_call_operand.vmem [shape: f32[1,16], index: 2, kind: input, shape index: {}]   ;;  %s465_s3 = inlined_call_operand.vmem [shape: bf16[2,72,16], index: 3, kind: output, shape index: {}]  }
   0x1 LB: > { %s316_s13 = sadd.s32 4294967295, %s361_s12   ;;  %p320_p0 = scmp.ge.s32.totalorder %s361_s12, 1  ;;  %s361_s12 = sphi %s383_s12, %s13_s12  }
   0x2   : > { %p137_p1 = scmp.lt.s32.totalorder %s361_s12, 3 }
   0x4   : > { %p138_p2 = pnand %p320_p0, %p137_p1 }
   0x5   : > { %p161_p3 = scmp.lt.s32.totalorder (!%p138_p2), %s316_s13, 1 }
   0x6   : > { %141 = sbr.rel (%p138_p2) target bundleno = 40 (0x28), region = 32 }
   0xb   : > { %s467_s13 = smov (!%p161_p3, %s316_s13), 1  ;;  %v404_v0 = vld [vmem:[%s463_s1] ss:$0 sm:$0xff]  ;;  %vm251_vm0 = vcmask 125952  }
   0xc   : > { %s344_s14 = smul.u32 36, %s467_s13  ;;  %v412_v5 = vld [vmem:[%s464_s2] ss:$0 sm:$0xff] }
   0xe   : > { %s399_s17 = scalar_lea.vmem %s462_s0, %s344_s14  ;;  %s436_s24 = scalar_lea.vmem %s465_s3, %s344_s14 }
   0xf   : > { %v326_v1 = vld [vmem:[%s399_s17] sm:$0xff]   ;;  %v341_v2 = vld [vmem:[%s399_s17 + $0x8] sm:$0xff]   ;;  %v342_v3 = vld [vmem:[%s399_s17 + $0x10] sm:$0xff]  }
  0x10   : > { %v327_v4 = vunpack.c.l.bf16 %v326_v1  ;;  %v328_v6 = vunpack.c.h.bf16 %v326_v1  ;;  %v331_v7 = vunpack.c.l.bf16 %v341_v2  ;;  %v332_v8 = vunpack.c.h.bf16 %v341_v2  ;;  %v343_v9 = vld [vmem:[%s399_s17 + $0x18] sm:$0xff]   ;;  %v179_v41 = vld [vmem:[%s399_s17 + $0x20] sm:$0xf] }
  0x11   : > { %v335_v10 = vunpack.c.l.bf16 %v342_v3  ;;  %v336_v11 = vunpack.c.h.bf16 %v342_v3  ;;  %v339_v12 = vunpack.c.l.bf16 %v343_v9  ;;  %v340_v13 = vunpack.c.h.bf16 %v343_v9 }
  0x12   : > { %v193_v14 = vmul.f32 %v404_v0, %v327_v4  ;;  %v194_v15 = vmul.f32 %v404_v0, %v328_v6  ;;  %v195_v16 = vmul.f32 %v404_v0, %v331_v7  ;;  %v196_v17 = vmul.f32 %v404_v0, %v332_v8 }
  0x13   : > { %v197_v18 = vmul.f32 %v404_v0, %v335_v10  ;;  %v198_v19 = vmul.f32 %v404_v0, %v336_v11  ;;  %v199_v20 = vmul.f32 %v404_v0, %v339_v12  ;;  %v200_v21 = vmul.f32 %v404_v0, %v340_v13 }
  0x14   : > { %v206_v22 = vadd.f32 %v412_v5, %v193_v14  ;;  %v207_v23 = vadd.f32 %v412_v5, %v194_v15  ;;  %v208_v24 = vadd.f32 %v412_v5, %v195_v16  ;;  %v209_v25 = vadd.f32 %v412_v5, %v196_v17 }
  0x15   : > { %v210_v26 = vadd.f32 %v412_v5, %v197_v18  ;;  %v211_v27 = vadd.f32 %v412_v5, %v198_v19  ;;  %v212_v28 = vadd.f32 %v412_v5, %v199_v20  ;;  %v213_v29 = vadd.f32 %v412_v5, %v200_v21 }
  0x16   : > { %vm215_vm1 = vcmp.ge.f32.partialorder %v206_v22, 0.0  ;;  %v224_v30 = vmul.f32 0.2, %v206_v22  ;;  %vm216_vm2 = vcmp.ge.f32.partialorder %v207_v23, 0.0  ;;  %v225_v31 = vmul.f32 0.2, %v207_v23 }
  0x17   : > { %vm217_vm3 = vcmp.ge.f32.partialorder %v208_v24, 0.0  ;;  %v226_v32 = vmul.f32 0.2, %v208_v24  ;;  %vm218_vm4 = vcmp.ge.f32.partialorder %v209_v25, 0.0  ;;  %v227_v33 = vmul.f32 0.2, %v209_v25 }
  0x18   : > { %v233_v34 = vsel %vm215_vm1, %v206_v22, %v224_v30  ;;  %v234_v35 = vsel %vm216_vm2, %v207_v23, %v225_v31  ;;  %vm219_vm5 = vcmp.ge.f32.partialorder %v210_v26, 0.0  ;;  %v228_v36 = vmul.f32 0.2, %v210_v26 }
  0x19   : > { %v242_v37 = vpack.c.bf16 %v233_v34, %v233_v34  ;;  %v243_v38 = vpack.c.bf16 %v234_v35, %v234_v35  ;;  %v235_v39 = vsel %vm217_vm3, %v208_v24, %v226_v32  ;;  %v236_v40 = vsel %vm218_vm4, %v209_v25, %v227_v33 }
  0x1a   : > { %v244_v42 = vpack.c.bf16 %v235_v39, %v235_v39  ;;  %v245_v43 = vpack.c.bf16 %v236_v40, %v236_v40  ;;  %v237_v44 = vsel %vm219_vm5, %v210_v26, %v228_v36  ;;  %vm220_vm6 = vcmp.ge.f32.partialorder %v211_v27, 0.0 }
  0x1b   : > { %252 = vst.msk [vmem:[%s436_s24] sm:$0xf] %vm251_vm0, %v242_v37  ;;  %v246_v45 = vpack.c.bf16 %v237_v44, %v237_v44  ;;  %v229_v46 = vmul.f32 0.2, %v211_v27  ;;  %vm221_vm7 = vcmp.ge.f32.partialorder %v212_v28, 0.0  ;;  %vm222_vm8 = vcmp.ge.f32.partialorder %v213_v29, 0.0 }
  0x1c   : > { %253 = vst.msk [vmem:[%s436_s24 + $0x4] sm:$0xf] %vm251_vm0, %v243_v38  ;;  %v230_v47 = vmul.f32 0.2, %v212_v28  ;;  %v231_v48 = vmul.f32 0.2, %v213_v29  ;;  %v188_v49 = vunpack.c.l.bf16 %v179_v41 }
  0x1d   : > { %254 = vst.msk [vmem:[%s436_s24 + $0x8] sm:$0xf] %vm251_vm0, %v244_v42  ;;  %v238_v50 = vsel %vm220_vm6, %v211_v27, %v229_v46 }
  0x1e   : > { %255 = vst.msk [vmem:[%s436_s24 + $0xc] sm:$0xf] %vm251_vm0, %v245_v43  ;;  %v247_v51 = vpack.c.bf16 %v238_v50, %v238_v50  ;;  %v239_v52 = vsel %vm221_vm7, %v212_v28, %v230_v47  ;;  %v240_v53 = vsel %vm222_vm8, %v213_v29, %v231_v48  ;;  %v201_v54 = vmul.f32 %v404_v0, %v188_v49 }
  0x1f   : > { %256 = vst.msk [vmem:[%s436_s24 + $0x10] sm:$0xf] %vm251_vm0, %v246_v45  ;;  %v248_v55 = vpack.c.bf16 %v239_v52, %v239_v52  ;;  %v249_v56 = vpack.c.bf16 %v240_v53, %v240_v53 }
  0x20   : > { %257 = vst.msk [vmem:[%s436_s24 + $0x14] sm:$0xf] %vm251_vm0, %v247_v51  ;;  %v214_v57 = vadd.f32 %v412_v5, %v201_v54 }
  0x21   : > { %258 = vst.msk [vmem:[%s436_s24 + $0x18] sm:$0xf] %vm251_vm0, %v248_v55 }
  0x22   : > { %259 = vst.msk [vmem:[%s436_s24 + $0x1c] sm:$0xf] %vm251_vm0, %v249_v56  ;;  %vm223_vm9 = vcmp.ge.f32.partialorder %v214_v57, 0.0  ;;  %v232_v58 = vmul.f32 0.2, %v214_v57 }
  0x24   : > { %v241_v59 = vsel %vm223_vm9, %v214_v57, %v232_v58 }
  0x25   : > { %v250_v60 = vpack.c.bf16 %v241_v59, %v241_v59 }
  0x27   : > { %260 = vst.msk [vmem:[%s436_s24 + $0x20] sm:$0xf] %vm251_vm0, %v250_v60 }
  0x28 PF: > { %s13_s12 = sadd.s32 1, %s361_s12  }
  0x29   : > { %p10_p4 = scmp.ge.s32.totalorder %s13_s12, 4  }
  0x2b   :  { %12 = sbr.rel (!%p10_p4) target bundleno = 1 (0x1), region = 62 }

// kernel: discriminator_patch_forward.9
= control target key start
LH: loop header
LB: loop body
LE: loop exit
PB: predicated region body
PF: predicated region fallthrough
CT: control target
= control target key end

     0   :  { %s1150_s21 = smov 0   ;;  %s1336_s0 = inlined_call_operand.vmem [shape: bf16[2,82,32], index: 0, kind: input, shape index: {}]   ;;  %s1337_s1 = inlined_call_operand.vmem [shape: bf16[4,32,16], index: 1, kind: input, shape index: {}]   ;;  %s1338_s2 = inlined_call_operand.vmem [shape: f32[1,16], index: 2, kind: input, shape index: {}]   ;;  %s1339_s3 = inlined_call_operand.vmem [shape: f32[72,1], index: 3, kind: input, shape index: {}]   ;;  %s1340_s4 = inlined_call_operand.vmem [shape: bf16[2,72,16], index: 4, kind: output, shape index: {0}]   ;;  %s1341_s5 = inlined_call_operand.vmem [shape: f32[2,1,16], index: 5, kind: output, shape index: {1}]   ;;  %s1342_s6 = inlined_call_operand.vmem [shape: f32[2,1,16], index: 6, kind: output, shape index: {2}]  }
   0x1 LB: > { %s967_s22 = sadd.s32 4294967295, %s1112_s21   ;;  %p971_p0 = scmp.ge.s32.totalorder %s1112_s21, 1  ;;  %s1112_s21 = sphi %s1150_s21, %s17_s21  }
   0x2   : > { %p217_p1 = scmp.lt.s32.totalorder %s1112_s21, 3 }
   0x4   : > { %p218_p2 = pnand %p971_p0, %p217_p1 }
   0x5   : > { %p253_p3 = scmp.lt.s32.totalorder (!%p218_p2), %s967_s22, 1 }
   0x6   : > { %221 = sbr.rel (%p218_p2) target bundleno = 246 (0xf6), region = 36 }
   0xb   : > { %v1077_v0 = vld [vmem:[%s1337_s1 + $0x8] sm:$0xff]  ;;  %v1087_v1 = vld [vmem:[%s1337_s1 + $0x38] sm:$0xff]  ;;  %v1076_v4 = vld [vmem:[%s1337_s1] sm:$0xff]  ;;  %s1344_s22 = smov (!%p253_p3, %s967_s22), 1  ;;  %v1114_v9 = vmov 0   ;;  %vm366_vm0 = vcmask 261120  }
   0xc   : > { %v1079_v2 = vld [vmem:[%s1337_s1 + $0x18] sm:$0xff]  ;;  %v1085_v3 = vld [vmem:[%s1337_s1 + $0x28] sm:$0xff]  ;;  %445 = vmatpush.bf16.msra.mxu1 %v1077_v0  ;;  %672 = vmatpush.bf16.msra.mxu3 %v1087_v1  ;;  %v1086_v5 = vld [vmem:[%s1337_s1 + $0x30] sm:$0xff]  ;;  %s1088_s17 = smul.u32 44, %s1344_s22  ;;  %vm629_vm1 = vcmask 1046528   ;;  %vm852_vm3 = vcmask 125952   ;;  %s265_s25 = scalar_lea.vmem %s1341_s5, %s1344_s22 }
   0xd   : > { %388 = vmatpush.bf16.msra.mxu0 %v1079_v2  ;;  %584 = vmatpush.bf16.msra.mxu2 %v1085_v3  ;;  %v1078_v6 = vld [vmem:[%s1337_s1 + $0x10] sm:$0xff]  ;;  %v1084_v7 = vld [vmem:[%s1337_s1 + $0x20] sm:$0xff]  ;;  %vm314_vm2 = vsmask.f32 7424  ;;  %v722_v33 = vld [vmem:[%s1339_s3 + $0x8] sm:$0xff]  ;;  %vm784_vm4 = vcmask 130048   ;;  %s268_s28 = scalar_lea.vmem %s1342_s6, %s1344_s22 }
   0xe   : > { %v721_v8 = vld [vmem:[%s1339_s3] sm:$0xff]  ;;  %1099 = vset.pattern.permute.xlu0 %v1114_v9  ;;  %1100 = vset.pattern.permute.xlu1 %v1114_v9  ;;  %s1191_s20 = scalar_lea.vmem %s1336_s0, %s1088_s17  ;;  %v723_v36 = vld [vmem:[%s1339_s3 + $0x10] sm:$0xff]  ;;  %v724_v50 = vld [vmem:[%s1339_s3 + $0x18] sm:$0xff]  ;;  %s1089_s17 = smul.u32 36, %s1344_s22  ;;  %vm808_vm5 = vcmask 122880  }
   0xf   : > { %732 = vperm.xlu0 %1099, %v721_v8   ;;  %1101 = vset.pattern.permute.xlu2 %v1114_v9  ;;  %v1072_v10 = vld [vmem:[%s1191_s20] sm:$0xff]  ;;  %v1103_v12 = vld [vmem:[%s1191_s20 + $0x4] sm:$0xf0]  ;;  %v1080_v13 = vld [vmem:[%s1191_s20 + $0xc] sm:$0xff] }
  0x10   : > { %446 = vmatpush.bf16.msra.mxu1 %v1076_v4  ;;  %673 = vmatpush.bf16.msra.mxu3 %v1086_v5  ;;  %v473_v11 = vld [vmem:[%s1191_s20 + $0x4] sm:$0xff]   ;;  %v318_v16 = vshll.u32 %v1072_v10, 16  ;;  %v316_v17 = vshrl.u32 %v1072_v10, 16  ;;  %v520_v19 = vshll.u32 %v1080_v13, 16  ;;  %v631_v21 = vrot.slane %v1080_v13, 1  ;;  %v1074_v34 = vld [vmem:[%s1191_s20 + $0x10] sm:$0xff] }
  0x11   : > { %389 = vmatpush.bf16.msra.mxu0 %v1078_v6  ;;  %585 = vmatpush.bf16.msra.mxu2 %v1084_v7  ;;  %v1104_v14 = vld [vmem:[%s1191_s20 + $0x4] sm:$0xe]  ;;  %v1073_v15 = vld [vmem:[%s1191_s20 + $0x8] sm:$0xff]  ;;  %v513_v24 = vshrl.u32 %v473_v11, 16  ;;  %v515_v25 = vshll.u32 %v473_v11, 16  ;;  %v1081_v37 = vld [vmem:[%s1191_s20 + $0x14] sm:$0xff] }
  0x12   : > { %v323_v18 = vshll.u32 %v1073_v15, 16  ;;  %v1105_v20 = vor.u32 %v1104_v14, %v1103_v12  ;;  %v320_v22 = vrot.slane %v318_v16, 1  ;;  %v522_v29 = vrot.slane %v520_v19, 1  ;;  %742 = vperm.xlu1 %1100, %v723_v36   ;;  %v1075_v51 = vld [vmem:[%s1191_s20 + $0x18] sm:$0xff]  ;;  %v278_v60 = vld [vmem:[%s1191_s20 + $0x20] sm:$0xf] }
  0x13   : > { %1015 = vmatmul.msk.bf16.vlgmr.msra.gmra.mxu1 %vm366_vm0, %v1072_v10  ;;  %v517_v28 = vrot.slane %v515_v25, 1  ;;  %v327_v38 = vshrl.u32 %v1073_v15, 16  ;;  %v331_v39 = vshll.u32 %v1074_v34, 16  ;;  %v524_v40 = vshrl.u32 %v1080_v13, 16  ;;  %v1082_v52 = vld [vmem:[%s1191_s20 + $0x1c] sm:$0xff]  ;;  %v727_v8 = vld [vmem:[%s1339_s3 + $0x30] sm:$0xff] }
  0x14   : > { %v325_v23 = vrot.slane %v323_v18, 1  ;;  %v630_v26 = vrot.slane %v1105_v20, 1  ;;  %v321_v27 = vor.u32 %v320_v22, %v316_v17  ;;  %v528_v41 = vshll.u32 %v1081_v37, 16  ;;  %v283_v61 = vld [vmem:[%s1191_s20 + $0x24] sm:$0x1]  ;;  %v728_v9 = vld [vmem:[%s1339_s3 + $0x38] sm:$0xff] }
  0x15   : > { %v518_v32 = vor.u32 %v517_v28, %v513_v24  ;;  %v633_v42 = vrot.slane %v1081_v37, 1  ;;  %v333_v44 = vrot.slane %v331_v39, 1  ;;  %v526_v45 = vor.u32 %v524_v40, %v522_v29  ;;  %v1038_v6 = vld [vmem:[%s1191_s20 + $0x24] sm:$0xf]  ;;  %v1083_v7 = vld [vmem:[%s1191_s20 + $0x24] sm:$0x10]  ;;  %s1275_s20 = scalar_lea.vmem %s1340_s4, %s1089_s17 }
  0x16   : > { %v632_v30 = vsel %vm629_vm1, %v630_v26, %v631_v21  ;;  %v326_v31 = vsel %vm314_vm2, %v321_v27, %v325_v23  ;;  %v329_v43 = vor.u32 %v327_v38, %v325_v23  ;;  %v530_v46 = vrot.slane %v528_v41, 1  ;;  %v725_v10 = vld [vmem:[%s1339_s3 + $0x20] sm:$0xff]  ;;  %v726_v19 = vld [vmem:[%s1339_s3 + $0x28] sm:$0xff] }
  0x17   : > { %1065 = vmatmul.msk.bf16.vlgmr.msra.gmra.mxu3 %vm366_vm0, %v632_v30  ;;  %1002 = vmatmul.msk.bf16.vlgmr.msra.gmra.mxu0 %vm366_vm0, %v326_v31  ;;  %v523_v35 = vsel %vm314_vm2, %v518_v32, %v522_v29  ;;  %v634_v47 = vsel %vm629_vm1, %v631_v21, %v633_v42  ;;  %v335_v53 = vshrl.u32 %v1074_v34, 16  ;;  %v339_v54 = vshll.u32 %v1075_v51, 16  ;;  %v729_v25 = vld [vmem:[%s1339_s3 + $0x40] sm:$0xff] }
  0x18   : > { %737 = vperm.xlu0 %1099, %v722_v33   ;;  %1048 = vmatmul.msk.bf16.vlgmr.msra.gmra.mxu2 %vm366_vm0, %v523_v35  ;;  %v334_v48 = vsel %vm314_vm2, %v329_v43, %v333_v44  ;;  %v531_v49 = vsel %vm314_vm2, %v526_v45, %v530_v46  ;;  %v532_v55 = vshrl.u32 %v1081_v37, 16  ;;  %v536_v56 = vshll.u32 %v1082_v52, 16  ;;  %v1266_v40 = vld [vmem:[%s1338_s2] ss:$0 sm:$0xff] }
  0x19   : > { %v635_v57 = vrot.slane %v1082_v52, 1  ;;  %v337_v58 = vor.u32 %v335_v53, %v333_v44  ;;  %v341_v59 = vrot.slane %v339_v54, 1  ;;  %v307_v2 = vunpack.c.l.b16 %v278_v60  ;;  %752 = vperm.xlu2 %1101, %v725_v10  }
  0x1a   : > { %747 = vperm.xlu1 %1100, %v724_v50   ;;  %v534_v62 = vor.u32 %v532_v55, %v530_v46  ;;  %v538_v63 = vrot.slane %v536_v56, 1  ;;  %v308_v3 = vunpack.c.l.b16 %v283_v61  ;;  %v1039_v11 = vor.u32 %v1083_v7, %v1038_v6 }
  0x1b   : > { %v636_v0 = vsel %vm629_vm1, %v633_v42, %v635_v57  ;;  %v342_v1 = vsel %vm314_vm2, %v337_v58, %v341_v59  ;;  %v343_v12 = vshrl.u32 %v1075_v51, 16  ;;  %v540_v14 = vshrl.u32 %v1082_v52, 16 }
  0x1c   : > { %v539_v4 = vsel %vm314_vm2, %v534_v62, %v538_v63  ;;  %v313_v5 = vpack.c.b16 %v308_v3, %v307_v2  ;;  %v637_v16 = vrot.slane %v1039_v11, 1  ;;  %v415_v26 = vpack.c.b16 %v307_v2, %v307_v2 }
  0x1d   : > { %v345_v17 = vor.u32 %v343_v12, %v341_v59  ;;  %v542_v20 = vor.u32 %v540_v14, %v538_v63  ;;  %v548_v28 = vshrl.u32 %v1039_v11, 16 }
  0x1e   : > { %v347_v13 = vshll.u32 %v313_v5, 16  ;;  %v638_v22 = vsel %vm629_vm1, %v635_v57, %v637_v16  ;;  %v351_v27 = vshrl.u32 %v313_v5, 16 }
  0x20   : > { %762 = vperm.xlu0 %1099, %v727_v8   ;;  %v349_v18 = vrot.slane %v347_v13, 1 }
  0x21   : > { %757 = vperm.xlu2 %1101, %v726_v19  }
  0x22   : > { %767 = vperm.xlu1 %1100, %v728_v9   ;;  %v350_v23 = vsel %vm314_vm2, %v345_v17, %v349_v18  ;;  %v353_v29 = vor.u32 %v351_v27, %v349_v18 }
  0x23   : > { %1016 = vmatmul.msk.bf16.gmra.mxu1 %vm366_vm0, %v1073_v15  ;;  %v544_v15 = vshll.u32 %v1039_v11, 16 }
  0x25   : > { %v546_v21 = vrot.slane %v544_v15, 1 }
  0x27   : > { %1066 = vmatmul.msk.bf16.gmra.mxu3 %vm366_vm0, %v634_v47  ;;  %1003 = vmatmul.msk.bf16.gmra.mxu0 %vm366_vm0, %v334_v48  ;;  %v547_v24 = vsel %vm314_vm2, %v542_v20, %v546_v21  ;;  %v550_v30 = vor.u32 %v548_v28, %v546_v21 }
  0x28   : > { %1049 = vmatmul.msk.bf16.gmra.mxu2 %vm366_vm0, %v531_v49 }
  0x29   : > { %772 = vperm.xlu2 %1101, %v729_v25  }
  0x33   : > { %1017 = vmatmul.msk.bf16.gmra.mxu1 %vm366_vm0, %v1074_v34 }
  0x37   : > { %1067 = vmatmul.msk.bf16.gmra.mxu3 %vm366_vm0, %v636_v0  ;;  %1004 = vmatmul.msk.bf16.gmra.mxu0 %vm366_vm0, %v342_v1 }
  0x38   : > { %1050 = vmatmul.msk.bf16.gmra.mxu2 %vm366_vm0, %v539_v4 }
  0x43   : > { %1018 = vmatmul.msk.bf16.gmra.mxu1 %vm366_vm0, %v1075_v51 }
  0x47   : > { %1068 = vmatmul.msk.bf16.gmra.mxu3 %vm366_vm0, %v638_v22  ;;  %1005 = vmatmul.msk.bf16.gmra.mxu0 %vm366_vm0, %v350_v23 }
  0x48   : > { %1051 = vmatmul.msk.bf16.gmra.mxu2 %vm366_vm0, %v547_v24 }
  0x53   : > { %1019 = vmatmul.msk.bf16.gmra.mxu1 %vm366_vm0, %v415_v26 }
  0x57   : > { %1069 = vmatmul.msk.bf16.gmra.mxu3 %vm366_vm0, %v637_v16  ;;  %1006 = vmatmul.msk.bf16.gmra.mxu0 %vm366_vm0, %v353_v29 }
  0x58   : > { %1052 = vmatmul.msk.bf16.gmra.mxu2 %vm366_vm0, %v550_v30 }
  0x73   : > { %v753_v25 = vpop.permute.xlu2 %752 }
  0x81   : > { %v733_v14 = vpop.permute.xlu0 %732 }
  0x84   : > { %v743_v22 = vpop.permute.xlu1 %742 }
  0x8a   : > { %v738_v29 = vpop.permute.xlu0 %737 }
  0x90   : > { %v448_v31 = vpop.f32.mrf.mxu1 }
  0x94   : > { %v391_v32 = vpop.f32.mrf.mxu0 }
  0x95   : > { %v449_v34 = vadd.f32 %v448_v31, %v391_v32 }
  0x98   : > { %v450_v33 = vpop.f32.mrf.mxu1 }
  0x9a   : > { %v675_v35 = vpop.f32.mrf.mxu3 }
  0x9b   : > { %v587_v37 = vpop.f32.mrf.mxu2 }
  0x9c   : > { %v393_v36 = vpop.f32.mrf.mxu0  ;;  %v611_v39 = vadd.f32 %v587_v37, %v449_v34 }
  0x9d   : > { %v451_v44 = vadd.f32 %v450_v33, %v393_v36  ;;  %v748_v36 = vpop.permute.xlu1 %747 }
  0x9e   : > { %v699_v41 = vadd.f32 %v675_v35, %v611_v39 }
  0xa0   : > { %v453_v38 = vpop.f32.mrf.mxu1  ;;  %v1270_v42 = vadd.f32 %v1266_v40, %v699_v41 }
  0xa2   : > { %v677_v43 = vpop.f32.mrf.mxu3  ;;  %v843_v45 = vpack.c.bf16 %v1270_v42, %v1270_v42 }
  0xa3   : > { %v589_v47 = vpop.f32.mrf.mxu2 }
  0xa4   : > { %v396_v46 = vpop.f32.mrf.mxu0  ;;  %853 = vst.msk [vmem:[%s1275_s20] sm:$0xf] %vm852_vm3, %v843_v45  ;;  %v612_v49 = vadd.f32 %v589_v47, %v451_v44 }
  0xa5   : > { %v454_v51 = vadd.f32 %v453_v38, %v396_v46  ;;  %v775_v38 = vmul.f32 %v733_v14, %v1270_v42  ;;  %v758_v46 = vpop.permute.xlu2 %757 }
  0xa6   : > { %v700_v50 = vadd.f32 %v677_v43, %v612_v49 }
  0xa8   : > { %v455_v48 = vpop.f32.mrf.mxu1  ;;  %v713_v52 = vadd.f32 %v1266_v40, %v700_v50  ;;  %v810_v50 = vmul.f32 %v775_v38, %v1270_v42 }
  0xaa   : > { %v680_v53 = vpop.f32.mrf.mxu3  ;;  %v844_v54 = vpack.c.bf16 %v713_v52, %v713_v52  ;;  %v776_v35 = vmul.f32 %v738_v29, %v713_v52  ;;  %v819_v42 = vsel %vm784_vm4, %v810_v50, 0.0 }
  0xab   : > { %v592_v56 = vpop.f32.mrf.mxu2 }
  0xac   : > { %v398_v55 = vpop.f32.mrf.mxu0  ;;  %854 = vst.msk [vmem:[%s1275_s20 + $0x4] sm:$0xf] %vm852_vm3, %v844_v54  ;;  %v613_v58 = vadd.f32 %v592_v56, %v454_v51  ;;  %v811_v45 = vmul.f32 %v776_v35, %v713_v52 }
  0xad   : > { %v456_v62 = vadd.f32 %v455_v48, %v398_v55  ;;  %v786_v55 = vsel %vm784_vm4, %v776_v35, 0.0 }
  0xae   : > { %v701_v59 = vadd.f32 %v680_v53, %v613_v58  ;;  %v785_v58 = vsel %vm784_vm4, %v775_v38, 0.0  ;;  %v820_v52 = vsel %vm784_vm4, %v811_v45, 0.0  ;;  %v773_v38 = vpop.permute.xlu2 %772 }
  0xb0   : > { %v458_v57 = vpop.f32.mrf.mxu1  ;;  %v714_v60 = vadd.f32 %v1266_v40, %v701_v59 }
  0xb2   : > { %v682_v61 = vpop.f32.mrf.mxu3  ;;  %v845_v63 = vpack.c.bf16 %v714_v60, %v714_v60  ;;  %v777_v39 = vmul.f32 %v743_v22, %v714_v60 }
  0xb3   : > { %v594_v1 = vpop.f32.mrf.mxu2 }
  0xb4   : > { %v401_v0 = vpop.f32.mrf.mxu0  ;;  %855 = vst.msk [vmem:[%s1275_s20 + $0x8] sm:$0xf] %vm852_vm3, %v845_v63  ;;  %v614_v3 = vadd.f32 %v594_v1, %v456_v62  ;;  %v812_v51 = vmul.f32 %v777_v39, %v714_v60  ;;  %v787_v60 = vadd.f32 %v786_v55, %v785_v58 }
  0xb5   : > { %v459_v5 = vadd.f32 %v458_v57, %v401_v0 }
  0xb6   : > { %v702_v4 = vadd.f32 %v682_v61, %v614_v3  ;;  %v788_v61 = vsel %vm784_vm4, %v777_v39, 0.0  ;;  %v822_v0 = vsel %vm784_vm4, %v812_v51, 0.0 }
  0xb8   : > { %v460_v2 = vpop.f32.mrf.mxu1  ;;  %v715_v6 = vadd.f32 %v1266_v40, %v702_v4 }
  0xba   : > { %v685_v7 = vpop.f32.mrf.mxu3  ;;  %v846_v8 = vpack.c.bf16 %v715_v6, %v715_v6  ;;  %v778_v44 = vmul.f32 %v748_v36, %v715_v6 }
  0xbb   : > { %v597_v10 = vpop.f32.mrf.mxu2 }
  0xbc   : > { %v403_v9 = vpop.f32.mrf.mxu0  ;;  %856 = vst.msk [vmem:[%s1275_s20 + $0xc] sm:$0xf] %vm852_vm3, %v846_v8  ;;  %v615_v12 = vadd.f32 %v597_v10, %v459_v5  ;;  %v813_v59 = vmul.f32 %v778_v44, %v715_v6  ;;  %v790_v1 = vsel %vm784_vm4, %v778_v44, 0.0  ;;  %v821_v8 = vadd.f32 %v820_v52, %v819_v42 }
  0xbd   : > { %v461_v17 = vadd.f32 %v460_v2, %v403_v9  ;;  %v763_v2 = vpop.permute.xlu0 %762  ;;  %v789_v9 = vadd.f32 %v788_v61, %v787_v60 }
  0xbe   : > { %v703_v13 = vadd.f32 %v685_v7, %v615_v12  ;;  %v824_v10 = vsel %vm784_vm4, %v813_v59, 0.0 }
  0xc0   : > { %v463_v11 = vpop.f32.mrf.mxu1  ;;  %v716_v15 = vadd.f32 %v1266_v40, %v703_v13 }
  0xc2   : > { %v687_v16 = vpop.f32.mrf.mxu3  ;;  %v847_v18 = vpack.c.bf16 %v716_v15, %v716_v15  ;;  %v779_v56 = vmul.f32 %v753_v25, %v716_v15 }
  0xc3   : > { %v599_v20 = vpop.f32.mrf.mxu2 }
  0xc4   : > { %v406_v19 = vpop.f32.mrf.mxu0  ;;  %857 = vst.msk [vmem:[%s1275_s20 + $0x10] sm:$0xf] %vm852_vm3, %v847_v18  ;;  %v616_v23 = vadd.f32 %v599_v20, %v461_v17  ;;  %v814_v3 = vmul.f32 %v779_v56, %v716_v15  ;;  %v792_v12 = vsel %vm784_vm4, %v779_v56, 0.0  ;;  %v823_v18 = vadd.f32 %v822_v0, %v821_v8 }
  0xc5   : > { %v464_v26 = vadd.f32 %v463_v11, %v406_v19  ;;  %v768_v11 = vpop.permute.xlu1 %767  ;;  %v791_v19 = vadd.f32 %v790_v1, %v789_v9 }
  0xc6   : > { %v704_v24 = vadd.f32 %v687_v16, %v616_v23  ;;  %v826_v20 = vsel %vm784_vm4, %v814_v3, 0.0 }
  0xc7   : > { %v793_v25 = vadd.f32 %v792_v12, %v791_v19 }
  0xc8   : > { %v465_v21 = vpop.f32.mrf.mxu1  ;;  %v717_v27 = vadd.f32 %v1266_v40, %v704_v24  ;;  %v825_v24 = vadd.f32 %v824_v10, %v823_v18 }
  0xca   : > { %v690_v28 = vpop.f32.mrf.mxu3  ;;  %v848_v30 = vpack.c.bf16 %v717_v27, %v717_v27  ;;  %v780_v62 = vmul.f32 %v758_v46, %v717_v27 }
  0xcb   : > { %v602_v32 = vpop.f32.mrf.mxu2 }
  0xcc   : > { %v408_v31 = vpop.f32.mrf.mxu0  ;;  %858 = vst.msk [vmem:[%s1275_s20 + $0x14] sm:$0xf] %vm852_vm3, %v848_v30  ;;  %v617_v34 = vadd.f32 %v602_v32, %v464_v26  ;;  %v815_v13 = vmul.f32 %v780_v62, %v717_v27  ;;  %v827_v30 = vadd.f32 %v826_v20, %v825_v24 }
  0xcd   : > { %v466_v47 = vadd.f32 %v465_v21, %v408_v31  ;;  %v794_v21 = vsel %vm784_vm4, %v780_v62, 0.0 }
  0xce   : > { %v705_v37 = vadd.f32 %v690_v28, %v617_v34  ;;  %v828_v26 = vsel %vm784_vm4, %v815_v13, 0.0  ;;  %v795_v31 = vadd.f32 %v794_v21, %v793_v25 }
  0xcf   : > { %v829_v36 = vadd.f32 %v828_v26, %v827_v30 }
  0xd0   : > { %v468_v33 = vpop.f32.mrf.mxu1  ;;  %v718_v41 = vadd.f32 %v1266_v40, %v705_v37 }
  0xd2   : > { %v692_v43 = vpop.f32.mrf.mxu3  ;;  %v849_v48 = vpack.c.bf16 %v718_v41, %v718_v41  ;;  %v781_v4 = vmul.f32 %v763_v2, %v718_v41 }
  0xd3   : > { %v604_v53 = vpop.f32.mrf.mxu2 }
  0xd4   : > { %v411_v49 = vpop.f32.mrf.mxu0  ;;  %859 = vst.msk [vmem:[%s1275_s20 + $0x18] sm:$0xf] %vm852_vm3, %v849_v48  ;;  %v618_v57 = vadd.f32 %v604_v53, %v466_v47  ;;  %v816_v22 = vmul.f32 %v781_v4, %v718_v41  ;;  %v796_v27 = vsel %vm784_vm4, %v781_v4, 0.0 }
  0xd5   : > { %v469_v5 = vadd.f32 %v468_v33, %v411_v49  ;;  %v797_v37 = vadd.f32 %v796_v27, %v795_v31 }
  0xd6   : > { %v706_v63 = vadd.f32 %v692_v43, %v618_v57  ;;  %v830_v32 = vsel %vm784_vm4, %v816_v22, 0.0 }
  0xd7   : > { %v831_v44 = vadd.f32 %v830_v32, %v829_v36 }
  0xd8   : > { %v470_v54 = vpop.f32.mrf.mxu1  ;;  %v719_v7 = vadd.f32 %v1266_v40, %v706_v63 }
  0xda   : > { %v695_v6 = vpop.f32.mrf.mxu3  ;;  %v782_v14 = vmul.f32 %v768_v11, %v719_v7  ;;  %v850_v16 = vpack.c.bf16 %v719_v7, %v719_v7 }
  0xdb   : > { %v607_v15 = vpop.f32.mrf.mxu2 }
  0xdc   : > { %v413_v17 = vpop.f32.mrf.mxu0  ;;  %860 = vst.msk [vmem:[%s1275_s20 + $0x1c] sm:$0xf] %vm852_vm3, %v850_v16  ;;  %v619_v23 = vadd.f32 %v607_v15, %v469_v5  ;;  %v817_v28 = vmul.f32 %v782_v14, %v719_v7  ;;  %v798_v33 = vsel %vm784_vm4, %v782_v14, 0.0 }
  0xdd   : > { %v799_v45 = vadd.f32 %v798_v33, %v797_v37 }
  0xde   : > { %v707_v29 = vadd.f32 %v695_v6, %v619_v23  ;;  %v832_v39 = vsel %vm784_vm4, %v817_v28, 0.0 }
  0xdf   : > { %v833_v49 = vadd.f32 %v832_v39, %v831_v44 }
  0xe0   : > { %v720_v34 = vadd.f32 %v1266_v40, %v707_v29 }
  0xe2   : > { %v697_v35 = vpop.f32.mrf.mxu3  ;;  %v783_v41 = vmul.f32 %v773_v38, %v720_v34  ;;  %v851_v43 = vpack.c.bf16 %v720_v34, %v720_v34 }
  0xe3   : > { %v609_v46 = vpop.f32.mrf.mxu2 }
  0xe4   : > { %v800_v47 = vsel %vm784_vm4, %v783_v41, 0.0  ;;  %v818_v48 = vmul.f32 %v783_v41, %v720_v34  ;;  %861 = vst.msk [vmem:[%s1275_s20 + $0x20] sm:$0xf] %vm852_vm3, %v851_v43 }
  0xe5   : > { %v801_v50 = vadd.f32 %v800_v47, %v799_v45 }
  0xe6   : > { %v834_v40 = vsel %vm784_vm4, %v818_v48, 0.0 }
  0xe7   : > { %v802_v51 = vrot.slane %v801_v50, 4  ;;  %v835_v53 = vadd.f32 %v834_v40, %v833_v49 }
  0xe9   : > { %v803_v54 = vadd.f32 %v802_v51, %v801_v50  ;;  %v836_v55 = vrot.slane %v835_v53, 4 }
  0xeb   : > { %v804_v56 = vrot.slane %v803_v54, 2  ;;  %v837_v57 = vadd.f32 %v836_v55, %v835_v53 }
  0xed   : > { %v805_v58 = vadd.f32 %v804_v56, %v803_v54  ;;  %v838_v59 = vrot.slane %v837_v57, 2 }
  0xef   : > { %v806_v52 = vrot.slane %v805_v58, 1  ;;  %v839_v61 = vadd.f32 %v838_v59, %v837_v57 }
  0xf1   : > { %v807_v62 = vadd.f32 %v806_v52, %v805_v58  ;;  %v840_v63 = vrot.slane %v839_v61, 1 }
  0xf3   : > { %809 = vst.msk [vmem:[%s265_s25] sm:$0x1] %vm808_vm5, %v807_v62  ;;  %v841_v42 = vadd.f32 %v840_v63, %v839_v61 }
  0xf5   : > { %842 = vst.msk [vmem:[%s268_s28] sm:$0x1] %vm808_vm5, %v841_v42 }
  0xf6 PF: > { %s17_s21 = sadd.s32 1, %s1112_s21  }
  0xf7   : > { %p14_p4 = scmp.ge.s32.totalorder %s17_s21, 4  }
  0xf9   :  { %16 = sbr.rel (!%p14_p4) target bundleno = 1 (0x1), region = 93 }

// kernel: discriminator_patch_forward.11
= control target key start
LH: loop header
LB: loop body
LE: loop exit
PB: predicated region body
PF: predicated region fallthrough
CT: control target
= control target key end

     0   :  { %s934_s21 = smov 0   ;;  %s1052_s0 = inlined_call_operand.vmem [shape: bf16[2,26,64], index: 0, kind: input, shape index: {}]   ;;  %s1053_s1 = inlined_call_operand.vmem [shape: bf16[4,64,32], index: 1, kind: input, shape index: {}]   ;;  %s1054_s2 = inlined_call_operand.vmem [shape: f32[1,32], index: 2, kind: input, shape index: {}]   ;;  %s1055_s3 = inlined_call_operand.vmem [shape: f32[20,1], index: 3, kind: input, shape index: {}]   ;;  %s1056_s4 = inlined_call_operand.vmem [shape: bf16[2,20,32], index: 4, kind: output, shape index: {0}]   ;;  %s1057_s5 = inlined_call_operand.vmem [shape: f32[2,1,32], index: 5, kind: output, shape index: {1}]   ;;  %s1058_s6 = inlined_call_operand.vmem [shape: f32[2,1,32], index: 6, kind: output, shape index: {2}]  }
   0x1 LB: > { %s744_s22 = sadd.s32 4294967295, %s896_s21   ;;  %p748_p0 = scmp.ge.s32.totalorder %s896_s21, 1  ;;  %s896_s21 = sphi %s934_s21, %s17_s21  }
   0x2   : > { %p217_p1 = scmp.lt.s32.totalorder %s896_s21, 3 }
   0x4   : > { %p218_p2 = pnand %p748_p0, %p217_p1 }
   0x5   : > { %p253_p3 = scmp.lt.s32.totalorder (!%p218_p2), %s744_s22, 1 }
   0x6   : > { %221 = sbr.rel (%p218_p2) target bundleno = 203 (0xcb), region = 36 }
   0xb   : > { %v867_v0 = vld [vmem:[%s1053_s1 + $0x38] sm:$0xff]  ;;  %v866_v4 = vld [vmem:[%s1053_s1 + $0x30] sm:$0xff]  ;;  %s1060_s22 = smov (!%p253_p3, %s744_s22), 1  ;;  %v865_v8 = vld [vmem:[%s1053_s1 + $0x28] sm:$0xff]  ;;  %v898_v10 = vmov 0   ;;  %vm519_vm1 = vcmask 1044480  }
   0xc   : > { %v863_v1 = vld [vmem:[%s1053_s1 + $0x18] sm:$0xff]  ;;  %350 = vmatpush.bf16.msra.mxu0 %v867_v0  ;;  %v862_v5 = vld [vmem:[%s1053_s1 + $0x10] sm:$0xff]  ;;  %v861_v9 = vld [vmem:[%s1053_s1 + $0x8] sm:$0xff]  ;;  %s858_s19 = sshll.u32 %s1060_s22, 4  ;;  %887 = vset.pattern.permute.xlu0 %v898_v10  ;;  %vm299_vm0 = vsmask.f32 7424  ;;  %s265_s29 = scalar_lea.vmem %s1057_s5, %s1060_s22 }
   0xd   : > { %v872_v2 = vld [vmem:[%s1053_s1 + $0x58] sm:$0xff]  ;;  %400 = vmatpush.bf16.msra.mxu1 %v863_v1  ;;  %v871_v6 = vld [vmem:[%s1053_s1 + $0x50] sm:$0xff]  ;;  %888 = vset.pattern.permute.xlu1 %v898_v10  ;;  %v870_v11 = vld [vmem:[%s1053_s1 + $0x48] sm:$0xff]  ;;  %s984_s28 = scalar_lea.vmem %s1052_s0, %s858_s19  ;;  %vm339_vm2 = vcmask 523264   ;;  %vm437_vm3 = vsmask.f32 5376  ;;  %s268_s8 = scalar_lea.vmem %s1058_s6, %s1060_s22 }
   0xe   : > { %v876_v3 = vld [vmem:[%s1053_s1 + $0x78] sm:$0xff]  ;;  %489 = vmatpush.bf16.msra.mxu2 %v872_v2  ;;  %v875_v7 = vld [vmem:[%s1053_s1 + $0x70] sm:$0xff]  ;;  %v874_v12 = vld [vmem:[%s1053_s1 + $0x68] sm:$0xff]  ;;  %s877_s23 = smul.u32 12, %s1060_s22  ;;  %vm606_vm4 = vcmask 257024   ;;  %vm602_vm5 = vcmask 261120  }
   0xf   : > { %557 = vmatpush.bf16.msra.mxu3 %v876_v3  ;;  %v581_v13 = vld [vmem:[%s1055_s3] sm:$0xff]  ;;  %v281_v15 = vld [vmem:[%s984_s28 + $0x8] sm:$0x7]  ;;  %v868_v20 = vld [vmem:[%s984_s28 + $0x8] sm:$0x10]  ;;  %vm637_vm6 = vcmask 254976  }
  0x10   : > { %351 = vmatpush.bf16.msra.mxu0 %v866_v4  ;;  %v859_v14 = vld [vmem:[%s984_s28] sm:$0xff]  ;;  %v296_v17 = vunpack.c.l.b16 %v281_v15  ;;  %v810_v19 = vld [vmem:[%s984_s28 + $0x8] sm:$0xf]  ;;  %586 = vperm.xlu0 %887, %v581_v13   ;;  %v583_v29 = vld [vmem:[%s1055_s3 + $0x10] sm:$0xf]  ;;  %s1032_s26 = scalar_lea.vmem %s1056_s4, %s877_s23  ;;  %vm615_vm7 = vcmask 253952  }
  0x11   : > { %401 = vmatpush.bf16.msra.mxu1 %v862_v5  ;;  %v414_v16 = vld [vmem:[%s984_s28] sm:$0xc]  ;;  %v415_v18 = vld [vmem:[%s984_s28 + $0x4] sm:$0xf]  ;;  %v301_v22 = vshrl.u32 %v859_v14, 16  ;;  %v303_v23 = vshll.u32 %v859_v14, 16  ;;  %v811_v25 = vor.u32 %v868_v20, %v810_v19  ;;  %596 = vperm.xlu1 %888, %v583_v29  }
  0x12   : > { %490 = vmatpush.bf16.msra.mxu2 %v871_v6  ;;  %v431_v21 = vunpack.c.l.b16 %v414_v16  ;;  %v432_v24 = vunpack.c.l.b16 %v415_v18  ;;  %v506_v26 = vld [vmem:[%s984_s28] sm:$0x8]  ;;  %v298_v27 = vpack.c.b16 %v296_v17, %v296_v17  ;;  %v582_v48 = vld [vmem:[%s1055_s3 + $0x8] sm:$0xff]  ;;  %v889_v4 = vld [vmem:[%s1054_s2] ss:$0 sm:$0xff] }
  0x13   : > { %558 = vmatpush.bf16.msra.mxu3 %v875_v7  ;;  %v517_v28 = vunpack.c.l.b16 %v506_v26  ;;  %v864_v30 = vld [vmem:[%s1053_s1 + $0x20] sm:$0xff]  ;;  %v305_v32 = vrot.slane %v303_v23, 1  ;;  %v447_v34 = vshrl.u32 %v811_v25, 16  ;;  %v450_v35 = vshll.u32 %v811_v25, 16  ;;  %v272_v56 = vld [vmem:[%s984_s28 + $0x8] sm:$0x3] }
  0x14   : > { %352 = vmatpush.bf16.msra.mxu0 %v865_v8  ;;  %v860_v31 = vld [vmem:[%s1053_s1] sm:$0xff]  ;;  %v435_v33 = vpack.c.b16 %v432_v24, %v431_v21  ;;  %v308_v38 = vshll.u32 %v298_v27, 16  ;;  %v521_v40 = vrot.slane %v811_v25, 3  ;;  %v312_v57 = vshrl.u32 %v298_v27, 16 }
  0x15   : > { %402 = vmatpush.bf16.msra.mxu1 %v861_v9  ;;  %v869_v36 = vld [vmem:[%s1053_s1 + $0x40] sm:$0xff]  ;;  %v518_v39 = vpack.c.b16 %v432_v24, %v517_v28  ;;  %v306_v41 = vor.u32 %v305_v32, %v301_v22  ;;  %v449_v44 = vrot.slane %v447_v34, 2  ;;  %v452_v46 = vrot.slane %v450_v35, 3 }
  0x16   : > { %491 = vmatpush.bf16.msra.mxu2 %v870_v11  ;;  %v873_v37 = vld [vmem:[%s1053_s1 + $0x60] sm:$0xff]  ;;  %v439_v42 = vshrl.u32 %v435_v33, 16  ;;  %v442_v43 = vshll.u32 %v435_v33, 16  ;;  %v310_v45 = vrot.slane %v308_v38, 1  ;;  %v365_v58 = vunpack.c.l.b16 %v272_v56 }
  0x17   : > { %559 = vmatpush.bf16.msra.mxu3 %v874_v12  ;;  %v520_v47 = vrot.slane %v518_v39, 3  ;;  %v453_v52 = vor.u32 %v452_v46, %v449_v44 }
  0x18   : > { %353 = vmatpush.bf16.msra.mxu0 %v864_v30  ;;  %v441_v49 = vrot.slane %v439_v42, 2  ;;  %v444_v50 = vrot.slane %v442_v43, 3  ;;  %v311_v51 = vsel %vm299_vm0, %v306_v41, %v310_v45  ;;  %591 = vperm.xlu0 %887, %v582_v48   ;;  %v314_v59 = vor.u32 %v312_v57, %v310_v45 }
  0x19   : > { %403 = vmatpush.bf16.msra.mxu1 %v860_v31  ;;  %v522_v53 = vsel %vm519_vm1, %v520_v47, %v521_v40  ;;  %v366_v60 = vpack.c.b16 %v365_v58, %v365_v58 }
  0x1a   : > { %492 = vmatpush.bf16.msra.mxu2 %v869_v36  ;;  %v445_v54 = vor.u32 %v444_v50, %v441_v49 }
  0x1b   : > { %560 = vmatpush.bf16.msra.mxu3 %v873_v37  ;;  %780 = vmatmul.msk.bf16.vlgmr.msra.gmra.mxu0 %vm339_vm2, %v311_v51 }
  0x1c   : > { %798 = vmatmul.msk.bf16.vlgmr.msra.gmra.mxu1 %vm339_vm2, %v859_v14  ;;  %v454_v55 = vsel %vm437_vm3, %v445_v54, %v453_v52 }
  0x1d   : > { %828 = vmatmul.msk.bf16.vlgmr.msra.gmra.mxu2 %vm339_vm2, %v454_v55 }
  0x1e   : > { %854 = vmatmul.msk.bf16.vlgmr.msra.gmra.mxu3 %vm339_vm2, %v522_v53 }
  0x2b   : > { %781 = vmatmul.msk.bf16.gmra.mxu0 %vm339_vm2, %v314_v59 }
  0x2c   : > { %799 = vmatmul.msk.bf16.gmra.mxu1 %vm339_vm2, %v366_v60 }
  0x2d   : > { %829 = vmatmul.msk.bf16.gmra.mxu2 %vm339_vm2, %v453_v52 }
  0x2e   : > { %855 = vmatmul.msk.bf16.gmra.mxu3 %vm339_vm2, %v521_v40 }
  0x82   : > { %v587_v7 = vpop.permute.xlu0 %586 }
  0x83   : > { %v597_v30 = vpop.permute.xlu1 %596 }
  0x8a   : > { %v592_v19 = vpop.permute.xlu0 %591 }
  0x98   : > { %v355_v61 = vpop.f32.mrf.mxu0 }
  0x99   : > { %v405_v62 = vpop.f32.mrf.mxu1 }
  0x9a   : > { %v406_v63 = vadd.f32 %v405_v62, %v355_v61 }
  0xa0   : > { %v494_v1 = vpop.f32.mrf.mxu2  ;;  %v357_v2 = vpop.f32.mrf.mxu0 }
  0xa1   : > { %v562_v0 = vpop.f32.mrf.mxu3  ;;  %v503_v3 = vadd.f32 %v494_v1, %v406_v63  ;;  %v407_v5 = vpop.f32.mrf.mxu1 }
  0xa2   : > { %v408_v10 = vadd.f32 %v407_v5, %v357_v2 }
  0xa3   : > { %v571_v6 = vadd.f32 %v562_v0, %v503_v3 }
  0xa5   : > { %v578_v8 = vadd.f32 %v889_v4, %v571_v6 }
  0xa7   : > { %v632_v9 = vpack.c.bf16 %v578_v8, %v578_v8  ;;  %v599_v25 = vmul.f32 %v587_v7, %v578_v8 }
  0xa8   : > { %v496_v12 = vpop.f32.mrf.mxu2  ;;  %v360_v13 = vpop.f32.mrf.mxu0 }
  0xa9   : > { %v564_v11 = vpop.f32.mrf.mxu3  ;;  %v504_v14 = vadd.f32 %v496_v12, %v408_v10  ;;  %v410_v15 = vpop.f32.mrf.mxu1  ;;  %635 = vst.msk [vmem:[%s1032_s26] sm:$0xf] %vm606_vm4, %v632_v9  ;;  %v617_v31 = vmul.f32 %v599_v25, %v578_v8  ;;  %v603_v34 = vsel %vm602_vm5, %v599_v25, 0.0 }
  0xaa   : > { %v411_v18 = vadd.f32 %v410_v15, %v360_v13 }
  0xab   : > { %v572_v16 = vadd.f32 %v564_v11, %v504_v14  ;;  %v620_v41 = vsel %vm602_vm5, %v617_v31, 0.0 }
  0xad   : > { %v579_v17 = vadd.f32 %v889_v4, %v572_v16 }
  0xaf   : > { %v633_v20 = vpack.c.bf16 %v579_v17, %v579_v17  ;;  %v600_v21 = vmul.f32 %v592_v19, %v579_v17 }
  0xb0   : > { %v499_v23 = vpop.f32.mrf.mxu2  ;;  %v362_v24 = vpop.f32.mrf.mxu0 }
  0xb1   : > { %v567_v22 = vpop.f32.mrf.mxu3  ;;  %v505_v26 = vadd.f32 %v499_v23, %v411_v18  ;;  %v412_v27 = vpop.f32.mrf.mxu1  ;;  %636 = vst.msk [vmem:[%s1032_s26 + $0x4] sm:$0xf] %vm606_vm4, %v633_v20  ;;  %v618_v28 = vmul.f32 %v600_v21, %v579_v17  ;;  %v604_v32 = vsel %vm602_vm5, %v600_v21, 0.0 }
  0xb2   : > { %v605_v39 = vadd.f32 %v604_v32, %v603_v34 }
  0xb3   : > { %v573_v29 = vadd.f32 %v567_v22, %v505_v26  ;;  %v621_v35 = vsel %vm602_vm5, %v618_v28, 0.0 }
  0xb4   : > { %v622_v44 = vadd.f32 %v621_v35, %v620_v41 }
  0xb5   : > { %v580_v33 = vadd.f32 %v889_v4, %v573_v29 }
  0xb7   : > { %v634_v36 = vpack.c.bf16 %v580_v33, %v580_v33  ;;  %v601_v37 = vmul.f32 %v597_v30, %v580_v33 }
  0xb8   : > { %v501_v40 = vpop.f32.mrf.mxu2 }
  0xb9   : > { %v569_v38 = vpop.f32.mrf.mxu3  ;;  %638 = vst.msk [vmem:[%s1032_s26 + $0x8] sm:$0x3] %vm637_vm6, %v634_v36  ;;  %v607_v42 = vsel %vm606_vm4, %v601_v37, 0.0  ;;  %v619_v43 = vmul.f32 %v601_v37, %v580_v33 }
  0xba   : > { %v608_v45 = vadd.f32 %v607_v42, %v605_v39 }
  0xbb   : > { %v623_v46 = vsel %vm606_vm4, %v619_v43, 0.0 }
  0xbc   : > { %v609_v47 = vrot.slane %v608_v45, 4  ;;  %v624_v48 = vadd.f32 %v623_v46, %v622_v44 }
  0xbe   : > { %v610_v49 = vadd.f32 %v609_v47, %v608_v45  ;;  %v625_v50 = vrot.slane %v624_v48, 4 }
  0xc0   : > { %v611_v51 = vrot.slane %v610_v49, 2  ;;  %v626_v52 = vadd.f32 %v625_v50, %v624_v48 }
  0xc2   : > { %v612_v53 = vadd.f32 %v611_v51, %v610_v49  ;;  %v627_v54 = vrot.slane %v626_v52, 2 }
  0xc4   : > { %v613_v55 = vrot.slane %v612_v53, 1  ;;  %v628_v56 = vadd.f32 %v627_v54, %v626_v52 }
  0xc6   : > { %v614_v57 = vadd.f32 %v613_v55, %v612_v53  ;;  %v629_v58 = vrot.slane %v628_v56, 1 }
  0xc8   : > { %616 = vst.msk [vmem:[%s265_s29] sm:$0x1] %vm615_vm7, %v614_v57  ;;  %v630_v59 = vadd.f32 %v629_v58, %v628_v56 }
  0xca   : > { %631 = vst.msk [vmem:[%s268_s8] sm:$0x1] %vm615_vm7, %v630_v59 }
  0xcb PF: > { %s17_s21 = sadd.s32 1, %s896_s21  }
  0xcc   : > { %p14_p4 = scmp.ge.s32.totalorder %s17_s21, 4  }
  0xce   :  { %16 = sbr.rel (!%p14_p4) target bundleno = 1 (0x1), region = 93 }

// kernel: discriminator_patch_forward.12
= control target key start
LH: loop header
LB: loop body
LE: loop exit
PB: predicated region body
PF: predicated region fallthrough
CT: control target
= control target key end

     0   :  { %s315_s12 = smov 0   ;;  %s338_s0 = inlined_call_operand.vmem [shape: bf16[2,20,32], index: 0, kind: input, shape index: {}]   ;;  %s339_s1 = inlined_call_operand.vmem [shape: f32[1,32], index: 1, kind: input, shape index: {}]   ;;  %s340_s2 = inlined_call_operand.vmem [shape: f32[1,32], index: 2, kind: input, shape index: {}]   ;;  %s341_s3 = inlined_call_operand.vmem [shape: bf16[2,20,32], index: 3, kind: output, shape index: {}]  }
   0x1 LB: > { %s263_s13 = sadd.s32 4294967295, %s293_s12   ;;  %p267_p0 = scmp.ge.s32.totalorder %s293_s12, 1  ;;  %s293_s12 = sphi %s315_s12, %s13_s12  }
   0x2   : > { %p137_p1 = scmp.lt.s32.totalorder %s293_s12, 3 }
   0x4   : > { %p138_p2 = pnand %p267_p0, %p137_p1 }
   0x5   : > { %p161_p3 = scmp.lt.s32.totalorder (!%p138_p2), %s263_s13, 1 }
   0x6   : > { %141 = sbr.rel (%p138_p2) target bundleno = 30 (0x1e), region = 32 }
   0xb   : > { %s343_s13 = smov (!%p161_p3, %s263_s13), 1  ;;  %v285_v0 = vld [vmem:[%s339_s1] ss:$0 sm:$0xff]  ;;  %vm203_vm3 = vcmask 257024   ;;  %vm206_vm4 = vcmask 254976  }
   0xc   : > { %s276_s14 = smul.u32 12, %s343_s13  ;;  %v286_v6 = vld [vmem:[%s340_s2] ss:$0 sm:$0xff] }
   0xe   : > { %s165_s17 = scalar_lea.vmem %s338_s0, %s276_s14  ;;  %s170_s24 = scalar_lea.vmem %s341_s3, %s276_s14 }
   0xf   : > { %v273_v1 = vld [vmem:[%s165_s17] sm:$0xff]   ;;  %v173_v2 = vld [vmem:[%s165_s17 + $0x8] sm:$0x3] }
  0x10   : > { %v274_v3 = vunpack.c.l.bf16 %v273_v1  ;;  %v275_v4 = vunpack.c.h.bf16 %v273_v1  ;;  %v176_v5 = vunpack.c.l.bf16 %v173_v2 }
  0x12   : > { %v181_v7 = vmul.f32 %v285_v0, %v274_v3  ;;  %v182_v8 = vmul.f32 %v285_v0, %v275_v4  ;;  %v183_v9 = vmul.f32 %v285_v0, %v176_v5 }
  0x14   : > { %v188_v10 = vadd.f32 %v286_v6, %v181_v7  ;;  %v189_v11 = vadd.f32 %v286_v6, %v182_v8  ;;  %v190_v12 = vadd.f32 %v286_v6, %v183_v9 }
  0x16   : > { %vm191_vm0 = vcmp.ge.f32.partialorder %v188_v10, 0.0  ;;  %v194_v13 = vmul.f32 0.2, %v188_v10  ;;  %vm192_vm1 = vcmp.ge.f32.partialorder %v189_v11, 0.0  ;;  %v195_v14 = vmul.f32 0.2, %v189_v11 }
  0x17   : > { %vm193_vm2 = vcmp.ge.f32.partialorder %v190_v12, 0.0  ;;  %v196_v15 = vmul.f32 0.2, %v190_v12 }
  0x18   : > { %v197_v16 = vsel %vm191_vm0, %v188_v10, %v194_v13  ;;  %v198_v17 = vsel %vm192_vm1, %v189_v11, %v195_v14 }
  0x19   : > { %v200_v18 = vpack.c.bf16 %v197_v16, %v197_v16  ;;  %v201_v19 = vpack.c.bf16 %v198_v17, %v198_v17  ;;  %v199_v20 = vsel %vm193_vm2, %v190_v12, %v196_v15 }
  0x1a   : > { %v202_v21 = vpack.c.bf16 %v199_v20, %v199_v20 }
  0x1b   : > { %204 = vst.msk [vmem:[%s170_s24] sm:$0xf] %vm203_vm3, %v200_v18 }
  0x1c   : > { %205 = vst.msk [vmem:[%s170_s24 + $0x4] sm:$0xf] %vm203_vm3, %v201_v19 }
  0x1d   : > { %207 = vst.msk [vmem:[%s170_s24 + $0x8] sm:$0x3] %vm206_vm4, %v202_v21 }
  0x1e PF: > { %s13_s12 = sadd.s32 1, %s293_s12  }
  0x1f   : > { %p10_p4 = scmp.ge.s32.totalorder %s13_s12, 4  }
  0x21   :  { %12 = sbr.rel (!%p10_p4) target bundleno = 1 (0x1), region = 62 }

// kernel: discriminator_patch_forward.14
= control target key start
LH: loop header
LB: loop body
LE: loop exit
PB: predicated region body
PF: predicated region fallthrough
CT: control target
= control target key end

     0   :  { %s315_s12 = smov 0   ;;  %s338_s0 = inlined_call_operand.vmem [shape: bf16[2,18,64], index: 0, kind: input, shape index: {}]   ;;  %s339_s1 = inlined_call_operand.vmem [shape: f32[1,64], index: 1, kind: input, shape index: {}]   ;;  %s340_s2 = inlined_call_operand.vmem [shape: f32[1,64], index: 2, kind: input, shape index: {}]   ;;  %s341_s3 = inlined_call_operand.vmem [shape: bf16[2,18,64], index: 3, kind: output, shape index: {}]  }
   0x1 LB: > { %s263_s13 = sadd.s32 4294967295, %s293_s12   ;;  %p267_p0 = scmp.ge.s32.totalorder %s293_s12, 1  ;;  %s293_s12 = sphi %s315_s12, %s13_s12  }
   0x2   : > { %p137_p1 = scmp.lt.s32.totalorder %s293_s12, 3 }
   0x4   : > { %p138_p2 = pnand %p267_p0, %p137_p1 }
   0x5   : > { %p161_p3 = scmp.lt.s32.totalorder (!%p138_p2), %s263_s13, 1 }
   0x6   : > { %141 = sbr.rel (%p138_p2) target bundleno = 30 (0x1e), region = 32 }
   0xb   : > { %s343_s13 = smov (!%p161_p3, %s263_s13), 1  ;;  %v285_v0 = vld [vmem:[%s339_s1] ss:$0 sm:$0xff]  ;;  %vm203_vm3 = vcmask 519168   ;;  %vm206_vm4 = vcmask 516096  }
   0xc   : > { %s276_s14 = smul.u32 12, %s343_s13  ;;  %v286_v6 = vld [vmem:[%s340_s2] ss:$0 sm:$0xff] }
   0xe   : > { %s165_s17 = scalar_lea.vmem %s338_s0, %s276_s14  ;;  %s170_s24 = scalar_lea.vmem %s341_s3, %s276_s14 }
   0xf   : > { %v273_v1 = vld [vmem:[%s165_s17] sm:$0xff]   ;;  %v173_v2 = vld [vmem:[%s165_s17 + $0x8] sm:$0x1] }
  0x10   : > { %v274_v3 = vunpack.c.l.bf16 %v273_v1  ;;  %v275_v4 = vunpack.c.h.bf16 %v273_v1  ;;  %v176_v5 = vunpack.c.l.bf16 %v173_v2 }
  0x12   : > { %v181_v7 = vmul.f32 %v285_v0, %v274_v3  ;;  %v182_v8 = vmul.f32 %v285_v0, %v275_v4  ;;  %v183_v9 = vmul.f32 %v285_v0, %v176_v5 }
  0x14   : > { %v188_v10 = vadd.f32 %v286_v6, %v181_v7  ;;  %v189_v11 = vadd.f32 %v286_v6, %v182_v8  ;;  %v190_v12 = vadd.f32 %v286_v6, %v183_v9 }
  0x16   : > { %vm191_vm0 = vcmp.ge.f32.partialorder %v188_v10, 0.0  ;;  %v194_v13 = vmul.f32 0.2, %v188_v10  ;;  %vm192_vm1 = vcmp.ge.f32.partialorder %v189_v11, 0.0  ;;  %v195_v14 = vmul.f32 0.2, %v189_v11 }
  0x17   : > { %vm193_vm2 = vcmp.ge.f32.partialorder %v190_v12, 0.0  ;;  %v196_v15 = vmul.f32 0.2, %v190_v12 }
  0x18   : > { %v197_v16 = vsel %vm191_vm0, %v188_v10, %v194_v13  ;;  %v198_v17 = vsel %vm192_vm1, %v189_v11, %v195_v14 }
  0x19   : > { %v200_v18 = vpack.c.bf16 %v197_v16, %v197_v16  ;;  %v201_v19 = vpack.c.bf16 %v198_v17, %v198_v17  ;;  %v199_v20 = vsel %vm193_vm2, %v190_v12, %v196_v15 }
  0x1a   : > { %v202_v21 = vpack.c.bf16 %v199_v20, %v199_v20 }
  0x1b   : > { %204 = vst.msk [vmem:[%s170_s24] sm:$0xf] %vm203_vm3, %v200_v18 }
  0x1c   : > { %205 = vst.msk [vmem:[%s170_s24 + $0x4] sm:$0xf] %vm203_vm3, %v201_v19 }
  0x1d   : > { %207 = vst.msk [vmem:[%s170_s24 + $0x8] sm:$0x1] %vm206_vm4, %v202_v21 }
  0x1e PF: > { %s13_s12 = sadd.s32 1, %s293_s12  }
  0x1f   : > { %p10_p4 = scmp.ge.s32.totalorder %s13_s12, 4  }
  0x21   :  { %12 = sbr.rel (!%p10_p4) target bundleno = 1 (0x1), region = 62 }

// kernel: discriminator_patch_forward.13
= control target key start
LH: loop header
LB: loop body
LE: loop exit
PB: predicated region body
PF: predicated region fallthrough
CT: control target
= control target key end

     0   :  { %s1727_s21 = smov 0   ;;  %s1990_s0 = inlined_call_operand.vmem [shape: bf16[2,39,32], index: 0, kind: input, shape index: {}]   ;;  %s1991_s1 = inlined_call_operand.vmem [shape: bf16[16,32,64], index: 1, kind: input, shape index: {}]   ;;  %s1992_s2 = inlined_call_operand.vmem [shape: f32[1,64], index: 2, kind: input, shape index: {}]   ;;  %s1993_s3 = inlined_call_operand.vmem [shape: f32[18,1], index: 3, kind: input, shape index: {}]   ;;  %s1994_s4 = inlined_call_operand.vmem [shape: bf16[2,18,64], index: 4, kind: output, shape index: {0}]   ;;  %s1995_s5 = inlined_call_operand.vmem [shape: f32[2,1,64], index: 5, kind: output, shape index: {1}]   ;;  %s1996_s6 = inlined_call_operand.vmem [shape: f32[2,1,64], index: 6, kind: output, shape index: {2}]  }
   0x1 LB: > { %s1394_s22 = sadd.s32 4294967295, %s1689_s21   ;;  %p1398_p0 = scmp.ge.s32.totalorder %s1689_s21, 1  ;;  %s1689_s21 = sphi %s1727_s21, %s17_s21  }
   0x2   : > { %p217_p1 = scmp.lt.s32.totalorder %s1689_s21, 3 }
   0x4   : > { %p218_p2 = pnand %p1398_p0, %p217_p1 }
   0x5   : > { %p253_p3 = scmp.lt.s32.totalorder (!%p218_p2), %s1394_s22, 1 }
   0x6   : > { %221 = sbr.rel (%p218_p2) target bundleno = 297 (0x129), region = 36 }
   0xb   : > { %v1628_v0 = vld [vmem:[%s1991_s1 + $0x8] sm:$0xff]  ;;  %v1630_v2 = vld [vmem:[%s1991_s1 + $0x18] sm:$0xff]  ;;  %v1627_v4 = vld [vmem:[%s1991_s1] sm:$0xff]  ;;  %s1998_s22 = smov (!%p253_p3, %s1394_s22), 1  ;;  %vm319_vm0 = vcmask 261120   ;;  %vm391_vm1 = vcmask 1046528  }
   0xc   : > { %v1632_v1 = vld [vmem:[%s1991_s1 + $0x28] sm:$0xff]  ;;  %v1634_v3 = vld [vmem:[%s1991_s1 + $0x38] sm:$0xff]  ;;  %370 = vmatpush.bf16.msra.mxu1 %v1628_v0  ;;  %v1631_v5 = vld [vmem:[%s1991_s1 + $0x20] sm:$0xff]  ;;  %332 = vmatpush.bf16.msra.mxu0 %v1630_v2  ;;  %s1664_s15 = smul.u32 20, %s1998_s22  ;;  %vm291_vm2 = vsmask.f32 7424  ;;  %s265_s16 = scalar_lea.vmem %s1995_s5, %s1998_s22 }
   0xd   : > { %419 = vmatpush.bf16.msra.mxu2 %v1632_v1  ;;  %485 = vmatpush.bf16.msra.mxu3 %v1634_v3  ;;  %v1629_v6 = vld [vmem:[%s1991_s1 + $0x10] sm:$0xff]  ;;  %v1640_v8 = vld [vmem:[%s1991_s1 + $0x68] sm:$0xff]  ;;  %v1642_v10 = vld [vmem:[%s1991_s1 + $0x78] sm:$0xff]  ;;  %vm443_vm3 = vsmask.f32 6400  ;;  %vm513_vm5 = vcmask 1044480   ;;  %s268_s19 = scalar_lea.vmem %s1996_s6, %s1998_s22 }
   0xe   : > { %v1633_v7 = vld [vmem:[%s1991_s1 + $0x30] sm:$0xff]  ;;  %v1636_v9 = vld [vmem:[%s1991_s1 + $0x48] sm:$0xff]  ;;  %s1774_s26 = scalar_lea.vmem %s1990_s0, %s1664_s15  ;;  %v1638_v11 = vld [vmem:[%s1991_s1 + $0x58] sm:$0xff]  ;;  %vm575_vm4 = vsmask.f32 4352  ;;  %vm753_vm7 = vcmask 1045504  }
   0xf   : > { %v1780_v12 = vld [vmem:[%s1774_s26] sm:$0xff]   ;;  %v277_v14 = vld [vmem:[%s1774_s26 + $0x8] sm:$0x3]  ;;  %v1641_v24 = vld [vmem:[%s1991_s1 + $0x70] sm:$0xff]  ;;  %vm805_vm6 = vsmask.f32 5376 }
  0x10   : > { %371 = vmatpush.bf16.msra.mxu1 %v1627_v4  ;;  %v382_v13 = vld [vmem:[%s1774_s26] sm:$0xe]  ;;  %333 = vmatpush.bf16.msra.mxu0 %v1629_v6  ;;  %v1663_v15 = vunpack.c.h.b16 %v1780_v12  ;;  %v293_v16 = vshrl.u32 %v1780_v12, 16  ;;  %v295_v17 = vshll.u32 %v1780_v12, 16  ;;  %v434_v19 = vld [vmem:[%s1774_s26 + $0x8] sm:$0x7]  ;;  %v288_v22 = vunpack.c.l.b16 %v277_v14 }
  0x11   : > { %420 = vmatpush.bf16.msra.mxu2 %v1631_v5  ;;  %486 = vmatpush.bf16.msra.mxu3 %v1633_v7  ;;  %v389_v18 = vunpack.c.l.b16 %v382_v13  ;;  %v1639_v20 = vld [vmem:[%s1991_s1 + $0x60] sm:$0xff]  ;;  %v441_v23 = vunpack.c.l.b16 %v434_v19  ;;  %v1637_v27 = vld [vmem:[%s1991_s1 + $0x50] sm:$0xff]  ;;  %v272_v40 = vld [vmem:[%s1774_s26 + $0x8] sm:$0x1]  ;;  %s1665_s10 = smul.u32 12, %s1998_s22  ;;  %vm1285_vm8 = vcmask 519168  }
  0x12   : > { %v1635_v21 = vld [vmem:[%s1991_s1 + $0x40] sm:$0xff]  ;;  %v297_v25 = vrot.slane %v295_v17, 1  ;;  %v290_v28 = vpack.c.b16 %v288_v22, %v288_v22  ;;  %v559_v48 = vld [vmem:[%s1774_s26 + $0xc] sm:$0x1]  ;;  %v345_v52 = vunpack.c.l.b16 %v272_v40  ;;  %v1651_v58 = vld [vmem:[%s1991_s1 + $0xb8] sm:$0xff]  ;;  %vm1252_vm9 = vcmask 523264  }
  0x13   : > { %1423 = vmatmul.msk.bf16.vlgmr.msra.gmra.mxu1 %vm319_vm0, %v1780_v12  ;;  %v390_v26 = vpack.c.b16 %v1663_v15, %v389_v18  ;;  %v442_v29 = vpack.c.b16 %v441_v23, %v441_v23  ;;  %v1684_v41 = vld [vmem:[%s1774_s26] sm:$0x8]  ;;  %v1808_v46 = vld [vmem:[%s1774_s26 + $0x4] sm:$0xff]   ;;  %v1818_v54 = vunpack.c.l.b16 %v559_v48  ;;  %v1646_v60 = vld [vmem:[%s1991_s1 + $0x98] sm:$0xff]  ;;  %s1969_s13 = scalar_lea.vmem %s1994_s4, %s1665_s10  ;;  %vm1265_vm10 = vcmask 516096  }
  0x14   : > { %541 = vmatpush.bf16.msrb.mxu0 %v1636_v9  ;;  %617 = vmatpush.bf16.msrb.mxu1 %v1638_v11  ;;  %v298_v31 = vor.u32 %v297_v25, %v293_v16  ;;  %v393_v34 = vrot.slane %v290_v28, 1  ;;  %v300_v35 = vshll.u32 %v290_v28, 16  ;;  %v1686_v47 = vld [vmem:[%s1774_s26] sm:$0xf0]   ;;  %v1816_v53 = vunpack.c.h.b16 %v1808_v46  ;;  %v1648_v55 = vld [vmem:[%s1991_s1 + $0xa8] sm:$0xff]  ;;  %v1645_v22 = vld [vmem:[%s1991_s1 + $0x90] sm:$0xff] }
  0x15   : > { %663 = vmatpush.bf16.msrb.mxu2 %v1640_v8  ;;  %725 = vmatpush.bf16.msrb.mxu3 %v1642_v10  ;;  %v392_v30 = vrot.slane %v390_v26, 1  ;;  %v445_v32 = vshrl.u32 %v390_v26, 16  ;;  %v448_v33 = vshll.u32 %v390_v26, 16  ;;  %v453_v36 = vshrl.u32 %v442_v29, 16  ;;  %v1644_v57 = vld [vmem:[%s1991_s1 + $0x88] sm:$0xff]  ;;  %v1647_v17 = vld [vmem:[%s1991_s1 + $0xa0] sm:$0xff] }
  0x16   : > { %v456_v37 = vshll.u32 %v442_v29, 16  ;;  %v302_v43 = vrot.slane %v300_v35, 1  ;;  %v346_v59 = vpack.c.b16 %v345_v52, %v345_v52  ;;  %v1685_v61 = vor.u32 %v1686_v47, %v1684_v41  ;;  %v678_v9 = vld [vmem:[%s1774_s26 + $0xc] sm:$0x3]  ;;  %v500_v10 = vld [vmem:[%s1774_s26] sm:$0x8] }
  0x17   : > { %v447_v38 = vrot.slane %v445_v32, 1  ;;  %v450_v39 = vrot.slane %v448_v33, 2  ;;  %v394_v42 = vsel %vm391_vm1, %v392_v30, %v393_v34  ;;  %v455_v44 = vrot.slane %v453_v36, 1  ;;  %v501_v11 = vld [vmem:[%s1774_s26 + $0x8] sm:$0xff]   ;;  %v740_v35 = vld [vmem:[%s1774_s26 + $0x4] sm:$0xc] }
  0x18   : > { %542 = vmatpush.bf16.msrb.mxu0 %v1635_v21  ;;  %618 = vmatpush.bf16.msrb.mxu1 %v1637_v27  ;;  %v458_v45 = vrot.slane %v456_v37, 2  ;;  %v303_v50 = vsel %vm291_vm2, %v298_v31, %v302_v43  ;;  %v574_v62 = vpack.c.b16 %v1818_v54, %v1816_v53  ;;  %v304_v63 = vshrl.u32 %v290_v28, 16  ;;  %v1650_v21 = vld [vmem:[%s1991_s1 + $0xb0] sm:$0xff]  ;;  %v1659_v40 = vld [vmem:[%s1991_s1 + $0xf8] sm:$0xff] }
  0x19   : > { %664 = vmatpush.bf16.msrb.mxu2 %v1639_v20  ;;  %726 = vmatpush.bf16.msrb.mxu3 %v1641_v24  ;;  %v451_v49 = vor.u32 %v450_v39, %v447_v38  ;;  %v577_v0 = vshrl.u32 %v1685_v61, 16  ;;  %v580_v1 = vshll.u32 %v1685_v61, 16  ;;  %v685_v13 = vunpack.c.l.b16 %v678_v9  ;;  %v1643_v20 = vld [vmem:[%s1991_s1 + $0x80] sm:$0xff]  ;;  %v1657_v38 = vld [vmem:[%s1991_s1 + $0xe8] sm:$0xff]  ;;  %v1655_v41 = vld [vmem:[%s1991_s1 + $0xd8] sm:$0xff] }
  0x1a   : > { %1437 = vmatmul.msk.bf16.vlgmr.msra.gmra.mxu2 %vm319_vm0, %v394_v42  ;;  %v459_v51 = vor.u32 %v458_v45, %v455_v44  ;;  %1413 = vmatmul.msk.bf16.vlgmr.msra.gmra.mxu0 %vm319_vm0, %v303_v50  ;;  %v585_v2 = vshrl.u32 %v574_v62, 16  ;;  %v588_v3 = vshll.u32 %v574_v62, 16  ;;  %v306_v4 = vor.u32 %v304_v63, %v302_v43  ;;  %v1653_v39 = vld [vmem:[%s1991_s1 + $0xc8] sm:$0xff]  ;;  %v1557_v61 = vld [vmem:[%s1774_s26 + $0x4] sm:$0x8]  ;;  %v1658_v9 = vld [vmem:[%s1991_s1 + $0xf0] sm:$0xff] }
  0x1b   : > { %v579_v5 = vrot.slane %v577_v0, 3  ;;  %v582_v6 = vrot.slane %v580_v1, 4  ;;  %v509_v18 = vunpack.c.l.b16 %v500_v10  ;;  %v510_v19 = vunpack.c.l.b16 %v501_v11  ;;  %v1891_v48 = vld [vmem:[%s1774_s26 + $0xc] sm:$0xff]   ;;  %v1649_v62 = vld [vmem:[%s1774_s26 + $0x4] sm:$0xf0] }
  0x1c   : > { %v460_v56 = vsel %vm443_vm3, %v451_v49, %v459_v51  ;;  %781 = vmatpush.bf16.msra.mxu0 %v1644_v57  ;;  %847 = vmatpush.bf16.msra.mxu1 %v1646_v60  ;;  %v587_v7 = vrot.slane %v585_v2, 3  ;;  %v590_v8 = vrot.slane %v588_v3, 4  ;;  %v686_v23 = vpack.c.b16 %v685_v13, %v685_v13  ;;  %v916_v49 = vld [vmem:[%s1774_s26 + $0x10] sm:$0x1]  ;;  %v741_v1 = vld [vmem:[%s1774_s26 + $0xc] sm:$0x7] }
  0x1d   : > { %1451 = vmatmul.msk.bf16.vlgmr.msra.gmra.mxu3 %vm319_vm0, %v460_v56  ;;  %898 = vmatpush.bf16.msra.mxu2 %v1648_v55  ;;  %v583_v14 = vor.u32 %v582_v6, %v579_v5  ;;  %v689_v24 = vshll.u32 %v1808_v46, 16  ;;  %v511_v26 = vpack.c.b16 %v1663_v15, %v509_v18  ;;  %v512_v27 = vpack.c.b16 %v510_v19, %v510_v19  ;;  %v862_v56 = vld [vmem:[%s1774_s26 + $0x4] sm:$0x8]  ;;  %v1654_v10 = vld [vmem:[%s1991_s1 + $0xd0] sm:$0xff] }
  0x1e   : > { %973 = vmatpush.bf16.msra.mxu3 %v1651_v58  ;;  %v591_v16 = vor.u32 %v590_v8, %v587_v7  ;;  %v687_v28 = vshrl.u32 %v1808_v46, 16  ;;  %v694_v30 = vshll.u32 %v686_v23, 16  ;;  %v749_v15 = vunpack.c.l.b16 %v740_v35  ;;  %v1656_v5 = vld [vmem:[%s1991_s1 + $0xe0] sm:$0xff] }
  0x1f   : > { %v691_v29 = vrot.slane %v689_v24, 1  ;;  %v514_v31 = vrot.slane %v511_v26, 3  ;;  %v515_v32 = vrot.slane %v512_v27, 3  ;;  %v803_v37 = vunpack.c.h.b16 %v501_v11  ;;  %v1652_v8 = vld [vmem:[%s1991_s1 + $0xc0] sm:$0xff] }
  0x20   : > { %v592_v25 = vsel %vm575_vm4, %v583_v14, %v591_v16  ;;  %782 = vmatpush.bf16.msra.mxu0 %v1643_v20  ;;  %848 = vmatpush.bf16.msra.mxu1 %v1645_v22  ;;  %v1881_v42 = vpack.c.b16 %v1816_v53, %v749_v15  ;;  %v638_v50 = vpack.c.b16 %v1818_v54, %v1818_v54  ;;  %v1898_v57 = vunpack.c.l.b16 %v1891_v48 }
  0x21   : > { %899 = vmatpush.bf16.msra.mxu2 %v1647_v17  ;;  %v692_v33 = vor.u32 %v691_v29, %v687_v28  ;;  %v516_v36 = vsel %vm513_vm5, %v514_v31, %v515_v32  ;;  %v1883_v43 = vpack.c.b16 %v803_v37, %v803_v37  ;;  %v929_v58 = vunpack.c.l.b16 %v916_v49  ;;  %v1043_v31 = vld [vmem:[%s1774_s26 + $0x10] sm:$0x7] }
  0x22   : > { %974 = vmatpush.bf16.msra.mxu3 %v1650_v21  ;;  %v807_v44 = vshrl.u32 %v1881_v42, 16  ;;  %v810_v45 = vshll.u32 %v1881_v42, 16  ;;  %v869_v0 = vunpack.c.l.b16 %v862_v56  ;;  %v1558_v2 = vor.u32 %v1649_v62, %v1557_v61 }
  0x23   : > { %1424 = vmatmul.msk.bf16.gmra.mxu1 %vm319_vm0, %v346_v59  ;;  %v818_v47 = vshll.u32 %v1883_v43, 16  ;;  %v931_v54 = vpack.c.b16 %v929_v58, %v1898_v57  ;;  %v750_v6 = vunpack.c.l.b16 %v741_v1  ;;  %v872_v19 = vrot.slane %v1883_v43, 3 }
  0x24   : > { %v809_v52 = vrot.slane %v807_v44, 2  ;;  %v812_v55 = vrot.slane %v810_v45, 3  ;;  %v870_v7 = vpack.c.b16 %v1816_v53, %v869_v0  ;;  %v933_v11 = vshrl.u32 %v1558_v2, 16 }
  0x25   : > { %v820_v60 = vrot.slane %v818_v47, 3  ;;  %v936_v13 = vshll.u32 %v1558_v2, 16  ;;  %v941_v14 = vshrl.u32 %v931_v54, 16  ;;  %v752_v53 = vpack.c.b16 %v750_v6, %v750_v6 }
  0x26   : > { %v813_v3 = vor.u32 %v812_v55, %v809_v52  ;;  %v871_v18 = vrot.slane %v870_v7, 3  ;;  %v935_v20 = vrot.slane %v933_v11, 3  ;;  %v754_v24 = vrot.slane %v1881_v42, 2  ;;  %v1233_v11 = vld [vmem:[%s1993_s3 + $0x10] sm:$0x3] }
  0x27   : > { %v938_v21 = vrot.slane %v936_v13, 4  ;;  %v943_v22 = vrot.slane %v941_v14, 3  ;;  %vm1256_vm11 = vcmask 517120  }
  0x28   : > { %v873_v26 = vsel %vm513_vm5, %v871_v18, %v872_v19 }
  0x29   : > { %v939_v27 = vor.u32 %v938_v21, %v935_v20 }
  0x2a   : > { %1438 = vmatmul.msk.bf16.gmra.mxu2 %vm319_vm0, %v393_v34  ;;  %1414 = vmatmul.msk.bf16.gmra.mxu0 %vm319_vm0, %v306_v4  ;;  %v696_v34 = vrot.slane %v694_v30, 1  ;;  %v988_v30 = vld [vmem:[%s1774_s26 + $0x8] sm:$0xe] }
  0x2c   : > { %v697_v12 = vsel %vm291_vm2, %v692_v33, %v696_v34  ;;  %v997_v33 = vunpack.c.l.b16 %v988_v30 }
  0x2d   : > { %1452 = vmatmul.msk.bf16.gmra.mxu3 %vm319_vm0, %v459_v51  ;;  %v698_v51 = vshrl.u32 %v686_v23, 16 }
  0x2e   : > { %v999_v35 = vpack.c.b16 %v1898_v57, %v997_v33 }
  0x2f   : > { %v700_v63 = vor.u32 %v698_v51, %v696_v34  ;;  %v1050_v34 = vunpack.c.l.b16 %v1043_v31 }
  0x30   : > { %v1056_v15 = vshll.u32 %v999_v35, 16 }
  0x33   : > { %1479 = vmatmul.msk.bf16.vlgmr.msrb.gmra.mxu1 %vm319_vm0, %v592_v25  ;;  %v755_v25 = vrot.slane %v752_v53, 2 }
  0x34   : > { %1093 = vmatpush.bf16.msrb.mxu1 %v1655_v41  ;;  %v1166_v41 = vunpack.c.h.b16 %v1891_v48  ;;  %v1231_v48 = vld [vmem:[%s1993_s3] sm:$0xff] }
  0x35   : > { %v756_v29 = vsel %vm753_vm7, %v754_v24, %v755_v25 }
  0x36   : > { %v1167_v49 = vpack.c.b16 %v1166_v41, %v1166_v41 }
  0x38   : > { %1094 = vmatpush.bf16.msrb.mxu1 %v1654_v10  ;;  %v1177_v58 = vshrl.u32 %v1167_v49, 16 }
  0x3a   : > { %1493 = vmatmul.msk.bf16.vlgmr.msrb.gmra.mxu2 %vm319_vm0, %v1808_v46  ;;  %1465 = vmatmul.msk.bf16.vlgmr.msrb.gmra.mxu0 %vm319_vm0, %v516_v36  ;;  %v815_v46 = vshrl.u32 %v1883_v43, 16  ;;  %v1051_v36 = vpack.c.b16 %v1050_v34, %v1050_v34  ;;  %v1058_v43 = vrot.slane %v1056_v15, 2  ;;  %v1179_v2 = vrot.slane %v1177_v58, 2 }
  0x3b   : > { %1144 = vmatpush.bf16.msrb.mxu2 %v1657_v38  ;;  %1028 = vmatpush.bf16.msrb.mxu0 %v1653_v39  ;;  %v1108_v39 = vld [vmem:[%s1774_s26 + $0x8] sm:$0xc] }
  0x3c   : > { %v817_v59 = vrot.slane %v815_v46, 2  ;;  %v1061_v37 = vshrl.u32 %v1051_v36, 16  ;;  %v1064_v38 = vshll.u32 %v1051_v36, 16  ;;  %v989_v46 = vld [vmem:[%s1774_s26 + $0x10] sm:$0x3] }
  0x3d   : > { %1507 = vmatmul.msk.bf16.vlgmr.msrb.gmra.mxu3 %vm319_vm0, %v697_v12  ;;  %v1053_v12 = vshrl.u32 %v999_v35, 16  ;;  %v998_v52 = vunpack.c.l.b16 %v989_v46 }
  0x3e   : > { %1209 = vmatpush.bf16.msrb.mxu3 %v1659_v40  ;;  %v821_v4 = vor.u32 %v820_v60, %v817_v59  ;;  %v1115_v40 = vunpack.c.l.b16 %v1108_v39  ;;  %v1063_v44 = vrot.slane %v1061_v37, 1  ;;  %v1066_v45 = vrot.slane %v1064_v38, 2 }
  0x3f   : > { %1145 = vmatpush.bf16.msrb.mxu2 %v1656_v5  ;;  %1029 = vmatpush.bf16.msrb.mxu0 %v1652_v8  ;;  %v1055_v42 = vrot.slane %v1053_v12, 1  ;;  %v1180_v59 = vshll.u32 %v1167_v49, 16  ;;  %v1691_v60 = vmov 0   ;;  %v1000_v61 = vpack.c.b16 %v998_v52, %v998_v52  ;;  %v1232_v5 = vld [vmem:[%s1993_s3 + $0x8] sm:$0xff] }
  0x40   : > { %v822_v17 = vsel %vm805_vm6, %v813_v3, %v821_v4  ;;  %v1116_v47 = vpack.c.b16 %v1898_v57, %v1115_v40  ;;  %v1067_v51 = vor.u32 %v1066_v45, %v1063_v44  ;;  %1675 = vset.pattern.permute.xlu0 %v1691_v60  ;;  %1676 = vset.pattern.permute.xlu1 %v1691_v60  ;;  %v1001_v3 = vrot.slane %v999_v35, 1 }
  0x41   : > { %1236 = vperm.xlu0 %1675, %v1231_v48   ;;  %1246 = vperm.xlu1 %1676, %v1233_v11  }
  0x42   : > { %1210 = vmatpush.bf16.msrb.mxu3 %v1658_v9  ;;  %v1169_v55 = vshrl.u32 %v1116_v47, 16  ;;  %v1172_v56 = vshll.u32 %v1116_v47, 16  ;;  %v1117_v62 = vrot.slane %v1116_v47, 2 }
  0x43   : > { %1480 = vmatmul.msk.bf16.gmra.mxu1 %vm319_vm0, %v591_v16  ;;  %v944_v16 = vshll.u32 %v931_v54, 16  ;;  %v1182_v54 = vrot.slane %v1180_v59, 3 }
  0x44   : > { %v1171_v0 = vrot.slane %v1169_v55, 2  ;;  %v1174_v1 = vrot.slane %v1172_v56, 3 }
  0x45   : > { %v946_v23 = vrot.slane %v944_v16, 4  ;;  %v1183_v8 = vor.u32 %v1182_v54, %v1179_v2 }
  0x46   : > { %v1175_v7 = vor.u32 %v1174_v1, %v1171_v0 }
  0x47   : > { %v947_v28 = vor.u32 %v946_v23, %v943_v22 }
  0x48   : > { %v1184_v10 = vsel %vm805_vm6, %v1175_v7, %v1183_v8 }
  0x49   : > { %1241 = vperm.xlu0 %1675, %v1232_v5  }
  0x4a   : > { %1494 = vmatmul.msk.bf16.gmra.mxu2 %vm319_vm0, %v638_v50  ;;  %1466 = vmatmul.msk.bf16.gmra.mxu0 %vm319_vm0, %v515_v32  ;;  %v948_v32 = vsel %vm575_vm4, %v939_v27, %v947_v28  ;;  %v1059_v50 = vor.u32 %v1058_v43, %v1055_v42 }
  0x4c   : > { %v1068_v57 = vsel %vm443_vm3, %v1059_v50, %v1067_v51 }
  0x4d   : > { %1508 = vmatmul.msk.bf16.gmra.mxu3 %vm319_vm0, %v700_v63  ;;  %v1118_v63 = vrot.slane %v1051_v36, 2 }
  0x4f   : > { %v1119_v6 = vsel %vm753_vm7, %v1117_v62, %v1118_v63 }
  0x53   : > { %1535 = vmatmul.msk.bf16.vlgmr.msra.gmra.mxu1 %vm319_vm0, %v822_v17 }
  0x5a   : > { %1549 = vmatmul.msk.bf16.vlgmr.msra.gmra.mxu2 %vm319_vm0, %v873_v26  ;;  %1521 = vmatmul.msk.bf16.vlgmr.msra.gmra.mxu0 %vm319_vm0, %v756_v29 }
  0x5d   : > { %1567 = vmatmul.msk.bf16.vlgmr.msra.gmra.mxu3 %vm319_vm0, %v948_v32 }
  0x63   : > { %1536 = vmatmul.msk.bf16.gmra.mxu1 %vm319_vm0, %v821_v4  ;;  %v1002_v4 = vrot.slane %v1000_v61, 1 }
  0x65   : > { %v1003_v9 = vsel %vm391_vm1, %v1001_v3, %v1002_v4 }
  0x6a   : > { %1550 = vmatmul.msk.bf16.gmra.mxu2 %vm319_vm0, %v872_v19  ;;  %1522 = vmatmul.msk.bf16.gmra.mxu0 %vm319_vm0, %v755_v25 }
  0x6d   : > { %1568 = vmatmul.msk.bf16.gmra.mxu3 %vm319_vm0, %v947_v28 }
  0x73   : > { %1595 = vmatmul.msk.bf16.vlgmr.msrb.gmra.mxu1 %vm319_vm0, %v1068_v57 }
  0x7a   : > { %1609 = vmatmul.msk.bf16.vlgmr.msrb.gmra.mxu2 %vm319_vm0, %v1119_v6  ;;  %1581 = vmatmul.msk.bf16.vlgmr.msrb.gmra.mxu0 %vm319_vm0, %v1003_v9 }
  0x7d   : > { %1623 = vmatmul.msk.bf16.vlgmr.msrb.gmra.mxu3 %vm319_vm0, %v1184_v10 }
  0x83   : > { %1596 = vmatmul.msk.bf16.gmra.mxu1 %vm319_vm0, %v1067_v51 }
  0x8a   : > { %1610 = vmatmul.msk.bf16.gmra.mxu2 %vm319_vm0, %v1118_v63  ;;  %1582 = vmatmul.msk.bf16.gmra.mxu0 %vm319_vm0, %v1002_v4 }
  0x8d   : > { %1624 = vmatmul.msk.bf16.gmra.mxu3 %vm319_vm0, %v1183_v8 }
  0x90   : > { %v373_v13 = vpop.f32.mrf.mxu1 }
  0x97   : > { %v335_v16 = vpop.f32.mrf.mxu0 }
  0x98   : > { %v375_v14 = vpop.f32.mrf.mxu1  ;;  %v374_v17 = vadd.f32 %v373_v13, %v335_v16 }
  0x9d   : > { %v422_v53 = vpop.f32.mrf.mxu2 }
  0x9e   : > { %v431_v18 = vadd.f32 %v422_v53, %v374_v17 }
  0x9f   : > { %v337_v20 = vpop.f32.mrf.mxu0 }
  0xa0   : > { %v378_v19 = vpop.f32.mrf.mxu1  ;;  %v488_v21 = vpop.f32.mrf.mxu3  ;;  %v376_v22 = vadd.f32 %v375_v14, %v337_v20 }
  0xa1   : > { %v497_v23 = vadd.f32 %v488_v21, %v431_v18 }
  0xa5   : > { %v424_v24 = vpop.f32.mrf.mxu2 }
  0xa6   : > { %v432_v25 = vadd.f32 %v424_v24, %v376_v22 }
  0xa7   : > { %v340_v27 = vpop.f32.mrf.mxu0 }
  0xa8   : > { %v380_v26 = vpop.f32.mrf.mxu1  ;;  %v490_v28 = vpop.f32.mrf.mxu3  ;;  %v379_v29 = vadd.f32 %v378_v19, %v340_v27 }
  0xa9   : > { %v498_v30 = vadd.f32 %v490_v28, %v432_v25 }
  0xad   : > { %v427_v31 = vpop.f32.mrf.mxu2 }
  0xae   : > { %v433_v32 = vadd.f32 %v427_v31, %v379_v29 }
  0xaf   : > { %v342_v34 = vpop.f32.mrf.mxu0 }
  0xb0   : > { %v620_v33 = vpop.f32.mrf.mxu1  ;;  %v493_v35 = vpop.f32.mrf.mxu3  ;;  %v1677_v34 = vld [vmem:[%s1992_s2] ss:$0 sm:$0xff] }
  0xb1   : > { %v499_v36 = vadd.f32 %v493_v35, %v433_v32 }
  0xb5   : > { %v429_v12 = vpop.f32.mrf.mxu2 }
  0xb7   : > { %v544_v38 = vpop.f32.mrf.mxu0 }
  0xb8   : > { %v622_v15 = vpop.f32.mrf.mxu1  ;;  %v495_v37 = vpop.f32.mrf.mxu3  ;;  %v553_v61 = vadd.f32 %v544_v38, %v497_v23 }
  0xba   : > { %v629_v63 = vadd.f32 %v620_v33, %v553_v61 }
  0xbd   : > { %v666_v39 = vpop.f32.mrf.mxu2 }
  0xbe   : > { %v675_v54 = vadd.f32 %v666_v39, %v629_v63  ;;  %v1237_v39 = vpop.permute.xlu0 %1236 }
  0xbf   : > { %v546_v41 = vpop.f32.mrf.mxu0 }
  0xc0   : > { %v625_v40 = vpop.f32.mrf.mxu1  ;;  %v728_v42 = vpop.f32.mrf.mxu3  ;;  %v554_v3 = vadd.f32 %v546_v41, %v498_v30 }
  0xc1   : > { %v737_v4 = vadd.f32 %v728_v42, %v675_v54 }
  0xc2   : > { %v630_v6 = vadd.f32 %v622_v15, %v554_v3 }
  0xc5   : > { %v668_v43 = vpop.f32.mrf.mxu2 }
  0xc6   : > { %v676_v11 = vadd.f32 %v668_v43, %v630_v6 }
  0xc7   : > { %v549_v45 = vpop.f32.mrf.mxu0 }
  0xc8   : > { %v627_v44 = vpop.f32.mrf.mxu1  ;;  %v730_v46 = vpop.f32.mrf.mxu3  ;;  %v555_v13 = vadd.f32 %v549_v45, %v499_v36 }
  0xc9   : > { %v738_v16 = vadd.f32 %v730_v46, %v676_v11 }
  0xca   : > { %v631_v53 = vadd.f32 %v625_v40, %v555_v13 }
  0xcd   : > { %v671_v47 = vpop.f32.mrf.mxu2 }
  0xce   : > { %v677_v24 = vadd.f32 %v671_v47, %v631_v53 }
  0xcf   : > { %v551_v50 = vpop.f32.mrf.mxu0 }
  0xd0   : > { %v850_v49 = vpop.f32.mrf.mxu1  ;;  %v733_v51 = vpop.f32.mrf.mxu3 }
  0xd1   : > { %v739_v27 = vadd.f32 %v733_v51, %v677_v24 }
  0xd5   : > { %v673_v52 = vpop.f32.mrf.mxu2 }
  0xd7   : > { %v784_v56 = vpop.f32.mrf.mxu0 }
  0xd8   : > { %v852_v48 = vpop.f32.mrf.mxu1  ;;  %v735_v55 = vpop.f32.mrf.mxu3  ;;  %v793_v7 = vadd.f32 %v784_v56, %v737_v4 }
  0xda   : > { %v859_v14 = vadd.f32 %v850_v49, %v793_v7 }
  0xdd   : > { %v901_v58 = vpop.f32.mrf.mxu2 }
  0xde   : > { %v910_v18 = vadd.f32 %v901_v58, %v859_v14  ;;  %v1242_v58 = vpop.permute.xlu0 %1241 }
  0xdf   : > { %v786_v60 = vpop.f32.mrf.mxu0 }
  0xe0   : > { %v855_v59 = vpop.f32.mrf.mxu1  ;;  %v976_v57 = vpop.f32.mrf.mxu3  ;;  %v794_v19 = vadd.f32 %v786_v60, %v738_v16 }
  0xe1   : > { %v985_v20 = vadd.f32 %v976_v57, %v910_v18 }
  0xe2   : > { %v860_v25 = vadd.f32 %v852_v48, %v794_v19 }
  0xe5   : > { %v903_v62 = vpop.f32.mrf.mxu2 }
  0xe6   : > { %v911_v30 = vadd.f32 %v903_v62, %v860_v25 }
  0xe7   : > { %v789_v1 = vpop.f32.mrf.mxu0 }
  0xe8   : > { %v857_v0 = vpop.f32.mrf.mxu1  ;;  %v978_v2 = vpop.f32.mrf.mxu3  ;;  %v795_v31 = vadd.f32 %v789_v1, %v739_v27 }
  0xe9   : > { %v986_v32 = vadd.f32 %v978_v2, %v911_v30 }
  0xea   : > { %v861_v15 = vadd.f32 %v855_v59, %v795_v31 }
  0xed   : > { %v906_v5 = vpop.f32.mrf.mxu2 }
  0xee   : > { %v912_v43 = vadd.f32 %v906_v5, %v861_v15 }
  0xef   : > { %v791_v9 = vpop.f32.mrf.mxu0 }
  0xf0   : > { %v1096_v8 = vpop.f32.mrf.mxu1  ;;  %v981_v10 = vpop.f32.mrf.mxu3 }
  0xf1   : > { %v987_v45 = vadd.f32 %v981_v10, %v912_v43 }
  0xf5   : > { %v908_v17 = vpop.f32.mrf.mxu2 }
  0xf7   : > { %v1031_v23 = vpop.f32.mrf.mxu0 }
  0xf8   : > { %v1098_v21 = vpop.f32.mrf.mxu1  ;;  %v983_v22 = vpop.f32.mrf.mxu3  ;;  %v1040_v26 = vadd.f32 %v1031_v23, %v985_v20 }
  0xfa   : > { %v1105_v28 = vadd.f32 %v1096_v8, %v1040_v26  ;;  %v1247_v8 = vpop.permute.xlu1 %1246 }
  0xfd   : > { %v1147_v29 = vpop.f32.mrf.mxu2 }
  0xfe   : > { %v1156_v33 = vadd.f32 %v1147_v29, %v1105_v28 }
  0xff   : > { %v1033_v36 = vpop.f32.mrf.mxu0 }
 0x100   : > { %v1101_v35 = vpop.f32.mrf.mxu1  ;;  %v1212_v12 = vpop.f32.mrf.mxu3  ;;  %v1041_v37 = vadd.f32 %v1033_v36, %v986_v32 }
 0x101   : > { %v1221_v38 = vadd.f32 %v1212_v12, %v1156_v33 }
 0x102   : > { %v1106_v41 = vadd.f32 %v1098_v21, %v1041_v37 }
 0x103   : > { %v1228_v40 = vadd.f32 %v1677_v34, %v1221_v38 }
 0x105   : > { %v1149_v42 = vpop.f32.mrf.mxu2  ;;  %v1282_v44 = vpack.c.bf16 %v1228_v40, %v1228_v40  ;;  %v1249_v51 = vmul.f32 %v1237_v39, %v1228_v40 }
 0x106   : > { %v1157_v46 = vadd.f32 %v1149_v42, %v1106_v41 }
 0x107   : > { %1286 = vst.msk [vmem:[%s1969_s13] sm:$0xf] %vm1285_vm8, %v1282_v44  ;;  %v1036_v49 = vpop.f32.mrf.mxu0  ;;  %v1267_v60 = vmul.f32 %v1249_v51, %v1228_v40  ;;  %v1253_v62 = vsel %vm1252_vm9, %v1249_v51, 0.0 }
 0x108   : > { %v1103_v47 = vpop.f32.mrf.mxu1  ;;  %v1214_v50 = vpop.f32.mrf.mxu3  ;;  %v1042_v52 = vadd.f32 %v1036_v49, %v987_v45 }
 0x109   : > { %v1222_v48 = vadd.f32 %v1214_v50, %v1157_v46  ;;  %v1270_v4 = vsel %vm1252_vm9, %v1267_v60, 0.0 }
 0x10a   : > { %v1107_v56 = vadd.f32 %v1101_v35, %v1042_v52 }
 0x10b   : > { %v1229_v55 = vadd.f32 %v1677_v34, %v1222_v48 }
 0x10d   : > { %v1152_v59 = vpop.f32.mrf.mxu2  ;;  %v1283_v57 = vpack.c.bf16 %v1229_v55, %v1229_v55  ;;  %v1250_v61 = vmul.f32 %v1242_v58, %v1229_v55 }
 0x10e   : > { %v1158_v1 = vadd.f32 %v1152_v59, %v1107_v56 }
 0x10f   : > { %1287 = vst.msk [vmem:[%s1969_s13 + $0x4] sm:$0xf] %vm1285_vm8, %v1283_v57  ;;  %v1254_v63 = vsel %vm1252_vm9, %v1250_v61, 0.0  ;;  %v1268_v0 = vmul.f32 %v1250_v61, %v1229_v55  ;;  %v1038_v54 = vpop.f32.mrf.mxu0 }
 0x110   : > { %v1255_v2 = vadd.f32 %v1254_v63, %v1253_v62  ;;  %v1217_v3 = vpop.f32.mrf.mxu3 }
 0x111   : > { %v1271_v5 = vsel %vm1252_vm9, %v1268_v0, 0.0  ;;  %v1223_v6 = vadd.f32 %v1217_v3, %v1158_v1 }
 0x112   : > { %v1272_v7 = vadd.f32 %v1271_v5, %v1270_v4 }
 0x113   : > { %v1230_v9 = vadd.f32 %v1677_v34, %v1223_v6 }
 0x115   : > { %v1154_v10 = vpop.f32.mrf.mxu2  ;;  %v1284_v11 = vpack.c.bf16 %v1230_v9, %v1230_v9  ;;  %v1251_v13 = vmul.f32 %v1247_v8, %v1230_v9 }
 0x117   : > { %1288 = vst.msk [vmem:[%s1969_s13 + $0x8] sm:$0x1] %vm1265_vm10, %v1284_v11  ;;  %v1257_v14 = vsel %vm1256_vm11, %v1251_v13, 0.0  ;;  %v1269_v16 = vmul.f32 %v1251_v13, %v1230_v9 }
 0x118   : > { %v1258_v17 = vadd.f32 %v1257_v14, %v1255_v2  ;;  %v1219_v53 = vpop.f32.mrf.mxu3 }
 0x119   : > { %v1273_v18 = vsel %vm1256_vm11, %v1269_v16, 0.0 }
 0x11a   : > { %v1259_v19 = vrot.slane %v1258_v17, 4  ;;  %v1274_v20 = vadd.f32 %v1273_v18, %v1272_v7 }
 0x11c   : > { %v1260_v21 = vadd.f32 %v1259_v19, %v1258_v17  ;;  %v1275_v22 = vrot.slane %v1274_v20, 4 }
 0x11e   : > { %v1261_v23 = vrot.slane %v1260_v21, 2  ;;  %v1276_v24 = vadd.f32 %v1275_v22, %v1274_v20 }
 0x120   : > { %v1262_v25 = vadd.f32 %v1261_v23, %v1260_v21  ;;  %v1277_v26 = vrot.slane %v1276_v24, 2 }
 0x122   : > { %v1263_v27 = vrot.slane %v1262_v25, 1  ;;  %v1278_v28 = vadd.f32 %v1277_v26, %v1276_v24 }
 0x124   : > { %v1264_v29 = vadd.f32 %v1263_v27, %v1262_v25  ;;  %v1279_v30 = vrot.slane %v1278_v28, 1 }
 0x126   : > { %1266 = vst.msk [vmem:[%s265_s16] sm:$0x1] %vm1265_vm10, %v1264_v29  ;;  %v1280_v31 = vadd.f32 %v1279_v30, %v1278_v28 }
 0x128   : > { %1281 = vst.msk [vmem:[%s268_s19] sm:$0x1] %vm1265_vm10, %v1280_v31 }
 0x129 PF: > { %s17_s21 = sadd.s32 1, %s1689_s21  }
 0x12a   : > { %p14_p4 = scmp.ge.s32.totalorder %s17_s21, 4  }
 0x12c   :  { %16 = sbr.rel (!%p14_p4) target bundleno = 1 (0x1), region = 105 }

// kernel: discriminator_patch_forward.15
= control target key start
LH: loop header
LB: loop body
LE: loop exit
PB: predicated region body
PF: predicated region fallthrough
CT: control target
= control target key end

     0   :  { %s1735_s14 = smov 0   ;;  %s2012_s0 = inlined_call_operand.vmem [shape: bf16[2,28,64], index: 0, kind: input, shape index: {}]   ;;  %s2013_s1 = inlined_call_operand.vmem [shape: bf16[16,64,1], index: 1, kind: input, shape index: {}]   ;;  %s2014_s2 = inlined_call_operand.<no memory space> [shape: f32[1,1], index: 2, kind: input, shape index: {}]   ;;  %s2015_s3 = inlined_call_operand.vmem [shape: f32[2,10,1], index: 3, kind: output, shape index: {}]  }
   0x1   :  { %v8_v0 = vstv %s2014_s2 }
   0x2   :  { %9 = vst [vmem:[#allocation2] sm:$0x1] %v8_v0 }
   0x3 LB: > { %s1226_s15 = sadd.s32 4294967295, %s1710_s14   ;;  %p1230_p0 = scmp.ge.s32.totalorder %s1710_s14, 1  ;;  %s1710_s14 = sphi %s1735_s14, %s15_s14  }
   0x4   : > { %p139_p1 = scmp.lt.s32.totalorder %s1710_s14, 3 }
   0x6   : > { %p140_p2 = pnand %p1230_p0, %p139_p1 }
   0x7   : > { %p163_p3 = scmp.lt.s32.totalorder (!%p140_p2), %s1226_s15, 1 }
   0x8   : > { %143 = sbr.rel (%p140_p2) target bundleno = 226 (0xe2), region = 32 }
   0xd   : > { %v1638_v1 = vld [vmem:[%s2013_s1 + $0x38] sm:$0xff]  ;;  %v1637_v5 = vld [vmem:[%s2013_s1 + $0x30] sm:$0xff]  ;;  %s2017_s15 = smov (!%p163_p3, %s1226_s15), 1  ;;  %v1636_v9 = vld [vmem:[%s2013_s1 + $0x28] sm:$0xff]  ;;  %vm230_vm0 = vcmask 523264   ;;  %vm1167_vm2 = vcmask 7168  }
   0xe   : > { %v1634_v2 = vld [vmem:[%s2013_s1 + $0x18] sm:$0xff]  ;;  %238 = vmatpush.bf16.msra.mxu0 %v1638_v1  ;;  %v1633_v6 = vld [vmem:[%s2013_s1 + $0x10] sm:$0xff]  ;;  %s1629_s4 = sshll.u32 %s2017_s15, 4  ;;  %v1632_v10 = vld [vmem:[%s2013_s1 + $0x8] sm:$0xff]  ;;  %vm557_vm1 = vsmask.f32 4352 }
   0xf   : > { %v1642_v3 = vld [vmem:[%s2013_s1 + $0x58] sm:$0xff]  ;;  %282 = vmatpush.bf16.msra.mxu1 %v1634_v2  ;;  %v1641_v7 = vld [vmem:[%s2013_s1 + $0x50] sm:$0xff]  ;;  %v1640_v11 = vld [vmem:[%s2013_s1 + $0x48] sm:$0xff]  ;;  %s1784_s13 = scalar_lea.vmem %s2012_s0, %s1629_s4  ;;  %s172_s26 = scalar_lea.vmem %s2015_s3, %s1629_s4  ;;  %vm1169_vm3 = vcmask 1024  }
  0x10   : > { %v1646_v4 = vld [vmem:[%s2013_s1 + $0x78] sm:$0xff]  ;;  %337 = vmatpush.bf16.msra.mxu2 %v1642_v3  ;;  %v1645_v8 = vld [vmem:[%s2013_s1 + $0x70] sm:$0xff]  ;;  %v1787_v12 = vld [vmem:[%s1784_s13] sm:$0xff]  }
  0x11   : > { %401 = vmatpush.bf16.msra.mxu3 %v1646_v4  ;;  %v184_v13 = vld [vmem:[%s1784_s13 + $0x4] sm:$0x3]  ;;  %v1644_v15 = vld [vmem:[%s2013_s1 + $0x68] sm:$0xff]  ;;  %v196_v16 = vunpack.c.l.b16 %v1787_v12  ;;  %v292_v18 = vld [vmem:[%s1784_s13] sm:$0xe]  ;;  %v427_v40 = vunpack.c.h.b16 %v1787_v12 }
  0x12   : > { %239 = vmatpush.bf16.msra.mxu0 %v1637_v5  ;;  %v175_v14 = vld [vmem:[%s1784_s13 + $0x4] sm:$0x1]  ;;  %v197_v17 = vunpack.c.l.b16 %v184_v13  ;;  %v303_v20 = vunpack.c.l.b16 %v292_v18  ;;  %v1658_v34 = vld [vmem:[%s2013_s1 + $0xd8] sm:$0xff]  ;;  %v413_v36 = vld [vmem:[%s1784_s13] sm:$0xc] }
  0x13   : > { %283 = vmatpush.bf16.msra.mxu1 %v1633_v6  ;;  %v349_v19 = vld [vmem:[%s1784_s13 + $0x4] sm:$0x7]  ;;  %v249_v23 = vunpack.c.l.b16 %v175_v14  ;;  %v1650_v35 = vld [vmem:[%s2013_s1 + $0x98] sm:$0xff]  ;;  %v426_v39 = vunpack.c.l.b16 %v413_v36  ;;  %v537_v41 = vld [vmem:[%s1784_s13] sm:$0x8] }
  0x14   : > { %338 = vmatpush.bf16.msra.mxu2 %v1641_v7  ;;  %v360_v21 = vunpack.c.l.b16 %v349_v19  ;;  %v198_v22 = vpack.c.b16 %v197_v17, %v196_v16  ;;  %v1635_v24 = vld [vmem:[%s2013_s1 + $0x20] sm:$0xff]  ;;  %v304_v26 = vpack.c.b16 %v197_v17, %v303_v20  ;;  %v539_v46 = vld [vmem:[%s1784_s13 + $0x8] sm:$0x1]  ;;  %v552_v47 = vunpack.c.l.b16 %v537_v41  ;;  %v1654_v49 = vld [vmem:[%s2013_s1 + $0xb8] sm:$0xff] }
  0x15   : > { %402 = vmatpush.bf16.msra.mxu3 %v1645_v8  ;;  %v1631_v25 = vld [vmem:[%s2013_s1] sm:$0xff]  ;;  %v250_v38 = vpack.c.b16 %v249_v23, %v196_v16  ;;  %v1662_v50 = vld [vmem:[%s2013_s1 + $0xf8] sm:$0xff]  ;;  %v1829_v52 = vunpack.c.l.b16 %v539_v46  ;;  %v1657_v54 = vld [vmem:[%s2013_s1 + $0xd0] sm:$0xff]  ;;  %v428_v56 = vpack.c.b16 %v427_v40, %v426_v39 }
  0x16   : > { %240 = vmatpush.bf16.msra.mxu0 %v1636_v9  ;;  %v361_v27 = vpack.c.b16 %v360_v21, %v303_v20  ;;  %v1639_v28 = vld [vmem:[%s2013_s1 + $0x40] sm:$0xff]  ;;  %v200_v30 = vshrl.u32 %v198_v22, 16  ;;  %v202_v31 = vshll.u32 %v198_v22, 16  ;;  %v305_v43 = vrot.slane %v304_v26, 1  ;;  %v1649_v55 = vld [vmem:[%s2013_s1 + $0x90] sm:$0xff]  ;;  %v1656_v0 = vld [vmem:[%s2013_s1 + $0xc8] sm:$0xff] }
  0x17   : > { %284 = vmatpush.bf16.msra.mxu1 %v1632_v10  ;;  %v1643_v29 = vld [vmem:[%s2013_s1 + $0x60] sm:$0xff]  ;;  %v1653_v58 = vld [vmem:[%s2013_s1 + $0xb0] sm:$0xff]  ;;  %v556_v61 = vpack.c.b16 %v1829_v52, %v1829_v52  ;;  %v1648_v1 = vld [vmem:[%s2013_s1 + $0x88] sm:$0xff]  ;;  %v430_v2 = vshrl.u32 %v428_v56, 16  ;;  %v433_v3 = vshll.u32 %v428_v56, 16 }
  0x18   : > { %339 = vmatpush.bf16.msra.mxu2 %v1640_v11  ;;  %v363_v32 = vshrl.u32 %v361_v27, 16  ;;  %v366_v33 = vshll.u32 %v361_v27, 16  ;;  %v204_v37 = vrot.slane %v202_v31, 1  ;;  %v1819_v42 = vld [vmem:[%s1784_s13 + $0x4] sm:$0xff]   ;;  %v1661_v59 = vld [vmem:[%s2013_s1 + $0xf0] sm:$0xff]  ;;  %v1674_v14 = vld [vmem:[%s2013_s1 + $0x158] sm:$0xff] }
  0x19   : > { %403 = vmatpush.bf16.msra.mxu3 %v1644_v15  ;;  %v553_v51 = vunpack.c.l.b16 %v1819_v42  ;;  %v480_v60 = vld [vmem:[%s1784_s13] sm:$0x8]  ;;  %v1652_v5 = vld [vmem:[%s2013_s1 + $0xa8] sm:$0xff]  ;;  %v567_v9 = vshll.u32 %v556_v61, 16  ;;  %v432_v12 = vrot.slane %v430_v2, 2  ;;  %v435_v13 = vrot.slane %v433_v3, 3 }
  0x1a   : > { %241 = vmatpush.bf16.msra.mxu0 %v1635_v24  ;;  %v365_v44 = vrot.slane %v363_v32, 1  ;;  %v368_v45 = vrot.slane %v366_v33, 2  ;;  %v205_v48 = vor.u32 %v204_v37, %v200_v30  ;;  %v491_v4 = vunpack.c.l.b16 %v480_v60  ;;  %v1660_v6 = vld [vmem:[%s2013_s1 + $0xe8] sm:$0xff]  ;;  %v1655_v10 = vld [vmem:[%s2013_s1 + $0xc0] sm:$0xff]  ;;  %v1666_v15 = vld [vmem:[%s2013_s1 + $0x118] sm:$0xff] }
  0x1b   : > { %285 = vmatpush.bf16.msra.mxu1 %v1631_v25  ;;  %v555_v57 = vpack.c.b16 %v553_v51, %v552_v47  ;;  %v1647_v11 = vld [vmem:[%s2013_s1 + $0x80] sm:$0xff]  ;;  %v569_v20 = vrot.slane %v567_v9, 4  ;;  %v727_v22 = vld [vmem:[%s1784_s13 + $0x8] sm:$0x7]  ;;  %v1670_v23 = vld [vmem:[%s2013_s1 + $0x138] sm:$0xff]  ;;  %v436_v26 = vor.u32 %v435_v13, %v432_v12  ;;  %v623_v32 = vpack.c.b16 %v1829_v52, %v553_v51 }
  0x1c   : > { %340 = vmatpush.bf16.msra.mxu2 %v1639_v28  ;;  %v369_v53 = vor.u32 %v368_v45, %v365_v44  ;;  %v1651_v16 = vld [vmem:[%s2013_s1 + $0xa0] sm:$0xff]  ;;  %v492_v17 = vpack.c.b16 %v427_v40, %v491_v4  ;;  %v1678_v24 = vld [vmem:[%s2013_s1 + $0x178] sm:$0xff]  ;;  %v1673_v27 = vld [vmem:[%s2013_s1 + $0x150] sm:$0xff]  ;;  %v738_v30 = vunpack.c.l.b16 %v727_v22 }
  0x1d   : > { %404 = vmatpush.bf16.msra.mxu3 %v1643_v29  ;;  %1259 = vmatmul.msk.bf16.vlgmr.msra.gmra.mxu0 %vm230_vm0, %v205_v48  ;;  %v559_v62 = vshrl.u32 %v555_v57, 16  ;;  %v562_v63 = vshll.u32 %v555_v57, 16  ;;  %v1659_v18 = vld [vmem:[%s2013_s1 + $0xe0] sm:$0xff]  ;;  %v1665_v33 = vld [vmem:[%s2013_s1 + $0x110] sm:$0xff]  ;;  %v668_v39 = vld [vmem:[%s1784_s13 + $0x8] sm:$0x3] }
  0x1e   : > { %468 = vmatpush.bf16.msrb.mxu0 %v1650_v35  ;;  %1276 = vmatmul.msk.bf16.vlgmr.msra.gmra.mxu1 %vm230_vm0, %v250_v38  ;;  %v667_v21 = vld [vmem:[%s1784_s13 + $0x4] sm:$0xe]  ;;  %v493_v28 = vrot.slane %v492_v17, 3  ;;  %v859_v35 = vunpack.c.h.b16 %v1819_v42  ;;  %v1669_v36 = vld [vmem:[%s2013_s1 + $0x130] sm:$0xff]  ;;  %v1672_v38 = vld [vmem:[%s2013_s1 + $0x148] sm:$0xff]  ;;  %v681_v46 = vunpack.c.l.b16 %v668_v39 }
  0x1f   : > { %1301 = vmatmul.msk.bf16.vlgmr.msra.gmra.mxu2 %vm230_vm0, %v305_v43  ;;  %525 = vmatpush.bf16.msrb.mxu1 %v1654_v49  ;;  %v561_v7 = vrot.slane %v559_v62, 3  ;;  %v564_v8 = vrot.slane %v562_v63, 4  ;;  %v791_v25 = vld [vmem:[%s1784_s13 + $0x4] sm:$0xc]  ;;  %v680_v29 = vunpack.c.l.b16 %v667_v21  ;;  %v1677_v37 = vld [vmem:[%s2013_s1 + $0x170] sm:$0xff]  ;;  %v1664_v41 = vld [vmem:[%s2013_s1 + $0x108] sm:$0xff] }
  0x20   : > { %602 = vmatpush.bf16.msrb.mxu2 %v1658_v34  ;;  %1326 = vmatmul.msk.bf16.vlgmr.msra.gmra.mxu3 %vm230_vm0, %v369_v53  ;;  %v802_v34 = vunpack.c.l.b16 %v791_v25  ;;  %v1668_v43 = vld [vmem:[%s2013_s1 + $0x128] sm:$0xff]  ;;  %v1671_v45 = vld [vmem:[%s2013_s1 + $0x140] sm:$0xff]  ;;  %v1686_v60 = vld [vmem:[%s2013_s1 + $0x1b8] sm:$0xff] }
  0x21   : > { %655 = vmatpush.bf16.msrb.mxu3 %v1662_v50  ;;  %v565_v19 = vor.u32 %v564_v8, %v561_v7  ;;  %v739_v40 = vpack.c.b16 %v738_v30, %v680_v29  ;;  %v1676_v44 = vld [vmem:[%s2013_s1 + $0x168] sm:$0xff]  ;;  %v1663_v47 = vld [vmem:[%s2013_s1 + $0x100] sm:$0xff]  ;;  %v1690_v50 = vld [vmem:[%s2013_s1 + $0x1d8] sm:$0xff]  ;;  %v682_v57 = vpack.c.b16 %v681_v46, %v680_v29 }
  0x22   : > { %469 = vmatpush.bf16.msrb.mxu0 %v1649_v55  ;;  %v860_v42 = vpack.c.b16 %v859_v35, %v802_v34  ;;  %v912_v53 = vld [vmem:[%s1784_s13 + $0x4] sm:$0x8]  ;;  %v1694_v63 = vld [vmem:[%s2013_s1 + $0x1f8] sm:$0xff]  ;;  %v1685_v9 = vld [vmem:[%s2013_s1 + $0x1b0] sm:$0xff] }
  0x23   : > { %526 = vmatpush.bf16.msrb.mxu1 %v1653_v58  ;;  %v570_v31 = vsel %vm557_vm1, %v565_v19, %v569_v20  ;;  %v741_v48 = vshrl.u32 %v739_v40, 16  ;;  %v744_v49 = vshll.u32 %v739_v40, 16  ;;  %v1667_v55 = vld [vmem:[%s2013_s1 + $0x120] sm:$0xff]  ;;  %v803_v58 = vpack.c.b16 %v738_v30, %v802_v34  ;;  %v1688_v17 = vld [vmem:[%s2013_s1 + $0x1c8] sm:$0xff] }
  0x24   : > { %603 = vmatpush.bf16.msrb.mxu2 %v1657_v54  ;;  %v862_v51 = vshrl.u32 %v860_v42, 16  ;;  %v865_v52 = vshll.u32 %v860_v42, 16  ;;  %v913_v54 = vld [vmem:[%s1784_s13 + $0x8] sm:$0xf]  ;;  %v1675_v56 = vld [vmem:[%s2013_s1 + $0x160] sm:$0xff]  ;;  %v683_v7 = vrot.slane %v682_v57, 1 }
  0x25   : > { %656 = vmatpush.bf16.msrb.mxu3 %v1661_v59  ;;  %v1682_v59 = vld [vmem:[%s2013_s1 + $0x198] sm:$0xff]  ;;  %v743_v61 = vrot.slane %v741_v48, 1  ;;  %v746_v62 = vrot.slane %v744_v49, 2  ;;  %v1954_v2 = vunpack.c.l.b16 %v913_v54  ;;  %v804_v8 = vrot.slane %v803_v58, 2  ;;  %v1687_v25 = vld [vmem:[%s2013_s1 + $0x1c0] sm:$0xff] }
  0x26   : > { %470 = vmatpush.bf16.msrb.mxu0 %v1648_v1  ;;  %v927_v1 = vunpack.c.l.b16 %v912_v53  ;;  %v864_v3 = vrot.slane %v862_v51, 2  ;;  %v867_v4 = vrot.slane %v865_v52, 3  ;;  %v1691_v34 = vld [vmem:[%s2013_s1 + $0x1e0] sm:$0xff] }
  0x27   : > { %527 = vmatpush.bf16.msrb.mxu1 %v1652_v5  ;;  %v914_v5 = vld [vmem:[%s1784_s13 + $0xc] sm:$0x1] }
  0x28   : > { %604 = vmatpush.bf16.msrb.mxu2 %v1656_v0  ;;  %v1689_v0 = vld [vmem:[%s2013_s1 + $0x1d0] sm:$0xff]  ;;  %v930_v12 = vpack.c.b16 %v1954_v2, %v927_v1 }
  0x29   : > { %657 = vmatpush.bf16.msrb.mxu3 %v1660_v6  ;;  %v1041_v6 = vld [vmem:[%s1784_s13 + $0xc] sm:$0x3] }
  0x2a   : > { %471 = vmatpush.bf16.msrb.mxu0 %v1647_v11  ;;  %v929_v11 = vunpack.c.l.b16 %v914_v5  ;;  %v1052_v13 = vunpack.c.l.b16 %v1041_v6  ;;  %v933_v20 = vshrl.u32 %v930_v12, 16  ;;  %v936_v21 = vshll.u32 %v930_v12, 16 }
  0x2b   : > { %528 = vmatpush.bf16.msrb.mxu1 %v1651_v16  ;;  %v1693_v16 = vld [vmem:[%s2013_s1 + $0x1f0] sm:$0xff] }
  0x2c   : > { %605 = vmatpush.bf16.msrb.mxu2 %v1655_v10  ;;  %v747_v10 = vor.u32 %v746_v62, %v743_v61  ;;  %v931_v19 = vpack.c.b16 %v929_v11, %v929_v11  ;;  %v1053_v22 = vpack.c.b16 %v1052_v13, %v1954_v2  ;;  %v938_v29 = vrot.slane %v936_v21, 4 }
  0x2d   : > { %658 = vmatpush.bf16.msrb.mxu3 %v1659_v18  ;;  %1351 = vmatmul.msk.bf16.vlgmr.msrb.gmra.mxu0 %vm230_vm0, %v436_v26  ;;  %v1684_v18 = vld [vmem:[%s2013_s1 + $0x1a8] sm:$0xff] }
  0x2e   : > { %715 = vmatpush.bf16.msra.mxu0 %v1666_v15  ;;  %1376 = vmatmul.msk.bf16.vlgmr.msrb.gmra.mxu1 %vm230_vm0, %v493_v28  ;;  %v1681_v15 = vld [vmem:[%s2013_s1 + $0x190] sm:$0xff]  ;;  %v1104_v26 = vld [vmem:[%s1784_s13 + $0x8] sm:$0xe]  ;;  %v935_v28 = vrot.slane %v933_v20, 3  ;;  %v941_v30 = vshll.u32 %v931_v19, 16 }
  0x2f   : > { %779 = vmatpush.bf16.msra.mxu1 %v1670_v23  ;;  %1401 = vmatmul.msk.bf16.vlgmr.msrb.gmra.mxu2 %vm230_vm0, %v570_v31  ;;  %v1680_v23 = vld [vmem:[%s2013_s1 + $0x188] sm:$0xff]  ;;  %v1057_v31 = vshll.u32 %v1053_v22, 16 }
  0x30   : > { %836 = vmatpush.bf16.msra.mxu2 %v1674_v14  ;;  %1426 = vmatmul.msk.bf16.vlgmr.msrb.gmra.mxu3 %vm230_vm0, %v623_v32  ;;  %v868_v14 = vor.u32 %v867_v4, %v864_v3  ;;  %v1679_v32 = vld [vmem:[%s2013_s1 + $0x180] sm:$0xff]  ;;  %v939_v35 = vor.u32 %v938_v29, %v935_v28 }
  0x31   : > { %900 = vmatpush.bf16.msra.mxu3 %v1678_v24  ;;  %v1692_v24 = vld [vmem:[%s2013_s1 + $0x1e8] sm:$0xff] }
  0x32   : > { %716 = vmatpush.bf16.msra.mxu0 %v1665_v33  ;;  %v1115_v33 = vunpack.c.l.b16 %v1104_v26 }
  0x33   : > { %780 = vmatpush.bf16.msra.mxu1 %v1669_v36  ;;  %v943_v36 = vrot.slane %v941_v30, 4 }
  0x34   : > { %837 = vmatpush.bf16.msra.mxu2 %v1673_v27  ;;  %v1683_v27 = vld [vmem:[%s2013_s1 + $0x1a0] sm:$0xff]  ;;  %v1116_v39 = vpack.c.b16 %v1052_v13, %v1115_v33 }
  0x35   : > { %901 = vmatpush.bf16.msra.mxu3 %v1677_v37  ;;  %v1055_v37 = vshrl.u32 %v1053_v22, 16  ;;  %v944_v40 = vsel %vm557_vm1, %v939_v35, %v943_v36  ;;  %v1703_v33 = vld [vmem:[#allocation2] ss:$0 sm:$0xff] }
  0x36   : > { %717 = vmatpush.bf16.msra.mxu0 %v1664_v41  ;;  %v997_v41 = vpack.c.b16 %v929_v11, %v1954_v2 }
  0x37   : > { %781 = vmatpush.bf16.msra.mxu1 %v1668_v43  ;;  %v1117_v43 = vrot.slane %v1116_v39, 1 }
  0x38   : > { %838 = vmatpush.bf16.msra.mxu2 %v1672_v38  ;;  %v1059_v38 = vrot.slane %v1057_v31, 1 }
  0x39   : > { %902 = vmatpush.bf16.msra.mxu3 %v1676_v44 }
  0x3a   : > { %718 = vmatpush.bf16.msra.mxu0 %v1663_v47  ;;  %v1060_v42 = vor.u32 %v1059_v38, %v1055_v37 }
  0x3b   : > { %782 = vmatpush.bf16.msra.mxu1 %v1667_v55 }
  0x3c   : > { %839 = vmatpush.bf16.msra.mxu2 %v1671_v45 }
  0x3d   : > { %903 = vmatpush.bf16.msra.mxu3 %v1675_v56  ;;  %1451 = vmatmul.msk.bf16.vlgmr.msra.gmra.mxu0 %vm230_vm0, %v683_v7 }
  0x3e   : > { %976 = vmatpush.bf16.msrb.mxu0 %v1682_v59  ;;  %1476 = vmatmul.msk.bf16.vlgmr.msra.gmra.mxu1 %vm230_vm0, %v747_v10 }
  0x3f   : > { %1029 = vmatpush.bf16.msrb.mxu1 %v1686_v60  ;;  %1501 = vmatmul.msk.bf16.vlgmr.msra.gmra.mxu2 %vm230_vm0, %v804_v8 }
  0x40   : > { %1092 = vmatpush.bf16.msrb.mxu2 %v1690_v50  ;;  %1526 = vmatmul.msk.bf16.vlgmr.msra.gmra.mxu3 %vm230_vm0, %v868_v14 }
  0x41   : > { %1149 = vmatpush.bf16.msrb.mxu3 %v1694_v63 }
  0x42   : > { %977 = vmatpush.bf16.msrb.mxu0 %v1681_v15 }
  0x43   : > { %1030 = vmatpush.bf16.msrb.mxu1 %v1685_v9 }
  0x44   : > { %1093 = vmatpush.bf16.msrb.mxu2 %v1689_v0 }
  0x45   : > { %1150 = vmatpush.bf16.msrb.mxu3 %v1693_v16 }
  0x46   : > { %978 = vmatpush.bf16.msrb.mxu0 %v1680_v23 }
  0x47   : > { %1031 = vmatpush.bf16.msrb.mxu1 %v1684_v18 }
  0x48   : > { %1094 = vmatpush.bf16.msrb.mxu2 %v1688_v17 }
  0x49   : > { %1151 = vmatpush.bf16.msrb.mxu3 %v1692_v24 }
  0x4a   : > { %979 = vmatpush.bf16.msrb.mxu0 %v1679_v32 }
  0x4b   : > { %1032 = vmatpush.bf16.msrb.mxu1 %v1683_v27 }
  0x4c   : > { %1095 = vmatpush.bf16.msrb.mxu2 %v1687_v25 }
  0x4d   : > { %1152 = vmatpush.bf16.msrb.mxu3 %v1691_v34  ;;  %1551 = vmatmul.msk.bf16.vlgmr.msrb.gmra.mxu0 %vm230_vm0, %v944_v40 }
  0x4e   : > { %1576 = vmatmul.msk.bf16.vlgmr.msrb.gmra.mxu1 %vm230_vm0, %v997_v41 }
  0x4f   : > { %1601 = vmatmul.msk.bf16.vlgmr.msrb.gmra.mxu2 %vm230_vm0, %v1060_v42 }
  0x50   : > { %1626 = vmatmul.msk.bf16.vlgmr.msrb.gmra.mxu3 %vm230_vm0, %v1117_v43 }
  0x9a   : > { %v243_v44 = vpop.f32.mrf.mxu0 }
  0x9b   : > { %v287_v45 = vpop.f32.mrf.mxu1 }
  0x9c   : > { %v288_v54 = vadd.f32 %v287_v45, %v243_v44 }
  0xa2   : > { %v342_v46 = vpop.f32.mrf.mxu2  ;;  %v245_v48 = vpop.f32.mrf.mxu0 }
  0xa3   : > { %v406_v47 = vpop.f32.mrf.mxu3  ;;  %v289_v49 = vpop.f32.mrf.mxu1  ;;  %v347_v55 = vadd.f32 %v342_v46, %v288_v54 }
  0xa4   : > { %v290_v61 = vadd.f32 %v289_v49, %v245_v48 }
  0xa5   : > { %v411_v57 = vadd.f32 %v406_v47, %v347_v55 }
  0xaa   : > { %v344_v50 = vpop.f32.mrf.mxu2  ;;  %v473_v52 = vpop.f32.mrf.mxu0 }
  0xab   : > { %v408_v51 = vpop.f32.mrf.mxu3  ;;  %v530_v53 = vpop.f32.mrf.mxu1  ;;  %v478_v62 = vadd.f32 %v473_v52, %v411_v57  ;;  %v348_v63 = vadd.f32 %v344_v50, %v290_v61 }
  0xad   : > { %v535_v0 = vadd.f32 %v530_v53, %v478_v62  ;;  %v412_v2 = vadd.f32 %v408_v51, %v348_v63 }
  0xb2   : > { %v607_v56 = vpop.f32.mrf.mxu2  ;;  %v475_v59 = vpop.f32.mrf.mxu0 }
  0xb3   : > { %v660_v58 = vpop.f32.mrf.mxu3  ;;  %v532_v60 = vpop.f32.mrf.mxu1  ;;  %v612_v3 = vadd.f32 %v607_v56, %v535_v0  ;;  %v479_v7 = vadd.f32 %v475_v59, %v412_v2 }
  0xb5   : > { %v665_v8 = vadd.f32 %v660_v58, %v612_v3  ;;  %v536_v9 = vadd.f32 %v532_v60, %v479_v7 }
  0xba   : > { %v609_v1 = vpop.f32.mrf.mxu2  ;;  %v720_v5 = vpop.f32.mrf.mxu0 }
  0xbb   : > { %v662_v4 = vpop.f32.mrf.mxu3  ;;  %v784_v6 = vpop.f32.mrf.mxu1  ;;  %v725_v10 = vadd.f32 %v720_v5, %v665_v8  ;;  %v613_v12 = vadd.f32 %v609_v1, %v536_v9 }
  0xbd   : > { %v789_v16 = vadd.f32 %v784_v6, %v725_v10  ;;  %v666_v17 = vadd.f32 %v662_v4, %v613_v12 }
  0xc2   : > { %v841_v11 = vpop.f32.mrf.mxu2  ;;  %v722_v14 = vpop.f32.mrf.mxu0 }
  0xc3   : > { %v905_v13 = vpop.f32.mrf.mxu3  ;;  %v786_v15 = vpop.f32.mrf.mxu1  ;;  %v846_v18 = vadd.f32 %v841_v11, %v789_v16  ;;  %v726_v19 = vadd.f32 %v722_v14, %v666_v17 }
  0xc5   : > { %v910_v21 = vadd.f32 %v905_v13, %v846_v18  ;;  %v790_v24 = vadd.f32 %v786_v15, %v726_v19 }
  0xca   : > { %v843_v20 = vpop.f32.mrf.mxu2  ;;  %v981_v23 = vpop.f32.mrf.mxu0 }
  0xcb   : > { %v907_v22 = vpop.f32.mrf.mxu3  ;;  %v986_v25 = vadd.f32 %v981_v23, %v910_v21  ;;  %v1034_v26 = vpop.f32.mrf.mxu1  ;;  %v847_v27 = vadd.f32 %v843_v20, %v790_v24 }
  0xcd   : > { %v1039_v28 = vadd.f32 %v1034_v26, %v986_v25  ;;  %v911_v30 = vadd.f32 %v907_v22, %v847_v27 }
  0xd2   : > { %v1097_v29 = vpop.f32.mrf.mxu2  ;;  %v983_v34 = vpop.f32.mrf.mxu0 }
  0xd3   : > { %v1102_v31 = vadd.f32 %v1097_v29, %v1039_v28  ;;  %v1154_v32 = vpop.f32.mrf.mxu3  ;;  %v987_v36 = vadd.f32 %v983_v34, %v911_v30  ;;  %v1036_v38 = vpop.f32.mrf.mxu1 }
  0xd5   : > { %v1159_v35 = vadd.f32 %v1154_v32, %v1102_v31  ;;  %v1040_v39 = vadd.f32 %v1036_v38, %v987_v36 }
  0xd7   : > { %v1165_v37 = vadd.f32 %v1703_v33, %v1159_v35 }
  0xd9   : > { %1168 = vst.msk [vmem:[%s172_s26] sm:$0xff] %vm1167_vm2, %v1165_v37 }
  0xda   : > { %v1099_v40 = vpop.f32.mrf.mxu2 }
  0xdb   : > { %v1103_v41 = vadd.f32 %v1099_v40, %v1040_v39  ;;  %v1156_v42 = vpop.f32.mrf.mxu3 }
  0xdd   : > { %v1160_v43 = vadd.f32 %v1156_v42, %v1103_v41 }
  0xdf   : > { %v1166_v44 = vadd.f32 %v1703_v33, %v1160_v43 }
  0xe1   : > { %1170 = vst.msk [vmem:[%s172_s26 + $0x8] sm:$0x3] %vm1169_vm3, %v1166_v44 }
  0xe2 PF: > { %s15_s14 = sadd.s32 1, %s1710_s14  }
  0xe3   : > { %p12_p4 = scmp.ge.s32.totalorder %s15_s14, 4  }
  0xe5   :  { %14 = sbr.rel (!%p12_p4) target bundleno = 3 (0x3), region = 77 }

</bundles_post_ra>
